<compile_context>
chip_gen: v6e
topology: v6e:2x2x1
jax: 0.10.0
libtpu: 0.0.40
codegen_flags: <defaults>
</compile_context>

<pallas_src>
import functools

import numpy as np
import jax
import jax.numpy as jnp
from jax import lax
from jax.experimental import pallas as pl
from jax.experimental.pallas import tpu as pltpu


def _round_up(x, m):
    return ((x + m - 1) // m) * m


def _neighbor_offsets(kernel_size, dilation):
    """(dy, dx) offsets of unfold_wo_center, in F.unfold channel order."""
    k, d = kernel_size, dilation
    pad = d * (k - 1) // 2
    offs = []
    for ky in range(k):
        for kx in range(k):
            if ky == k // 2 and kx == k // 2:
                continue
            offs.append((ky * d - pad, kx * d - pad))
    return tuple(offs)


def _neighbor_validity(offsets, H, W):
    """Host-side (K8, H*W) mask: neighbor lies inside the image (F.unfold zero-pad)."""
    pos = np.arange(H * W)
    hh, ww = pos // W, pos % W
    return np.stack(
        [((hh + dy >= 0) & (hh + dy < H) & (ww + dx >= 0) & (ww + dx < W))
         for (dy, dx) in offsets]).astype(np.float32)


# ----------------------------------------------------------------------------- #
# Pallas kernel: per-batch matching cost, HW chunk = reduction (last) grid axis
# ----------------------------------------------------------------------------- #
def _cost_kernel(logits_ref,    # (1, Qp, Ccls)   classification logits (Q padded to 8)
                 onehot_ref,    # (1, Ccls, Gp)   one-hot(labels)^T (G padded to 16)
                 maskwin_ref,   # (1, 1, Qp, WWIN) pred-mask logits, halo window of chunk
                 tbin_ref,      # (1, K8, Gp, CHW) bf16: (sim>=thr)*box_mask*valid
                 invden_ref,    # (1, 1, Gp)       w_pw*warm / clamp(sum tbin, 1)
                 spw_ref,       # (1, Qp, H)       pred proj (max over W)
                 sph_ref,       # (1, Qp, W)       pred proj (max over H)
                 tpw_ref,       # (1, Gp, H)       GT proj  (max over W)
                 tph_ref,       # (1, Gp, W)       GT proj  (max over H)
                 cost_ref,      # out: (1, Qp, Gp)
                 lfw_ref,       # scratch (Qp, WWIN) logsigmoid(x) on halo window
                 num_acc,       # scratch (Qp, Gp)   pairwise numerator accumulator
                 *, w_class, w_proj, offsets, img_w, pad_l, chw):
    f32 = jnp.float32
    c = pl.program_id(1)
    nc = pl.num_programs(1)

    @pl.when(c == 0)
    def _init():
        num_acc[...] = jnp.zeros_like(num_acc)

    # ---- pairwise (color-similarity) cost: partial sums for this HW chunk ----
    mw = maskwin_ref.at[0, 0]                                    # (Qp, WWIN) view
    xw = mw[...]
    # stable logsigmoid(x), computed once per halo window
    lfw_ref[...] = jnp.minimum(xw, 0.0) - jnp.log1p(jnp.exp(-jnp.abs(xw)))

    x_c = mw[:, pad_l:pad_l + chw]                               # center logits
    lf_c = lfw_ref[:, pad_l:pad_l + chw]                         # center logsigmoid

    num_c = jnp.zeros(num_acc.shape, f32)
    for j, (dy, dx) in enumerate(offsets):
        o = pad_l + dy * img_w + dx                              # static lane offset
        # TODO(synk): if bundle dumps show vld/XLU saturation from these unaligned
        # slices, switch to pltpu.roll(window, -o) + an aligned leading slice.
        x_n = mw[:, o:o + chw]
        lf_n = lfw_ref[:, o:o + chw]
        s = x_c + x_n
        # -log P(same) = logsigmoid(x_c + x_n) - logsigmoid(x_c) - logsigmoid(x_n)
        src = (jnp.minimum(s, 0.0) - jnp.log1p(jnp.exp(-jnp.abs(s)))) - lf_c - lf_n
        tb = tbin_ref[0, j]                                      # (Gp, CHW) bf16
        num_c = num_c + lax.dot_general(
            src.astype(jnp.bfloat16), tb, (((1,), (1,)), ((), ())),
            preferred_element_type=f32)                          # (Qp, Gp)
    num_acc[...] += num_c

    # ---- last reduction step: add class + projection costs, combine, store ---
    @pl.when(c == nc - 1)
    def _finalize():
        # classification: -softmax(logits)[:, tgt_ids] via one-hot matmul
        logits = logits_ref[0]                                   # (Qp, Ccls)
        z = logits - jnp.max(logits, axis=-1, keepdims=True)
        ez = jnp.exp(z)
        prob = ez / jnp.sum(ez, axis=-1, keepdims=True)
        cost_class = -jnp.dot(prob, onehot_ref[0],
                              preferred_element_type=f32)        # (Qp, Gp)

        # projection cost: dice on per-axis max projections (maxes hoisted)
        def dice(src_proj, tgt_proj):
            sgm = 1.0 / (1.0 + jnp.exp(-src_proj))
            num = 2.0 * lax.dot_general(sgm, tgt_proj, (((1,), (1,)), ((), ())),
                                        preferred_element_type=f32)
            den = (jnp.sum(sgm, axis=-1, keepdims=True)
                   + jnp.sum(tgt_proj, axis=-1)[None, :])
            return 1.0 - (num + 1.0) / (den + 1.0)

        cost_proj = (dice(spw_ref[0], tpw_ref[0])                # projection over W
                     + dice(sph_ref[0], tph_ref[0]))             # projection over H

        # pairwise weight & warm-up factor are folded into invden in the wrapper
        cost_pw = num_acc[...] * invden_ref[0]                   # (Qp,Gp)*(1,Gp)
        cost_ref[0] = (w_class * cost_class + w_proj * cost_proj
                       + cost_pw).astype(cost_ref.dtype)


def _matcher_costs_pallas(logits, onehot, mask_win, tbin, invden,
                          spw, sph, tpw, tph, *, w_class, w_proj,
                          offsets, img_w, pad_l, chw):
    B, Qp, Ccls = logits.shape
    Gp = onehot.shape[-1]
    nC, wwin = mask_win.shape[1], mask_win.shape[3]
    K8 = tbin.shape[1]
    H = spw.shape[-1]
    W = sph.shape[-1]

    kernel = functools.partial(
        _cost_kernel, w_class=w_class, w_proj=w_proj,
        offsets=offsets, img_w=img_w, pad_l=pad_l, chw=chw)

    return pl.pallas_call(
        kernel,
        out_shape=jax.ShapeDtypeStruct((B, Qp, Gp), jnp.float32),
        grid=(B, nC),
        in_specs=[
            pl.BlockSpec((1, Qp, Ccls), lambda b, c: (b, 0, 0)),         # logits
            pl.BlockSpec((1, Ccls, Gp), lambda b, c: (b, 0, 0)),         # one-hot^T
            pl.BlockSpec((1, 1, Qp, wwin), lambda b, c: (b, c, 0, 0)),   # mask halo windows
            pl.BlockSpec((1, K8, Gp, chw), lambda b, c: (b, 0, 0, c)),   # pre-thresholded targets
            pl.BlockSpec((1, 1, Gp), lambda b, c: (b, 0, 0)),            # scaled 1/denominator
            pl.BlockSpec((1, Qp, H), lambda b, c: (b, 0, 0)),            # src proj W
            pl.BlockSpec((1, Qp, W), lambda b, c: (b, 0, 0)),            # src proj H
            pl.BlockSpec((1, Gp, H), lambda b, c: (b, 0, 0)),            # tgt proj W
            pl.BlockSpec((1, Gp, W), lambda b, c: (b, 0, 0)),            # tgt proj H
        ],
        out_specs=pl.BlockSpec((1, Qp, Gp), lambda b, c: (b, 0, 0)),
        scratch_shapes=[
            pltpu.VMEM((Qp, wwin), jnp.float32),   # logsigmoid(x) on halo window
            pltpu.VMEM((Qp, Gp), jnp.float32),     # pairwise numerator accumulator
        ],
        compiler_params=pltpu.CompilerParams(
            dimension_semantics=("parallel", "arbitrary"),
            vmem_limit_bytes=48 * 1024 * 1024),
    )(logits, onehot, mask_win, tbin, invden, spw, sph, tpw, tph)


# ----------------------------------------------------------------------------- #
# Wrapper (pure data movement / layout): padding, windows, one-hot, projections
# ----------------------------------------------------------------------------- #
class HungarianMatcherProjPairPallas:
    def __init__(self, cost_class=1.0, cost_projection=1.0, cost_pairwise=1.0,
                 pairwise_size=3, pairwise_dilation=2, pairwise_color_thresh=0.3,
                 pairwise_warmup_iters=10000):
        assert cost_class != 0 or cost_projection != 0 or cost_pairwise != 0
        self.cost_class = cost_class
        self.cost_projection = cost_projection
        self.cost_pairwise = cost_pairwise
        self.pairwise_size = pairwise_size
        self.pairwise_dilation = pairwise_dilation
        self.pairwise_color_thresh = pairwise_color_thresh
        self.pairwise_warmup_iters = pairwise_warmup_iters
        self._iter = 0  # mirrors the registered "_iter" buffer

    def forward(self, outputs, targets):
        self._iter += 1
        warm = min(self._iter / float(self.pairwise_warmup_iters), 1.0)

        pred_logits = outputs["pred_logits"].astype(jnp.float32)      # (B, Q, Ccls)
        pred_masks = outputs["pred_masks"].astype(jnp.float32)        # (B, Q, H, W)
        B, Q, Ccls = pred_logits.shape
        H, W = pred_masks.shape[-2:]
        HW = H * W

        # synthetic path assumes equal #GT per image so targets stack into (B, G, ...)
        labels = jnp.stack([t["labels"] for t in targets])            # (B, G) int
        box_masks = jnp.stack([t["box_masks"] for t in targets]).astype(jnp.float32)
        color_sim = jnp.stack([t["images_color_similarity"]
                               for t in targets]).astype(jnp.float32)  # (B, G, K8, H, W)
        G = labels.shape[1]
        offsets = _neighbor_offsets(self.pairwise_size, self.pairwise_dilation)
        K8 = len(offsets)

        # padding / tiling choices
        Qp = _round_up(Q, 8)              # f32 sublane minimum for query tiles
        Gp = _round_up(max(G, 1), 16)     # bf16 sublane minimum for the target stream
        HWp = _round_up(HW, 512)          # pad HW; never one giant chunk
        chw = 1024 if HWp % 1024 == 0 else 512
        nC = HWp // chw
        qpad, gpad = Qp - Q, Gp - G

        # halo window geometry for the flattened pred-mask logits
        S = max(abs(dy * W + dx) for (dy, dx) in offsets)
        pad_l = S
        wwin = _round_up(chw + 2 * S, 128)

        # ---- classification inputs ----
        logits = jnp.pad(pred_logits, ((0, 0), (0, qpad), (0, 0)))     # (B, Qp, Ccls)
        onehot = jnp.transpose(jax.nn.one_hot(labels, Ccls, dtype=jnp.float32),
                               (0, 2, 1))
        onehot = jnp.pad(onehot, ((0, 0), (0, 0), (0, gpad)))          # (B, Ccls, Gp)

        # ---- axis-projection maxes (tiny; hoisted out of kernel) ----
        spw = jnp.pad(jnp.max(pred_masks, axis=3), ((0, 0), (0, qpad), (0, 0)))
        sph = jnp.pad(jnp.max(pred_masks, axis=2), ((0, 0), (0, qpad), (0, 0)))
        tpw = jnp.pad(jnp.max(box_masks, axis=3), ((0, 0), (0, gpad), (0, 0)))
        tph = jnp.pad(jnp.max(box_masks, axis=2), ((0, 0), (0, gpad), (0, 0)))

        # ---- pairwise targets: pre-thresholded, validity-masked, bf16 stream ----
        valid = jnp.asarray(_neighbor_validity(offsets, H, W))        # (K8, HW)
        tbin = (color_sim >= self.pairwise_color_thresh).astype(jnp.float32) \
            * box_masks[:, :, None, :, :]                             # (B, G, K8, H, W)
        den = jnp.sum(tbin.reshape(B, G, -1), axis=-1)                # (B, G), unmasked
        invden = (float(self.cost_pairwise) * warm) / jnp.maximum(den, 1.0)
        invden = jnp.pad(invden, ((0, 0), (0, gpad)))[:, None, :]     # (B, 1, Gp)

        tbin_num = jnp.transpose(tbin, (0, 2, 1, 3, 4)).reshape(B, K8, G, HW)
        tbin_num = tbin_num * valid[None, :, None, :]                 # fold unfold zero-pad
        tbin_num = jnp.pad(tbin_num, ((0, 0), (0, 0), (0, gpad), (0, HWp - HW)))
        tbin_num = tbin_num.astype(jnp.bfloat16)                      # (B, K8, Gp, HWp)

        # ---- pred-mask halo windows (one per HW chunk) ----
        mask_flat = jnp.pad(pred_masks.reshape(B, Q, HW), ((0, 0), (0, qpad), (0, 0)))
        rpad = (HWp - HW) + (wwin - chw - pad_l)
        mask_padded = jnp.pad(mask_flat, ((0, 0), (0, 0), (pad_l, rpad)))
        # TODO(synk): this materializes overlapping windows ((chw+2S)/chw duplication);
        # an element-offset index_map could DMA them straight from the padded flat mask.
        mask_win = jnp.stack(
            [mask_padded[:, :, c * chw: c * chw + wwin] for c in range(nC)],
            axis=1)                                                    # (B, nC, Qp, wwin)

        C_pad = _matcher_costs_pallas(
            logits, onehot, mask_win, tbin_num, invden, spw, sph, tpw, tph,
            w_class=float(self.cost_class), w_proj=float(self.cost_projection),
            offsets=offsets, img_w=W, pad_l=pad_l, chw=chw)
        C = C_pad[:, :Q, :G]                                           # drop padding

        # TODO(synk): scipy.optimize.linear_sum_assignment (Hungarian algorithm) has
        # no clean Pallas equivalent; it remains a host-side op (None if scipy missing).
        indices = []
        C_host = np.asarray(C)
        try:
            from scipy.optimize import linear_sum_assignment
            for b in range(B):
                i, j = linear_sum_assignment(C_host[b])
                indices.append((np.asarray(i, np.int64), np.asarray(j, np.int64)))
        except Exception:
            indices = [None] * B
        return indices, C


# ----------------------------------------------------------------------------- #
# Pure-JAX reference (mirrors the PyTorch module) for verification
# ----------------------------------------------------------------------------- #
def _unfold_wo_center_ref(x, k, d):
    Q, C, H, W = x.shape
    pad = d * (k - 1) // 2
    xp = jnp.pad(x, ((0, 0), (0, 0), (pad, pad), (pad, pad)))
    outs = []
    for ky in range(k):
        for kx in range(k):
            if ky == k // 2 and kx == k // 2:
                continue
            outs.append(xp[:, :, ky * d:ky * d + H, kx * d:kx * d + W])
    return jnp.stack(outs, axis=2)   # (Q, C, k*k-1, H, W)


def reference_costs(pred_logits, labels, pred_masks, box_masks, color_sim,
                    warm, w_class, w_proj, w_pw, color_thr, k, d):
    B = pred_logits.shape[0]
    outs = []
    for b in range(B):
        prob = jax.nn.softmax(pred_logits[b], axis=-1)
        cost_class = -prob[:, labels[b]]
        om = pred_masks[b][:, None]          # (Q, 1, H, W)
        tm = box_masks[b][:, None]           # (G, 1, H, W)

        def proj(axis):
            s = jnp.max(om, axis=axis, keepdims=True).reshape(om.shape[0], -1)
            t = jnp.max(tm, axis=axis, keepdims=True).reshape(tm.shape[0], -1)
            si = jax.nn.sigmoid(s)
            num = 2.0 * si @ t.T
            den = si.sum(-1)[:, None] + t.sum(-1)[None, :]
            return 1.0 - (num + 1.0) / (den + 1.0)

        cost_proj = proj(3) + proj(2)

        ts = (color_sim[b] >= color_thr).astype(jnp.float32) * tm     # (G, k*k-1, H, W)
        lf = jax.nn.log_sigmoid(om)
        lb = jax.nn.log_sigmoid(-om)
        lfu = _unfold_wo_center_ref(lf, k, d)
        lbu = _unfold_wo_center_ref(lb, k, d)
        a = lf[:, :, None] + lfu
        bb = lb[:, :, None] + lbu
        m = jnp.maximum(a, bb)
        src = -(jnp.log(jnp.exp(a - m) + jnp.exp(bb - m)) + m)[:, 0]  # (Q, k*k-1, H, W)
        srcf = src.reshape(src.shape[0], -1)
        tsf = ts.reshape(ts.shape[0], -1)
        num = srcf @ tsf.T
        den = jnp.clip(tsf.sum(1), 1.0, None)[None, :]
        cost_pw = num / den

        outs.append(w_class * cost_class + w_proj * cost_proj + w_pw * warm * cost_pw)
    return jnp.stack(outs)


# ----------------------------------------------------------------------------- #
if __name__ == "__main__":
    key = jax.random.PRNGKey(0)
    B, Q, G, NCLS, H, W = 2, 8, 4, 6, 16, 16
    KSZ, DIL = 3, 2
    K8 = KSZ * KSZ - 1

    ks = jax.random.split(key, 5)
    pred_logits = jax.random.normal(ks[0], (B, Q, NCLS), jnp.float32)
    pred_masks = 2.0 * jax.random.normal(ks[1], (B, Q, H, W), jnp.float32)
    labels = jax.random.randint(ks[2], (B, G), 0, NCLS)
    box_masks = (jax.random.uniform(ks[3], (B, G, H, W)) > 0.5).astype(jnp.float32)
    color_sim = jax.random.uniform(ks[4], (B, G, K8, H, W), dtype=jnp.float32)

    outputs = {"pred_logits": pred_logits, "pred_masks": pred_masks}
    targets = [{"labels": labels[b],
                "box_masks": box_masks[b],
                "images_color_similarity": color_sim[b]} for b in range(B)]

    # warmup_iters=1 so the pairwise term is exercised at full weight in the check
    matcher = HungarianMatcherProjPairPallas(pairwise_warmup_iters=1)
    indices, C = matcher.forward(outputs, targets)
    C = jax.block_until_ready(C)

    warm = min(matcher._iter / float(matcher.pairwise_warmup_iters), 1.0)
    with jax.default_matmul_precision("highest"):
        C_ref = reference_costs(pred_logits, labels, pred_masks, box_masks, color_sim,
                                warm, 1.0, 1.0, 1.0, 0.3, KSZ, DIL)
    np.testing.assert_allclose(np.asarray(C), np.asarray(C_ref), rtol=5e-3, atol=5e-3)
    print("KERNEL_OK")
</pallas_src>

<mosaic_0001>
module attributes {stable_mosaic.version = 11 : i64} {
  func.func @_cost_kernel(%arg0: i32, %arg1: i32, %arg2: memref<1x8x6xf32, #tpu.memory_space<vmem>>, %arg3: memref<1x6x16xf32, #tpu.memory_space<vmem>>, %arg4: memref<1x1x8x640xf32, #tpu.memory_space<vmem>>, %arg5: memref<1x8x16x512xbf16, #tpu.memory_space<vmem>>, %arg6: memref<1x1x16xf32, #tpu.memory_space<vmem>>, %arg7: memref<1x8x16xf32, #tpu.memory_space<vmem>>, %arg8: memref<1x8x16xf32, #tpu.memory_space<vmem>>, %arg9: memref<1x16x16xf32, #tpu.memory_space<vmem>>, %arg10: memref<1x16x16xf32, #tpu.memory_space<vmem>>, %arg11: memref<1x8x16xf32, #tpu.memory_space<vmem>>, %arg12: memref<8x640xf32, #tpu.memory_space<vmem>>, %arg13: memref<8x16xf32, #tpu.memory_space<vmem>>) attributes {dimension_semantics = [#tpu.dimension_semantics<parallel>, #tpu.dimension_semantics<arbitrary>], iteration_bounds = array<i64: 2, 1>, scalar_prefetch = 0 : i64, scratch_operands = 2 : i64, tpu.core_type = #tpu.core_type<tc>, window_params = [{transform_indices = @transform_0, window_bounds = array<i64: 1, 8, 6>}, {transform_indices = @transform_1, window_bounds = array<i64: 1, 6, 16>}, {transform_indices = @transform_2, window_bounds = array<i64: 1, 1, 8, 640>}, {transform_indices = @transform_3, window_bounds = array<i64: 1, 8, 16, 512>}, {transform_indices = @transform_4, window_bounds = array<i64: 1, 1, 16>}, {transform_indices = @transform_5, window_bounds = array<i64: 1, 8, 16>}, {transform_indices = @transform_6, window_bounds = array<i64: 1, 8, 16>}, {transform_indices = @transform_7, window_bounds = array<i64: 1, 16, 16>}, {transform_indices = @transform_8, window_bounds = array<i64: 1, 16, 16>}, {transform_indices = @transform_9, window_bounds = array<i64: 1, 8, 16>}]} {
    %c0_i32 = arith.constant 0 : i32
    %0 = arith.cmpi eq, %arg1, %c0_i32 : i32
    %1 = arith.extui %0 : i1 to i32
    %c0_i32_0 = arith.constant 0 : i32
    %2 = arith.cmpi ne, %1, %c0_i32_0 : i32
    scf.if %2 {
      %cst_129 = arith.constant 0.000000e+00 : f32
      %185 = vector.broadcast %cst_129 : f32 to vector<8x16xf32>
      %c0_130 = arith.constant 0 : index
      %c0_131 = arith.constant 0 : index
      %186 = vector.load %arg13[%c0_130, %c0_131] : memref<8x16xf32, #tpu.memory_space<vmem>>, vector<8x16xf32>
      tpu.vector_store %arg13[%c0_130, %c0_131], %185 {strides = array<i32>} : memref<8x16xf32, #tpu.memory_space<vmem>>, vector<8x16xf32>,
    } else {
    }
    %c0 = arith.constant 0 : index
    %c0_1 = arith.constant 0 : index
    %c0_2 = arith.constant 0 : index
    %c0_3 = arith.constant 0 : index
    %3 = vector.load %arg4[%c0, %c0_1, %c0_2, %c0_3] : memref<1x1x8x640xf32, #tpu.memory_space<vmem>>, vector<1x1x8x640xf32>
    %4 = vector.shape_cast %3 : vector<1x1x8x640xf32> to vector<8x640xf32>
    %cst = arith.constant 0.000000e+00 : f32
    %5 = vector.broadcast %cst : f32 to vector<8x640xf32>
    %6 = arith.minimumf %4, %5 : vector<8x640xf32>
    %7 = math.absf %4 : vector<8x640xf32>
    %cst_4 = arith.constant 0.000000e+00 : f32
    %8 = vector.broadcast %cst_4 : f32 to vector<8x640xf32>
    %9 = arith.subf %8, %7 : vector<8x640xf32>
    %10 = math.exp %9 : vector<8x640xf32>
    %11 = math.log1p %10 : vector<8x640xf32>
    %12 = arith.subf %6, %11 : vector<8x640xf32>
    %c0_5 = arith.constant 0 : index
    %c0_6 = arith.constant 0 : index
    %13 = vector.load %arg12[%c0_5, %c0_6] : memref<8x640xf32, #tpu.memory_space<vmem>>, vector<8x640xf32>
    tpu.vector_store %arg12[%c0_5, %c0_6], %12 {strides = array<i32>} : memref<8x640xf32, #tpu.memory_space<vmem>>, vector<8x640xf32>,
    %c0_i32_7 = arith.constant 0 : i32
    %c0_i32_8 = arith.constant 0 : i32
    %c0_i32_9 = arith.constant 0 : i32
    %c0_i32_10 = arith.constant 0 : i32
    %14 = tpu.memref_slice %arg4[%c0_i32_7, %c0_i32_8, %c0_i32_9, %c0_i32_10] : memref<1x1x8x640xf32, #tpu.memory_space<vmem>> -> memref<1x1x8x640xf32, #tpu.memory_space<vmem>>
    %15 = tpu.memref_squeeze %14 : memref<1x1x8x640xf32, #tpu.memory_space<vmem>> -> memref<8x640xf32, #tpu.memory_space<vmem>>
    %c0_11 = arith.constant 0 : index
    %c34 = arith.constant 34 : index
    %16 = vector.load %15[%c0_11, %c34] : memref<8x640xf32, #tpu.memory_space<vmem>>, vector<8x512xf32>
    %c0_12 = arith.constant 0 : index
    %c34_13 = arith.constant 34 : index
    %17 = vector.load %arg12[%c0_12, %c34_13] : memref<8x640xf32, #tpu.memory_space<vmem>>, vector<8x512xf32>
    %cst_14 = arith.constant 0.000000e+00 : f32
    %18 = vector.broadcast %cst_14 : f32 to vector<8x16xf32>
    %c0_i32_15 = arith.constant 0 : i32
    %c0_i32_16 = arith.constant 0 : i32
    %c0_i32_17 = arith.constant 0 : i32
    %c0_i32_18 = arith.constant 0 : i32
    %19 = tpu.memref_slice %arg4[%c0_i32_15, %c0_i32_16, %c0_i32_17, %c0_i32_18] : memref<1x1x8x640xf32, #tpu.memory_space<vmem>> -> memref<1x1x8x640xf32, #tpu.memory_space<vmem>>
    %20 = tpu.memref_squeeze %19 : memref<1x1x8x640xf32, #tpu.memory_space<vmem>> -> memref<8x640xf32, #tpu.memory_space<vmem>>
    %c0_19 = arith.constant 0 : index
    %c0_20 = arith.constant 0 : index
    %21 = vector.load %20[%c0_19, %c0_20] : memref<8x640xf32, #tpu.memory_space<vmem>>, vector<8x512xf32>
    %c0_21 = arith.constant 0 : index
    %c0_22 = arith.constant 0 : index
    %22 = vector.load %arg12[%c0_21, %c0_22] : memref<8x640xf32, #tpu.memory_space<vmem>>, vector<8x512xf32>
    %23 = arith.addf %16, %21 : vector<8x512xf32>
    %cst_23 = arith.constant 0.000000e+00 : f32
    %24 = vector.broadcast %cst_23 : f32 to vector<8x512xf32>
    %25 = arith.minimumf %23, %24 : vector<8x512xf32>
    %26 = math.absf %23 : vector<8x512xf32>
    %cst_24 = arith.constant 0.000000e+00 : f32
    %27 = vector.broadcast %cst_24 : f32 to vector<8x512xf32>
    %28 = arith.subf %27, %26 : vector<8x512xf32>
    %29 = math.exp %28 : vector<8x512xf32>
    %30 = math.log1p %29 : vector<8x512xf32>
    %31 = arith.subf %25, %30 : vector<8x512xf32>
    %32 = arith.subf %31, %17 : vector<8x512xf32>
    %33 = arith.subf %32, %22 : vector<8x512xf32>
    %c0_25 = arith.constant 0 : index
    %c0_26 = arith.constant 0 : index
    %c0_27 = arith.constant 0 : index
    %c0_28 = arith.constant 0 : index
    %34 = vector.load %arg5[%c0_25, %c0_26, %c0_27, %c0_28] : memref<1x8x16x512xbf16, #tpu.memory_space<vmem>>, vector<1x1x16x512xbf16>
    %35 = vector.shape_cast %34 : vector<1x1x16x512xbf16> to vector<16x512xbf16>
    %36 = arith.truncf %33 : vector<8x512xf32> to vector<8x512xbf16>
    %cst_29 = arith.constant dense<0.000000e+00> : vector<8x16xf32>
    %37 = tpu.matmul %36, %35, %cst_29 {dimension_numbers = #tpu.dot_dimension_numbers<[1], [1], [0], [0], [0, 0, 1, 0], [], []>} : vector<8x512xbf16>, vector<16x512xbf16>, vector<8x16xf32> -> vector<8x16xf32>
    %38 = arith.addf %18, %37 : vector<8x16xf32>
    %c0_i32_30 = arith.constant 0 : i32
    %c0_i32_31 = arith.constant 0 : i32
    %c0_i32_32 = arith.constant 0 : i32
    %c0_i32_33 = arith.constant 0 : i32
    %39 = tpu.memref_slice %arg4[%c0_i32_30, %c0_i32_31, %c0_i32_32, %c0_i32_33] : memref<1x1x8x640xf32, #tpu.memory_space<vmem>> -> memref<1x1x8x640xf32, #tpu.memory_space<vmem>>
    %40 = tpu.memref_squeeze %39 : memref<1x1x8x640xf32, #tpu.memory_space<vmem>> -> memref<8x640xf32, #tpu.memory_space<vmem>>
    %c0_34 = arith.constant 0 : index
    %c2 = arith.constant 2 : index
    %41 = vector.load %40[%c0_34, %c2] : memref<8x640xf32, #tpu.memory_space<vmem>>, vector<8x512xf32>
    %c0_35 = arith.constant 0 : index
    %c2_36 = arith.constant 2 : index
    %42 = vector.load %arg12[%c0_35, %c2_36] : memref<8x640xf32, #tpu.memory_space<vmem>>, vector<8x512xf32>
    %43 = arith.addf %16, %41 : vector<8x512xf32>
    %cst_37 = arith.constant 0.000000e+00 : f32
    %44 = vector.broadcast %cst_37 : f32 to vector<8x512xf32>
    %45 = arith.minimumf %43, %44 : vector<8x512xf32>
    %46 = math.absf %43 : vector<8x512xf32>
    %cst_38 = arith.constant 0.000000e+00 : f32
    %47 = vector.broadcast %cst_38 : f32 to vector<8x512xf32>
    %48 = arith.subf %47, %46 : vector<8x512xf32>
    %49 = math.exp %48 : vector<8x512xf32>
    %50 = math.log1p %49 : vector<8x512xf32>
    %51 = arith.subf %45, %50 : vector<8x512xf32>
    %52 = arith.subf %51, %17 : vector<8x512xf32>
    %53 = arith.subf %52, %42 : vector<8x512xf32>
    %c0_39 = arith.constant 0 : index
    %c1 = arith.constant 1 : index
    %c0_40 = arith.constant 0 : index
    %c0_41 = arith.constant 0 : index
    %54 = vector.load %arg5[%c0_39, %c1, %c0_40, %c0_41] : memref<1x8x16x512xbf16, #tpu.memory_space<vmem>>, vector<1x1x16x512xbf16>
    %55 = vector.shape_cast %54 : vector<1x1x16x512xbf16> to vector<16x512xbf16>
    %56 = arith.truncf %53 : vector<8x512xf32> to vector<8x512xbf16>
    %cst_42 = arith.constant dense<0.000000e+00> : vector<8x16xf32>
    %57 = tpu.matmul %56, %55, %cst_42 {dimension_numbers = #tpu.dot_dimension_numbers<[1], [1], [0], [0], [0, 0, 1, 0], [], []>} : vector<8x512xbf16>, vector<16x512xbf16>, vector<8x16xf32> -> vector<8x16xf32>
    %58 = arith.addf %38, %57 : vector<8x16xf32>
    %c0_i32_43 = arith.constant 0 : i32
    %c0_i32_44 = arith.constant 0 : i32
    %c0_i32_45 = arith.constant 0 : i32
    %c0_i32_46 = arith.constant 0 : i32
    %59 = tpu.memref_slice %arg4[%c0_i32_43, %c0_i32_44, %c0_i32_45, %c0_i32_46] : memref<1x1x8x640xf32, #tpu.memory_space<vmem>> -> memref<1x1x8x640xf32, #tpu.memory_space<vmem>>
    %60 = tpu.memref_squeeze %59 : memref<1x1x8x640xf32, #tpu.memory_space<vmem>> -> memref<8x640xf32, #tpu.memory_space<vmem>>
    %c0_47 = arith.constant 0 : index
    %c4 = arith.constant 4 : index
    %61 = vector.load %60[%c0_47, %c4] : memref<8x640xf32, #tpu.memory_space<vmem>>, vector<8x512xf32>
    %c0_48 = arith.constant 0 : index
    %c4_49 = arith.constant 4 : index
    %62 = vector.load %arg12[%c0_48, %c4_49] : memref<8x640xf32, #tpu.memory_space<vmem>>, vector<8x512xf32>
    %63 = arith.addf %16, %61 : vector<8x512xf32>
    %cst_50 = arith.constant 0.000000e+00 : f32
    %64 = vector.broadcast %cst_50 : f32 to vector<8x512xf32>
    %65 = arith.minimumf %63, %64 : vector<8x512xf32>
    %66 = math.absf %63 : vector<8x512xf32>
    %cst_51 = arith.constant 0.000000e+00 : f32
    %67 = vector.broadcast %cst_51 : f32 to vector<8x512xf32>
    %68 = arith.subf %67, %66 : vector<8x512xf32>
    %69 = math.exp %68 : vector<8x512xf32>
    %70 = math.log1p %69 : vector<8x512xf32>
    %71 = arith.subf %65, %70 : vector<8x512xf32>
    %72 = arith.subf %71, %17 : vector<8x512xf32>
    %73 = arith.subf %72, %62 : vector<8x512xf32>
    %c0_52 = arith.constant 0 : index
    %c2_53 = arith.constant 2 : index
    %c0_54 = arith.constant 0 : index
    %c0_55 = arith.constant 0 : index
    %74 = vector.load %arg5[%c0_52, %c2_53, %c0_54, %c0_55] : memref<1x8x16x512xbf16, #tpu.memory_space<vmem>>, vector<1x1x16x512xbf16>
    %75 = vector.shape_cast %74 : vector<1x1x16x512xbf16> to vector<16x512xbf16>
    %76 = arith.truncf %73 : vector<8x512xf32> to vector<8x512xbf16>
    %cst_56 = arith.constant dense<0.000000e+00> : vector<8x16xf32>
    %77 = tpu.matmul %76, %75, %cst_56 {dimension_numbers = #tpu.dot_dimension_numbers<[1], [1], [0], [0], [0, 0, 1, 0], [], []>} : vector<8x512xbf16>, vector<16x512xbf16>, vector<8x16xf32> -> vector<8x16xf32>
    %78 = arith.addf %58, %77 : vector<8x16xf32>
    %c0_i32_57 = arith.constant 0 : i32
    %c0_i32_58 = arith.constant 0 : i32
    %c0_i32_59 = arith.constant 0 : i32
    %c0_i32_60 = arith.constant 0 : i32
    %79 = tpu.memref_slice %arg4[%c0_i32_57, %c0_i32_58, %c0_i32_59, %c0_i32_60] : memref<1x1x8x640xf32, #tpu.memory_space<vmem>> -> memref<1x1x8x640xf32, #tpu.memory_space<vmem>>
    %80 = tpu.memref_squeeze %79 : memref<1x1x8x640xf32, #tpu.memory_space<vmem>> -> memref<8x640xf32, #tpu.memory_space<vmem>>
    %c0_61 = arith.constant 0 : index
    %c32 = arith.constant 32 : index
    %81 = vector.load %80[%c0_61, %c32] : memref<8x640xf32, #tpu.memory_space<vmem>>, vector<8x512xf32>
    %c0_62 = arith.constant 0 : index
    %c32_63 = arith.constant 32 : index
    %82 = vector.load %arg12[%c0_62, %c32_63] : memref<8x640xf32, #tpu.memory_space<vmem>>, vector<8x512xf32>
    %83 = arith.addf %16, %81 : vector<8x512xf32>
    %cst_64 = arith.constant 0.000000e+00 : f32
    %84 = vector.broadcast %cst_64 : f32 to vector<8x512xf32>
    %85 = arith.minimumf %83, %84 : vector<8x512xf32>
    %86 = math.absf %83 : vector<8x512xf32>
    %cst_65 = arith.constant 0.000000e+00 : f32
    %87 = vector.broadcast %cst_65 : f32 to vector<8x512xf32>
    %88 = arith.subf %87, %86 : vector<8x512xf32>
    %89 = math.exp %88 : vector<8x512xf32>
    %90 = math.log1p %89 : vector<8x512xf32>
    %91 = arith.subf %85, %90 : vector<8x512xf32>
    %92 = arith.subf %91, %17 : vector<8x512xf32>
    %93 = arith.subf %92, %82 : vector<8x512xf32>
    %c0_66 = arith.constant 0 : index
    %c3 = arith.constant 3 : index
    %c0_67 = arith.constant 0 : index
    %c0_68 = arith.constant 0 : index
    %94 = vector.load %arg5[%c0_66, %c3, %c0_67, %c0_68] : memref<1x8x16x512xbf16, #tpu.memory_space<vmem>>, vector<1x1x16x512xbf16>
    %95 = vector.shape_cast %94 : vector<1x1x16x512xbf16> to vector<16x512xbf16>
    %96 = arith.truncf %93 : vector<8x512xf32> to vector<8x512xbf16>
    %cst_69 = arith.constant dense<0.000000e+00> : vector<8x16xf32>
    %97 = tpu.matmul %96, %95, %cst_69 {dimension_numbers = #tpu.dot_dimension_numbers<[1], [1], [0], [0], [0, 0, 1, 0], [], []>} : vector<8x512xbf16>, vector<16x512xbf16>, vector<8x16xf32> -> vector<8x16xf32>
    %98 = arith.addf %78, %97 : vector<8x16xf32>
    %c0_i32_70 = arith.constant 0 : i32
    %c0_i32_71 = arith.constant 0 : i32
    %c0_i32_72 = arith.constant 0 : i32
    %c0_i32_73 = arith.constant 0 : i32
    %99 = tpu.memref_slice %arg4[%c0_i32_70, %c0_i32_71, %c0_i32_72, %c0_i32_73] : memref<1x1x8x640xf32, #tpu.memory_space<vmem>> -> memref<1x1x8x640xf32, #tpu.memory_space<vmem>>
    %100 = tpu.memref_squeeze %99 : memref<1x1x8x640xf32, #tpu.memory_space<vmem>> -> memref<8x640xf32, #tpu.memory_space<vmem>>
    %c0_74 = arith.constant 0 : index
    %c36 = arith.constant 36 : index
    %101 = vector.load %100[%c0_74, %c36] : memref<8x640xf32, #tpu.memory_space<vmem>>, vector<8x512xf32>
    %c0_75 = arith.constant 0 : index
    %c36_76 = arith.constant 36 : index
    %102 = vector.load %arg12[%c0_75, %c36_76] : memref<8x640xf32, #tpu.memory_space<vmem>>, vector<8x512xf32>
    %103 = arith.addf %16, %101 : vector<8x512xf32>
    %cst_77 = arith.constant 0.000000e+00 : f32
    %104 = vector.broadcast %cst_77 : f32 to vector<8x512xf32>
    %105 = arith.minimumf %103, %104 : vector<8x512xf32>
    %106 = math.absf %103 : vector<8x512xf32>
    %cst_78 = arith.constant 0.000000e+00 : f32
    %107 = vector.broadcast %cst_78 : f32 to vector<8x512xf32>
    %108 = arith.subf %107, %106 : vector<8x512xf32>
    %109 = math.exp %108 : vector<8x512xf32>
    %110 = math.log1p %109 : vector<8x512xf32>
    %111 = arith.subf %105, %110 : vector<8x512xf32>
    %112 = arith.subf %111, %17 : vector<8x512xf32>
    %113 = arith.subf %112, %102 : vector<8x512xf32>
    %c0_79 = arith.constant 0 : index
    %c4_80 = arith.constant 4 : index
    %c0_81 = arith.constant 0 : index
    %c0_82 = arith.constant 0 : index
    %114 = vector.load %arg5[%c0_79, %c4_80, %c0_81, %c0_82] : memref<1x8x16x512xbf16, #tpu.memory_space<vmem>>, vector<1x1x16x512xbf16>
    %115 = vector.shape_cast %114 : vector<1x1x16x512xbf16> to vector<16x512xbf16>
    %116 = arith.truncf %113 : vector<8x512xf32> to vector<8x512xbf16>
    %cst_83 = arith.constant dense<0.000000e+00> : vector<8x16xf32>
    %117 = tpu.matmul %116, %115, %cst_83 {dimension_numbers = #tpu.dot_dimension_numbers<[1], [1], [0], [0], [0, 0, 1, 0], [], []>} : vector<8x512xbf16>, vector<16x512xbf16>, vector<8x16xf32> -> vector<8x16xf32>
    %118 = arith.addf %98, %117 : vector<8x16xf32>
    %c0_i32_84 = arith.constant 0 : i32
    %c0_i32_85 = arith.constant 0 : i32
    %c0_i32_86 = arith.constant 0 : i32
    %c0_i32_87 = arith.constant 0 : i32
    %119 = tpu.memref_slice %arg4[%c0_i32_84, %c0_i32_85, %c0_i32_86, %c0_i32_87] : memref<1x1x8x640xf32, #tpu.memory_space<vmem>> -> memref<1x1x8x640xf32, #tpu.memory_space<vmem>>
    %120 = tpu.memref_squeeze %119 : memref<1x1x8x640xf32, #tpu.memory_space<vmem>> -> memref<8x640xf32, #tpu.memory_space<vmem>>
    %c0_88 = arith.constant 0 : index
    %c64 = arith.constant 64 : index
    %121 = vector.load %120[%c0_88, %c64] : memref<8x640xf32, #tpu.memory_space<vmem>>, vector<8x512xf32>
    %c0_89 = arith.constant 0 : index
    %c64_90 = arith.constant 64 : index
    %122 = vector.load %arg12[%c0_89, %c64_90] : memref<8x640xf32, #tpu.memory_space<vmem>>, vector<8x512xf32>
    %123 = arith.addf %16, %121 : vector<8x512xf32>
    %cst_91 = arith.constant 0.000000e+00 : f32
    %124 = vector.broadcast %cst_91 : f32 to vector<8x512xf32>
    %125 = arith.minimumf %123, %124 : vector<8x512xf32>
    %126 = math.absf %123 : vector<8x512xf32>
    %cst_92 = arith.constant 0.000000e+00 : f32
    %127 = vector.broadcast %cst_92 : f32 to vector<8x512xf32>
    %128 = arith.subf %127, %126 : vector<8x512xf32>
    %129 = math.exp %128 : vector<8x512xf32>
    %130 = math.log1p %129 : vector<8x512xf32>
    %131 = arith.subf %125, %130 : vector<8x512xf32>
    %132 = arith.subf %131, %17 : vector<8x512xf32>
    %133 = arith.subf %132, %122 : vector<8x512xf32>
    %c0_93 = arith.constant 0 : index
    %c5 = arith.constant 5 : index
    %c0_94 = arith.constant 0 : index
    %c0_95 = arith.constant 0 : index
    %134 = vector.load %arg5[%c0_93, %c5, %c0_94, %c0_95] : memref<1x8x16x512xbf16, #tpu.memory_space<vmem>>, vector<1x1x16x512xbf16>
    %135 = vector.shape_cast %134 : vector<1x1x16x512xbf16> to vector<16x512xbf16>
    %136 = arith.truncf %133 : vector<8x512xf32> to vector<8x512xbf16>
    %cst_96 = arith.constant dense<0.000000e+00> : vector<8x16xf32>
    %137 = tpu.matmul %136, %135, %cst_96 {dimension_numbers = #tpu.dot_dimension_numbers<[1], [1], [0], [0], [0, 0, 1, 0], [], []>} : vector<8x512xbf16>, vector<16x512xbf16>, vector<8x16xf32> -> vector<8x16xf32>
    %138 = arith.addf %118, %137 : vector<8x16xf32>
    %c0_i32_97 = arith.constant 0 : i32
    %c0_i32_98 = arith.constant 0 : i32
    %c0_i32_99 = arith.constant 0 : i32
    %c0_i32_100 = arith.constant 0 : i32
    %139 = tpu.memref_slice %arg4[%c0_i32_97, %c0_i32_98, %c0_i32_99, %c0_i32_100] : memref<1x1x8x640xf32, #tpu.memory_space<vmem>> -> memref<1x1x8x640xf32, #tpu.memory_space<vmem>>
    %140 = tpu.memref_squeeze %139 : memref<1x1x8x640xf32, #tpu.memory_space<vmem>> -> memref<8x640xf32, #tpu.memory_space<vmem>>
    %c0_101 = arith.constant 0 : index
    %c66 = arith.constant 66 : index
    %141 = vector.load %140[%c0_101, %c66] : memref<8x640xf32, #tpu.memory_space<vmem>>, vector<8x512xf32>
    %c0_102 = arith.constant 0 : index
    %c66_103 = arith.constant 66 : index
    %142 = vector.load %arg12[%c0_102, %c66_103] : memref<8x640xf32, #tpu.memory_space<vmem>>, vector<8x512xf32>
    %143 = arith.addf %16, %141 : vector<8x512xf32>
    %cst_104 = arith.constant 0.000000e+00 : f32
    %144 = vector.broadcast %cst_104 : f32 to vector<8x512xf32>
    %145 = arith.minimumf %143, %144 : vector<8x512xf32>
    %146 = math.absf %143 : vector<8x512xf32>
    %cst_105 = arith.constant 0.000000e+00 : f32
    %147 = vector.broadcast %cst_105 : f32 to vector<8x512xf32>
    %148 = arith.subf %147, %146 : vector<8x512xf32>
    %149 = math.exp %148 : vector<8x512xf32>
    %150 = math.log1p %149 : vector<8x512xf32>
    %151 = arith.subf %145, %150 : vector<8x512xf32>
    %152 = arith.subf %151, %17 : vector<8x512xf32>
    %153 = arith.subf %152, %142 : vector<8x512xf32>
    %c0_106 = arith.constant 0 : index
    %c6 = arith.constant 6 : index
    %c0_107 = arith.constant 0 : index
    %c0_108 = arith.constant 0 : index
    %154 = vector.load %arg5[%c0_106, %c6, %c0_107, %c0_108] : memref<1x8x16x512xbf16, #tpu.memory_space<vmem>>, vector<1x1x16x512xbf16>
    %155 = vector.shape_cast %154 : vector<1x1x16x512xbf16> to vector<16x512xbf16>
    %156 = arith.truncf %153 : vector<8x512xf32> to vector<8x512xbf16>
    %cst_109 = arith.constant dense<0.000000e+00> : vector<8x16xf32>
    %157 = tpu.matmul %156, %155, %cst_109 {dimension_numbers = #tpu.dot_dimension_numbers<[1], [1], [0], [0], [0, 0, 1, 0], [], []>} : vector<8x512xbf16>, vector<16x512xbf16>, vector<8x16xf32> -> vector<8x16xf32>
    %158 = arith.addf %138, %157 : vector<8x16xf32>
    %c0_i32_110 = arith.constant 0 : i32
    %c0_i32_111 = arith.constant 0 : i32
    %c0_i32_112 = arith.constant 0 : i32
    %c0_i32_113 = arith.constant 0 : i32
    %159 = tpu.memref_slice %arg4[%c0_i32_110, %c0_i32_111, %c0_i32_112, %c0_i32_113] : memref<1x1x8x640xf32, #tpu.memory_space<vmem>> -> memref<1x1x8x640xf32, #tpu.memory_space<vmem>>
    %160 = tpu.memref_squeeze %159 : memref<1x1x8x640xf32, #tpu.memory_space<vmem>> -> memref<8x640xf32, #tpu.memory_space<vmem>>
    %c0_114 = arith.constant 0 : index
    %c68 = arith.constant 68 : index
    %161 = vector.load %160[%c0_114, %c68] : memref<8x640xf32, #tpu.memory_space<vmem>>, vector<8x512xf32>
    %c0_115 = arith.constant 0 : index
    %c68_116 = arith.constant 68 : index
    %162 = vector.load %arg12[%c0_115, %c68_116] : memref<8x640xf32, #tpu.memory_space<vmem>>, vector<8x512xf32>
    %163 = arith.addf %16, %161 : vector<8x512xf32>
    %cst_117 = arith.constant 0.000000e+00 : f32
    %164 = vector.broadcast %cst_117 : f32 to vector<8x512xf32>
    %165 = arith.minimumf %163, %164 : vector<8x512xf32>
    %166 = math.absf %163 : vector<8x512xf32>
    %cst_118 = arith.constant 0.000000e+00 : f32
    %167 = vector.broadcast %cst_118 : f32 to vector<8x512xf32>
    %168 = arith.subf %167, %166 : vector<8x512xf32>
    %169 = math.exp %168 : vector<8x512xf32>
    %170 = math.log1p %169 : vector<8x512xf32>
    %171 = arith.subf %165, %170 : vector<8x512xf32>
    %172 = arith.subf %171, %17 : vector<8x512xf32>
    %173 = arith.subf %172, %162 : vector<8x512xf32>
    %c0_119 = arith.constant 0 : index
    %c7 = arith.constant 7 : index
    %c0_120 = arith.constant 0 : index
    %c0_121 = arith.constant 0 : index
    %174 = vector.load %arg5[%c0_119, %c7, %c0_120, %c0_121] : memref<1x8x16x512xbf16, #tpu.memory_space<vmem>>, vector<1x1x16x512xbf16>
    %175 = vector.shape_cast %174 : vector<1x1x16x512xbf16> to vector<16x512xbf16>
    %176 = arith.truncf %173 : vector<8x512xf32> to vector<8x512xbf16>
    %cst_122 = arith.constant dense<0.000000e+00> : vector<8x16xf32>
    %177 = tpu.matmul %176, %175, %cst_122 {dimension_numbers = #tpu.dot_dimension_numbers<[1], [1], [0], [0], [0, 0, 1, 0], [], []>} : vector<8x512xbf16>, vector<16x512xbf16>, vector<8x16xf32> -> vector<8x16xf32>
    %178 = arith.addf %158, %177 : vector<8x16xf32>
    %c0_123 = arith.constant 0 : index
    %c0_124 = arith.constant 0 : index
    %179 = vector.load %arg13[%c0_123, %c0_124] : memref<8x16xf32, #tpu.memory_space<vmem>>, vector<8x16xf32>
    %180 = arith.addf %179, %178 : vector<8x16xf32>
    %c0_125 = arith.constant 0 : index
    %c0_126 = arith.constant 0 : index
    %181 = vector.load %arg13[%c0_125, %c0_126] : memref<8x16xf32, #tpu.memory_space<vmem>>, vector<8x16xf32>
    tpu.vector_store %arg13[%c0_125, %c0_126], %180 {strides = array<i32>} : memref<8x16xf32, #tpu.memory_space<vmem>>, vector<8x16xf32>,
    %c0_i32_127 = arith.constant 0 : i32
    %182 = arith.cmpi eq, %arg1, %c0_i32_127 : i32
    %183 = arith.extui %182 : i1 to i32
    %c0_i32_128 = arith.constant 0 : i32
    %184 = arith.cmpi ne, %183, %c0_i32_128 : i32
    scf.if %184 {
      %c0_129 = arith.constant 0 : index
      %c0_130 = arith.constant 0 : index
      %c0_131 = arith.constant 0 : index
      %185 = vector.load %arg2[%c0_129, %c0_130, %c0_131] : memref<1x8x6xf32, #tpu.memory_space<vmem>>, vector<1x8x6xf32>
      %186 = vector.shape_cast %185 : vector<1x8x6xf32> to vector<8x6xf32>
      %cst_132 = arith.constant dense<0xFF800000> : vector<8xf32>
      %187 = vector.multi_reduction <maximumf>, %186, %cst_132 [1] : vector<8x6xf32> to vector<8xf32>
      %188 = vector.shape_cast %187 : vector<8xf32> to vector<8x1xf32>
      %189 = vector.broadcast %188 : vector<8x1xf32> to vector<8x6xf32>
      %190 = arith.subf %186, %189 : vector<8x6xf32>
      %191 = math.exp %190 : vector<8x6xf32>
      %cst_133 = arith.constant dense<0.000000e+00> : vector<8xf32>
      %192 = vector.multi_reduction <add>, %191, %cst_133 [1] : vector<8x6xf32> to vector<8xf32>
      %193 = vector.shape_cast %192 : vector<8xf32> to vector<8x1xf32>
      %194 = vector.broadcast %193 : vector<8x1xf32> to vector<8x6xf32>
      %195 = arith.divf %191, %194 : vector<8x6xf32>
      %c0_134 = arith.constant 0 : index
      %c0_135 = arith.constant 0 : index
      %c0_136 = arith.constant 0 : index
      %196 = vector.load %arg3[%c0_134, %c0_135, %c0_136] : memref<1x6x16xf32, #tpu.memory_space<vmem>>, vector<1x6x16xf32>
      %197 = vector.shape_cast %196 : vector<1x6x16xf32> to vector<6x16xf32>
      %cst_137 = arith.constant dense<0.000000e+00> : vector<8x16xf32>
      %198 = tpu.matmul %195, %197, %cst_137 {dimension_numbers = #tpu.dot_dimension_numbers<[1], [0], [0], [1], [0, 0, 1, 1], [], []>} : vector<8x6xf32>, vector<6x16xf32>, vector<8x16xf32> -> vector<8x16xf32>
      %cst_138 = arith.constant 0.000000e+00 : f32
      %199 = vector.broadcast %cst_138 : f32 to vector<8x16xf32>
      %200 = arith.subf %199, %198 : vector<8x16xf32>
      %c0_139 = arith.constant 0 : index
      %c0_140 = arith.constant 0 : index
      %c0_141 = arith.constant 0 : index
      %201 = vector.load %arg7[%c0_139, %c0_140, %c0_141] : memref<1x8x16xf32, #tpu.memory_space<vmem>>, vector<1x8x16xf32>
      %202 = vector.shape_cast %201 : vector<1x8x16xf32> to vector<8x16xf32>
      %c0_142 = arith.constant 0 : index
      %c0_143 = arith.constant 0 : index
      %c0_144 = arith.constant 0 : index
      %203 = vector.load %arg9[%c0_142, %c0_143, %c0_144] : memref<1x16x16xf32, #tpu.memory_space<vmem>>, vector<1x16x16xf32>
      %204 = vector.shape_cast %203 : vector<1x16x16xf32> to vector<16x16xf32>
      %cst_145 = arith.constant 0.000000e+00 : f32
      %205 = vector.broadcast %cst_145 : f32 to vector<8x16xf32>
      %206 = arith.subf %205, %202 : vector<8x16xf32>
      %207 = math.exp %206 : vector<8x16xf32>
      %cst_146 = arith.constant 1.000000e+00 : f32
      %208 = vector.broadcast %cst_146 : f32 to vector<8x16xf32>
      %209 = arith.addf %208, %207 : vector<8x16xf32>
      %cst_147 = arith.constant 1.000000e+00 : f32
      %210 = vector.broadcast %cst_147 : f32 to vector<8x16xf32>
      %211 = arith.divf %210, %209 : vector<8x16xf32>
      %cst_148 = arith.constant dense<0.000000e+00> : vector<8x16xf32>
      %212 = tpu.matmul %211, %204, %cst_148 {dimension_numbers = #tpu.dot_dimension_numbers<[1], [1], [0], [0], [0, 0, 1, 0], [], []>} : vector<8x16xf32>, vector<16x16xf32>, vector<8x16xf32> -> vector<8x16xf32>
      %cst_149 = arith.constant 2.000000e+00 : f32
      %213 = vector.broadcast %cst_149 : f32 to vector<8x16xf32>
      %214 = arith.mulf %213, %212 : vector<8x16xf32>
      %cst_150 = arith.constant dense<0.000000e+00> : vector<8xf32>
      %215 = vector.multi_reduction <add>, %211, %cst_150 [1] : vector<8x16xf32> to vector<8xf32>
      %216 = vector.shape_cast %215 : vector<8xf32> to vector<8x1xf32>
      %cst_151 = arith.constant dense<0.000000e+00> : vector<16xf32>
      %217 = vector.multi_reduction <add>, %204, %cst_151 [1] : vector<16x16xf32> to vector<16xf32>
      %218 = vector.shape_cast %217 : vector<16xf32> to vector<1x16xf32>
      %219 = vector.broadcast %216 : vector<8x1xf32> to vector<8x16xf32>
      %220 = vector.broadcast %218 : vector<1x16xf32> to vector<8x16xf32>
      %221 = arith.addf %219, %220 : vector<8x16xf32>
      %cst_152 = arith.constant 1.000000e+00 : f32
      %222 = vector.broadcast %cst_152 : f32 to vector<8x16xf32>
      %223 = arith.addf %214, %222 : vector<8x16xf32>
      %cst_153 = arith.constant 1.000000e+00 : f32
      %224 = vector.broadcast %cst_153 : f32 to vector<8x16xf32>
      %225 = arith.addf %221, %224 : vector<8x16xf32>
      %226 = arith.divf %223, %225 : vector<8x16xf32>
      %cst_154 = arith.constant 1.000000e+00 : f32
      %227 = vector.broadcast %cst_154 : f32 to vector<8x16xf32>
      %228 = arith.subf %227, %226 : vector<8x16xf32>
      %c0_155 = arith.constant 0 : index
      %c0_156 = arith.constant 0 : index
      %c0_157 = arith.constant 0 : index
      %229 = vector.load %arg8[%c0_155, %c0_156, %c0_157] : memref<1x8x16xf32, #tpu.memory_space<vmem>>, vector<1x8x16xf32>
      %230 = vector.shape_cast %229 : vector<1x8x16xf32> to vector<8x16xf32>
      %c0_158 = arith.constant 0 : index
      %c0_159 = arith.constant 0 : index
      %c0_160 = arith.constant 0 : index
      %231 = vector.load %arg10[%c0_158, %c0_159, %c0_160] : memref<1x16x16xf32, #tpu.memory_space<vmem>>, vector<1x16x16xf32>
      %232 = vector.shape_cast %231 : vector<1x16x16xf32> to vector<16x16xf32>
      %cst_161 = arith.constant 0.000000e+00 : f32
      %233 = vector.broadcast %cst_161 : f32 to vector<8x16xf32>
      %234 = arith.subf %233, %230 : vector<8x16xf32>
      %235 = math.exp %234 : vector<8x16xf32>
      %cst_162 = arith.constant 1.000000e+00 : f32
      %236 = vector.broadcast %cst_162 : f32 to vector<8x16xf32>
      %237 = arith.addf %236, %235 : vector<8x16xf32>
      %cst_163 = arith.constant 1.000000e+00 : f32
      %238 = vector.broadcast %cst_163 : f32 to vector<8x16xf32>
      %239 = arith.divf %238, %237 : vector<8x16xf32>
      %cst_164 = arith.constant dense<0.000000e+00> : vector<8x16xf32>
      %240 = tpu.matmul %239, %232, %cst_164 {dimension_numbers = #tpu.dot_dimension_numbers<[1], [1], [0], [0], [0, 0, 1, 0], [], []>} : vector<8x16xf32>, vector<16x16xf32>, vector<8x16xf32> -> vector<8x16xf32>
      %cst_165 = arith.constant 2.000000e+00 : f32
      %241 = vector.broadcast %cst_165 : f32 to vector<8x16xf32>
      %242 = arith.mulf %241, %240 : vector<8x16xf32>
      %cst_166 = arith.constant dense<0.000000e+00> : vector<8xf32>
      %243 = vector.multi_reduction <add>, %239, %cst_166 [1] : vector<8x16xf32> to vector<8xf32>
      %244 = vector.shape_cast %243 : vector<8xf32> to vector<8x1xf32>
      %cst_167 = arith.constant dense<0.000000e+00> : vector<16xf32>
      %245 = vector.multi_reduction <add>, %232, %cst_167 [1] : vector<16x16xf32> to vector<16xf32>
      %246 = vector.shape_cast %245 : vector<16xf32> to vector<1x16xf32>
      %247 = vector.broadcast %244 : vector<8x1xf32> to vector<8x16xf32>
      %248 = vector.broadcast %246 : vector<1x16xf32> to vector<8x16xf32>
      %249 = arith.addf %247, %248 : vector<8x16xf32>
      %cst_168 = arith.constant 1.000000e+00 : f32
      %250 = vector.broadcast %cst_168 : f32 to vector<8x16xf32>
      %251 = arith.addf %242, %250 : vector<8x16xf32>
      %cst_169 = arith.constant 1.000000e+00 : f32
      %252 = vector.broadcast %cst_169 : f32 to vector<8x16xf32>
      %253 = arith.addf %249, %252 : vector<8x16xf32>
      %254 = arith.divf %251, %253 : vector<8x16xf32>
      %cst_170 = arith.constant 1.000000e+00 : f32
      %255 = vector.broadcast %cst_170 : f32 to vector<8x16xf32>
      %256 = arith.subf %255, %254 : vector<8x16xf32>
      %257 = arith.addf %228, %256 : vector<8x16xf32>
      %c0_171 = arith.constant 0 : index
      %c0_172 = arith.constant 0 : index
      %258 = vector.load %arg13[%c0_171, %c0_172] : memref<8x16xf32, #tpu.memory_space<vmem>>, vector<8x16xf32>
      %c0_173 = arith.constant 0 : index
      %c0_174 = arith.constant 0 : index
      %c0_175 = arith.constant 0 : index
      %259 = vector.load %arg6[%c0_173, %c0_174, %c0_175] : memref<1x1x16xf32, #tpu.memory_space<vmem>>, vector<1x1x16xf32>
      %260 = vector.shape_cast %259 : vector<1x1x16xf32> to vector<1x16xf32>
      %261 = vector.broadcast %260 : vector<1x16xf32> to vector<8x16xf32>
      %262 = arith.mulf %258, %261 : vector<8x16xf32>
      %cst_176 = arith.constant 1.000000e+00 : f32
      %263 = vector.broadcast %cst_176 : f32 to vector<8x16xf32>
      %264 = arith.mulf %263, %200 : vector<8x16xf32>
      %cst_177 = arith.constant 1.000000e+00 : f32
      %265 = vector.broadcast %cst_177 : f32 to vector<8x16xf32>
      %266 = arith.mulf %265, %257 : vector<8x16xf32>
      %267 = arith.addf %264, %266 : vector<8x16xf32>
      %268 = arith.addf %267, %262 : vector<8x16xf32>
      %c0_178 = arith.constant 0 : index
      %c0_179 = arith.constant 0 : index
      %c0_180 = arith.constant 0 : index
      %269 = vector.load %arg11[%c0_178, %c0_179, %c0_180] : memref<1x8x16xf32, #tpu.memory_space<vmem>>, vector<1x8x16xf32>
      %270 = vector.shape_cast %269 : vector<1x8x16xf32> to vector<8x16xf32>
      %271 = vector.shape_cast %268 : vector<8x16xf32> to vector<1x8x16xf32>
      tpu.vector_store %arg11[%c0_178, %c0_179, %c0_180], %271 {strides = array<i32>} : memref<1x8x16xf32, #tpu.memory_space<vmem>>, vector<1x8x16xf32>,
    } else {
    }
    return
  }
  func.func @transform_0(%arg0: i32, %arg1: i32) -> (i32, i32, i32) {
    %c0_i32 = arith.constant 0 : i32
    %c0_i32_0 = arith.constant 0 : i32
    %c0_i32_1 = arith.constant 0 : i32
    return %arg0, %c0_i32, %c0_i32_0 : i32, i32, i32
  }
  func.func @transform_1(%arg0: i32, %arg1: i32) -> (i32, i32, i32) {
    %c0_i32 = arith.constant 0 : i32
    %c0_i32_0 = arith.constant 0 : i32
    %c0_i32_1 = arith.constant 0 : i32
    return %arg0, %c0_i32, %c0_i32_0 : i32, i32, i32
  }
  func.func @transform_2(%arg0: i32, %arg1: i32) -> (i32, i32, i32, i32) {
    %c0_i32 = arith.constant 0 : i32
    %c0_i32_0 = arith.constant 0 : i32
    %c0_i32_1 = arith.constant 0 : i32
    return %arg0, %arg1, %c0_i32, %c0_i32_0 : i32, i32, i32, i32
  }
  func.func @transform_3(%arg0: i32, %arg1: i32) -> (i32, i32, i32, i32) {
    %c0_i32 = arith.constant 0 : i32
    %c0_i32_0 = arith.constant 0 : i32
    %c0_i32_1 = arith.constant 0 : i32
    return %arg0, %c0_i32, %c0_i32_0, %arg1 : i32, i32, i32, i32
  }
  func.func @transform_4(%arg0: i32, %arg1: i32) -> (i32, i32, i32) {
    %c0_i32 = arith.constant 0 : i32
    %c0_i32_0 = arith.constant 0 : i32
    %c0_i32_1 = arith.constant 0 : i32
    return %arg0, %c0_i32, %c0_i32_0 : i32, i32, i32
  }
  func.func @transform_5(%arg0: i32, %arg1: i32) -> (i32, i32, i32) {
    %c0_i32 = arith.constant 0 : i32
    %c0_i32_0 = arith.constant 0 : i32
    %c0_i32_1 = arith.constant 0 : i32
    return %arg0, %c0_i32, %c0_i32_0 : i32, i32, i32
  }
  func.func @transform_6(%arg0: i32, %arg1: i32) -> (i32, i32, i32) {
    %c0_i32 = arith.constant 0 : i32
    %c0_i32_0 = arith.constant 0 : i32
    %c0_i32_1 = arith.constant 0 : i32
    return %arg0, %c0_i32, %c0_i32_0 : i32, i32, i32
  }
  func.func @transform_7(%arg0: i32, %arg1: i32) -> (i32, i32, i32) {
    %c0_i32 = arith.constant 0 : i32
    %c0_i32_0 = arith.constant 0 : i32
    %c0_i32_1 = arith.constant 0 : i32
    return %arg0, %c0_i32, %c0_i32_0 : i32, i32, i32
  }
  func.func @transform_8(%arg0: i32, %arg1: i32) -> (i32, i32, i32) {
    %c0_i32 = arith.constant 0 : i32
    %c0_i32_0 = arith.constant 0 : i32
    %c0_i32_1 = arith.constant 0 : i32
    return %arg0, %c0_i32, %c0_i32_0 : i32, i32, i32
  }
  func.func @transform_9(%arg0: i32, %arg1: i32) -> (i32, i32, i32) {
    %c0_i32 = arith.constant 0 : i32
    %c0_i32_0 = arith.constant 0 : i32
    %c0_i32_1 = arith.constant 0 : i32
    return %arg0, %c0_i32, %c0_i32_0 : i32, i32, i32
  }
}

</mosaic_0001>

<bundles_post_ra>
// kernel: tpu_custom_call.1
= control target key start
LH: loop header
LB: loop body
LE: loop exit
PB: predicated region body
PF: predicated region fallthrough
CT: control target
= control target key end

     0   :  { %s5816_s0 = inlined_call_operand.vmem [shape: f32[2,8,6], index: 0, kind: input, shape index: {}]   ;;  %s5817_s1 = inlined_call_operand.vmem [shape: f32[2,6,16], index: 1, kind: input, shape index: {}]   ;;  %s5818_s2 = inlined_call_operand.hbm [shape: f32[2,1,8,640], index: 2, kind: input, shape index: {}]   ;;  %s5819_s3 = inlined_call_operand.hbm [shape: bf16[2,8,16,512], index: 3, kind: input, shape index: {}]   ;;  %s5820_s4 = inlined_call_operand.hbm [shape: f32[2,1,16], index: 4, kind: input, shape index: {}]   ;;  %s5821_s5 = inlined_call_operand.hbm [shape: f32[2,8,16], index: 5, kind: input, shape index: {}]   ;;  %s5822_s6 = inlined_call_operand.hbm [shape: f32[2,8,16], index: 6, kind: input, shape index: {}]   ;;  %s5823_s7 = inlined_call_operand.vmem [shape: f32[2,16,16], index: 7, kind: input, shape index: {}]   ;;  %s5824_s8 = inlined_call_operand.vmem [shape: f32[2,16,16], index: 8, kind: input, shape index: {}]   ;;  %s5825_s9 = inlined_call_operand.hbm [shape: f32[2,8,16], index: 9, kind: output, shape index: {}]  }
   0x1   :  { %5885 = sst [smem:[#allocation60_spill]] %s5816_s0 }
   0x2   :  { %5886 = sst [smem:[#allocation61_spill]] %s5817_s1 }
   0x3   :  { %5887 = sst [smem:[#allocation62_spill]] %s5819_s3 }
   0x4   :  { %5888 = sst [smem:[#allocation63_spill]] %s5821_s5 }
   0x5   :  { %5889 = sst [smem:[#allocation64_spill]] %s5823_s7 }
   0x6   :  { %5890 = sst [smem:[#allocation65_spill]] %s5824_s8 }
   0x7   :  { %5891 = sst [smem:[#allocation66_spill]] %s5825_s9 }
   0x8   :  { %14 = vsyncpa [#allocation5], 0 }
   0x9   :  { %16 = vsyncpa [#allocation5 + $0x1], 0 }
   0xa   :  { %17 = vsyncpa [#allocation8], 0 }
   0xb   :  { %19 = vsyncpa [#allocation8 + $0x1], 0 }
   0xc   :  { %20 = vsyncpa [#allocation11], 0 }
   0xd   :  { %22 = vsyncpa [#allocation11 + $0x1], 0 }
   0xe   :  { %23 = vsyncpa [#allocation6], 0 }
   0xf   :  { %25 = vsyncpa [#allocation6 + $0x1], 0  ;;  %s4177_s30 = smov 0   ;;  %s4179_s10 = smov 0  }
  0x10   :  { %s4181_s11 = smov 0   ;;  %s4183_s12 = smov 0  }
  0x11   :  { %s4185_s13 = smov 0   ;;  %s4187_s14 = smov 0  }
  0x12 LB: > { %5892 = sst [smem:[#allocation18_spill]] %s4087_s30  ;;  %s4208_s15 = sadd.s32 4294967295, %s4107_s14   ;;  %s4107_s14 = sphi %s4187_s14, %s31_s14   ;;  %s4103_s13 = sphi %s4185_s13, %s6100_s13   ;;  %s4099_s12 = sphi %s4183_s12, %s6099_s12   ;;  %s4095_s11 = sphi %s4181_s11, %s6095_s11   ;;  %s4091_s10 = sphi %s4179_s10, %s6098_s10   ;;  %s4087_s30 = sphi %s4177_s30, %s6097_s30  }
  0x13   : > { %5893 = sst [smem:[#allocation19_spill]] %s4095_s11  ;;  %s3406_s16 = sadd.s32 4294967294, %s4107_s14  }
  0x14   : > { %5894 = sst [smem:[#allocation20_spill]] %s4107_s14  ;;  %s43_s17 = sadd.s32 1, %s4103_s13 }
  0x15   : > { %s104_s18 = sadd.s32 1, %s4095_s11  ;;  %p45_p0 = scmp.ge.s32.totalorder %s43_s17, 2 }
  0x16   : > { %p111_p1 = scmp.ne.s32.totalorder %s4095_s11, %s4091_s10  ;;  %p112_p2 = scmp.eq.s32.totalorder %s4107_s14, 0 }
  0x17   : > { %p117_p3 = scmp.ne.s32.totalorder %s4091_s10, %s4087_s30  ;;  %s6102_s17 = smov (%p45_p0, %s43_s17), 0 }
  0x18   : > { %5895 = sst [smem:[#allocation21_spill]] %s6102_s17  ;;  %p4220_p4 = por %p112_p2, %p111_p1 }
  0x19   : > { %p118_p5 = scmp.eq.s32.totalorder %s4208_s15, 0  ;;  %s99_s20 = ssub.s32 %s4103_s13, %s6102_s17 }
  0x1a   : > { %p299_p6 = scmp.eq.s32.totalorder %s4208_s15, 1  ;;  %p102_p7 = scmp.eq.s32.totalorder %s99_s20, 0 }
  0x1b   : > { %p4228_p8 = por %p118_p5, %p117_p3  ;;  %p305_p10 = scmp.eq.s32.totalorder %s3406_s16, 1 }
  0x1c   : > { %p4232_p9 = por %p299_p6, %p111_p1  ;;  %p3567_p13 = scmp.lt.s32.totalorder %s4107_s14, 2 }
  0x1d   : > { %s4237_s23 = scalar_select %p102_p7, %s4095_s11, %s104_s18  }
  0x1e   : > { %s5898_s22 = scalar_select %p4232_p9, 1, 0 }
  0x1f   : > { %5900 = sst [smem:[#allocation23_spill]] %s4237_s23  ;;  %p4239_p11 = por %p305_p10, %p117_p3 }
  0x20   : > { %5899 = sst [smem:[#allocation22_spill]] %s5898_s22  ;;  %s4246_s25 = sand.u32 1, %s4095_s11  }
  0x21   : > { %s5901_s24 = scalar_select %p4239_p11, 1, 0 }
  0x22   : > { %s5830_s26 = sand.u32 1, %s4107_s14   ;;  %s3410_s27 = sshll.u32 %s4246_s25, 8 }
  0x23   : > { %5902 = sst [smem:[#allocation24_spill]] %s5901_s24  ;;  %p4252_p0 = pnand %p3567_p13, %p4220_p4 }
  0x24   : > { %s3502_s29 = sshll.u32 %s4103_s13, 12  ;;  %s5904_s3 = sld [smem:[#allocation62_spill]] }
  0x25   : > { %s364_s17 = scalar_lea.vmem [#allocation7], %s3410_s27  ;;  %s4262_s11 = scalar_lea.sflag [#allocation8], %s5830_s26 }
  0x26   : > { %s373_s23 = sshll.u32 %s364_s17, 4  ;;  %p4266_p1 = pneg %p4252_p0  ;;  %s374_s23 = int_to_ptr.vmem [resolvable:$true] %s373_s23 }
  0x27   : > { %s3892_s19 = scalar_lea.vmem %s374_s23, 4096  ;;  %s4109_s30 = smov [#allocation7]  }
  0x28   : > { %p3893_p2 = scmp.ne.s32.totalorder %s374_s23, %s3892_s19  ;;  %s3897_s16 = sshll.u32 %s4109_s30, 4  ;;  %s3898_s16 = int_to_ptr.vmem [resolvable:$false] %s3897_s16 }
  0x29   : > { %s3899_s27 = scalar_lea.vmem %s3898_s16, 8192  ;;  %p3900_p5 = scmp.lt.s32.totalorder %s374_s23, %s3898_s16 }
  0x2a   : > { %s372_s20 = scalar_lea.hbm %s5904_s3, %s3502_s29  ;;  %p3895_p3 = pnand %p3893_p2, %p4266_p1 }
  0x2b   : > { %p3901_p6 = scmp.lt.s32.totalorder %s3899_s27, %s3892_s19 }
  0x2c   : > { %p3896_p4 = pneg %p3895_p3 }
  0x2d   : > { %p3902_p7 = por %p3901_p6, %p3900_p5 }
  0x2f   : > { %p3903_p10 = pnand %p3902_p7, %p3896_p4 }
  0x31   : > { %3906 = shalt.err (!%p3903_p10)
}
  0x32   : > { %s4110_s17 = smov 256   ;;  %s4111_s29 = smov 16  }
  0x33   : > { %3553 = dma.hbm_to_vmem [thread:$0]  (!%p4252_p0), %s372_s20, 4096, %s374_s23, %s4262_s11, %s4110_s17, %s4110_s17, %s4111_s29  }
  0x34   : > { %p3418_p13 = scmp.ge.s32.totalorder %s4107_s14, 1  ;;  %p450_p2 = scmp.lt.s32.totalorder %s4107_s14, 3 }
  0x35   : > { %s5834_s30 = sshll.u32 %s4246_s25, 3  ;;  %s3415_s19 = sshll.u32 %s4103_s13, 7 }
  0x36   : > { %p4278_p3 = pnand %p3418_p13, %p450_p2  ;;  %s404_s16 = scalar_lea.vmem [#allocation10], %s5834_s30 }
  0x37   : > { %s411_s27 = sshll.u32 %s404_s16, 4  ;;  %s5907_s5 = sld [smem:[#allocation63_spill]]  ;;  %s412_s27 = int_to_ptr.vmem [resolvable:$true] %s411_s27 }
  0x38   : > { %s5908_s22 = sand.u32 1, %s4107_s14   ;;  %s3920_s23 = scalar_lea.vmem %s412_s27, 128 }
  0x39   : > { %s4290_s1 = scalar_lea.sflag [#allocation11], %s5908_s22  ;;  %p3921_p4 = scmp.ne.s32.totalorder %s412_s27, %s3920_s23 }
  0x3a   : > { %s4112_s20 = smov [#allocation10]  }
  0x3b   : > { %p3923_p5 = pnand %p3921_p4, %p4266_p1  ;;  %s3925_s17 = sshll.u32 %s4112_s20, 4  ;;  %s3926_s17 = int_to_ptr.vmem [resolvable:$false] %s3925_s17 }
  0x3c   : > { %s3927_s29 = scalar_lea.vmem %s3926_s17, 256  ;;  %p3928_p7 = scmp.lt.s32.totalorder %s412_s27, %s3926_s17 }
  0x3d   : > { %s409_s9 = scalar_lea.hbm %s5907_s5, %s3415_s19  ;;  %p3924_p6 = pneg %p3923_p5 }
  0x3e   : > { %p3929_p10 = scmp.lt.s32.totalorder %s3927_s29, %s3920_s23 }
  0x40   : > { %p3930_p13 = por %p3929_p10, %p3928_p7 }
  0x42   : > { %p3931_p2 = pnand %p3930_p13, %p3924_p6 }
  0x44   : > { %3934 = shalt.err (!%p3931_p2)
}
  0x45   : > { %3559 = dma.hbm_to_vmem [thread:$0]  (!%p4252_p0), %s409_s9, 128, %s412_s27, %s4290_s1  }
  0x46   : > { %s4300_s26 = scalar_lea.hbm %s5822_s6, %s3415_s19  ;;  %s3532_s16 = smul.u32 40, %s4246_s25 }
  0x47   : > { %s3533_s20 = smul.u32 640, %s4103_s13  ;;  %s3413_s23 = sshll.u32 %s4103_s13, 4 }
  0x48   : > { %s343_s5 = scalar_lea.vmem [#allocation4], %s3532_s16  ;;  %s4311_s0 = scalar_lea.hbm %s5820_s4, %s3413_s23 }
  0x49   : > { %s351_s30 = scalar_lea.hbm %s5818_s2, %s3533_s20  ;;  %s353_s14 = sshll.u32 %s343_s5, 4  ;;  %s354_s14 = int_to_ptr.vmem [resolvable:$true] %s353_s14 }
  0x4a   : > { %s340_s9 = scalar_lea.sflag [#allocation5], %s4246_s25  ;;  %s3948_s27 = scalar_lea.vmem %s354_s14, 640 }
  0x4b   : > { %p3949_p4 = scmp.ne.s32.totalorder %s354_s14, %s3948_s27  ;;  %s4113_s19 = smov [#allocation4]  }
  0x4c   : > { %s3953_s3 = sshll.u32 %s4113_s19, 4  ;;  %s3954_s3 = int_to_ptr.vmem [resolvable:$false] %s3953_s3 }
  0x4d   : > { %p3951_p5 = pnand %p3949_p4, %p4266_p1  ;;  %s3955_s22 = scalar_lea.vmem %s3954_s3, 1280 }
  0x4e   : > { %p3956_p7 = scmp.lt.s32.totalorder %s354_s14, %s3954_s3  ;;  %p3957_p10 = scmp.lt.s32.totalorder %s3955_s22, %s3948_s27 }
  0x4f   : > { %p3952_p6 = pneg %p3951_p5 }
  0x50   : > { %p3958_p13 = por %p3957_p10, %p3956_p7 }
  0x52   : > { %p3959_p2 = pnand %p3958_p13, %p3952_p6 }
  0x54   : > { %3962 = shalt.err (!%p3959_p2)
}
  0x55   : > { %3550 = dma.hbm_to_vmem [thread:$0]  (!%p4252_p0), %s351_s30, 640, %s354_s14, %s340_s9  }
  0x56   : > { %s386_s5 = scalar_lea.vmem [#allocation9], %s4246_s25  ;;  %s5909_s8 = sshll.u32 %s4246_s25, 3 }
  0x57   : > { %s393_s7 = sshll.u32 %s386_s5, 4  ;;  %s422_s16 = scalar_lea.vmem [#allocation12], %s5909_s8  ;;  %s394_s7 = int_to_ptr.vmem [resolvable:$true] %s393_s7 }
  0x58   : > { %s429_s20 = sshll.u32 %s422_s16, 4  ;;  %s3976_s23 = scalar_lea.vmem %s394_s7, 16  ;;  %s4321_s20 = int_to_ptr.vmem [resolvable:$true] %s429_s20 }
  0x59   : > { %p3977_p4 = scmp.ne.s32.totalorder %s394_s7, %s3976_s23  ;;  %s4114_s17 = smov [#allocation9]  }
  0x5a   : > { %s3981_s29 = sshll.u32 %s4114_s17, 4  ;;  %s3982_s29 = int_to_ptr.vmem [resolvable:$false] %s3981_s29 }
  0x5b   : > { %p3979_p5 = pnand %p3977_p4, %p4266_p1  ;;  %s3983_s27 = scalar_lea.vmem %s3982_s29, 32 }
  0x5c   : > { %p3984_p7 = scmp.lt.s32.totalorder %s394_s7, %s3982_s29  ;;  %p3985_p10 = scmp.lt.s32.totalorder %s3983_s27, %s3976_s23 }
  0x5d   : > { %p3980_p6 = pneg %p3979_p5 }
  0x5e   : > { %p3986_p13 = por %p3985_p10, %p3984_p7 }
  0x60   : > { %p3987_p2 = pnand %p3986_p13, %p3980_p6 }
  0x62   : > { %3990 = shalt.err (!%p3987_p2)
}
  0x63   : > { %3556 = dma.hbm_to_vmem [thread:$0]  (!%p4252_p0), %s4311_s0, 16, %s394_s7, %s4262_s11  }
  0x64   : > { %s4004_s14 = scalar_lea.vmem %s4321_s20, 128  ;;  %s4115_s25 = smov [#allocation12]  }
  0x65   : > { %p4005_p4 = scmp.ne.s32.totalorder %s4321_s20, %s4004_s14  ;;  %s4009_s30 = sshll.u32 %s4115_s25, 4  ;;  %s4010_s30 = int_to_ptr.vmem [resolvable:$false] %s4009_s30 }
  0x66   : > { %s4011_s9 = scalar_lea.vmem %s4010_s30, 256  ;;  %p4012_p6 = scmp.lt.s32.totalorder %s4321_s20, %s4010_s30 }
  0x67   : > { %p4007_p5 = pnand %p4005_p4, %p4266_p1  ;;  %p4013_p7 = scmp.lt.s32.totalorder %s4011_s9, %s4004_s14 }
  0x69   : > { %p4008_p12 = pneg %p4007_p5  ;;  %p4014_p10 = por %p4013_p7, %p4012_p6 }
  0x6b   : > { %p4015_p13 = pnand %p4014_p10, %p4008_p12 }
  0x6d   : > { %4018 = shalt.err (!%p4015_p13)
}
  0x6e   : > { %3562 = dma.hbm_to_vmem [thread:$0]  (!%p4252_p0), %s4300_s26, 128, %s4321_s20, %s4290_s1  }
  0x6f   : > { %454 = sbr.rel (%p4278_p3) target bundleno = 833 (0x341), region = 56 }
  0x74   : > { %s4342_s0 = sand.u32 1, %s4091_s10  }
  0x75   : > { %s3534_s11 = smul.u32 40, %s4342_s0  ;;  %s457_s24 = scalar_lea.sflag [#allocation5], %s4342_s0 }
  0x77   : > { %s4346_s19 = scalar_lea.vmem [#allocation4], %s3534_s11 }
  0x78   : > { %4070 = dma.done.wait (%p4228_p8), %s457_s24, 640  }
  0x79   : > { %4072 = vsyncadd (%p4228_p8), %s457_s24, 4294966656  ;;  %s465_s1 = sand.u32 1, %s4208_s15   ;;  %s3419_s28 = sshll.u32 %s4342_s0, 8 }
  0x7a   : > { %s466_s18 = scalar_lea.sflag [#allocation8], %s465_s1  ;;  %s4354_s26 = scalar_lea.vmem [#allocation7], %s3419_s28 }
  0x7b   : > { %4074 = dma.done.wait (%p4228_p8), %s466_s18, 4112  }
  0x7c   : > { %4076 = vsyncadd (%p4228_p8), %s466_s18, 4294963184  ;;  %s4361_s3 = sshll.u32 %s4342_s0, 3  ;;  %s477_s22 = scalar_lea.vmem [#allocation9], %s4342_s0 }
  0x7d   : > { %s483_s5 = scalar_lea.sflag [#allocation11], %s465_s1  ;;  %s486_s7 = scalar_lea.vmem [#allocation10], %s4361_s3 }
  0x7e   : > { %4078 = dma.done.wait (%p4228_p8), %s483_s5, 256  }
  0x7f   : > { %4080 = vsyncadd (%p4228_p8), %s483_s5, 4294967040  ;;  %v4370_v0 = vld [vmem:[%s4346_s19 + $0x10] sm:$0xff]  ;;  %v4373_v1 = vld [vmem:[%s4346_s19] sm:$0xff]  ;;  %s4116_s15 = smov 32   ;;  %s4117_s21 = smov 34   ;;  %vm2818_vm5 = vcmask 48128  }
  0x80   : > { %845 = vrot.lane.b32.xlu1 %v4370_v0, %s4116_s15  ;;  %841 = vrot.lane.b32.xlu0 %v4373_v1, %s4116_s15  ;;  %v4380_v2 = vld [vmem:[%s4346_s19 + $0x8] sm:$0xff]  ;;  %v603_v3 = vand.u32 2147483647, %v4373_v1  ;;  %v4384_v4 = vld [vmem:[%s4346_s19 + $0x18] sm:$0xff]  ;;  %v605_v6 = vand.u32 2147483647, %v4370_v0 }
  0x81   : > { %v604_v5 = vand.u32 2147483647, %v4380_v2  ;;  %v4393_v10 = vld [vmem:[%s4346_s19 + $0x20] sm:$0xff]  ;;  %v606_v15 = vand.u32 2147483647, %v4384_v4  ;;  %s4118_s8 = smov 30  }
  0x82   : > { %v608_v7 = vsub.f32 0.0, %v603_v3  ;;  %v610_v12 = vsub.f32 0.0, %v605_v6  ;;  %v607_v14 = vand.u32 2147483647, %v4393_v10  ;;  %s4119_s16 = smov 2   ;;  %s4120_s20 = smov 126  }
  0x83   : > { %v609_v8 = vsub.f32 0.0, %v604_v5  ;;  %v611_v17 = vsub.f32 0.0, %v606_v15  ;;  %s4121_s23 = smov 98   ;;  %v599_v46 = vmin.f32 %v4380_v2, 0.0  ;;  %v598_v47 = vmin.f32 %v4373_v1, 0.0  ;;  %s4122_s17 = smov 96  }
  0x84   : > { %847 = vrot.lane.b32.xlu1 %v4384_v4, %s4116_s15  ;;  %843 = vrot.lane.b32.xlu0 %v4380_v2, %s4116_s15  ;;  %v613_v9 = vmul.f32 1.442695, %v608_v7  ;;  %v617_v13 = vmul.f32 1.442695, %v610_v12  ;;  %v612_v16 = vsub.f32 0.0, %v607_v14  ;;  %v600_v54 = vmin.f32 %v4370_v0, 0.0 }
  0x85   : > { %v615_v11 = vmul.f32 1.442695, %v609_v8  ;;  %v619_v20 = vmul.f32 1.442695, %v611_v17  ;;  %s4123_s29 = smov 94   ;;  %p567_p8 = scmp.lt.s32.totalorder %s4099_s12, 1 }
  0x86   : > { %3677 = vpow2.f32 %v613_v9  ;;  %v621_v18 = vmul.f32 1.442695, %v612_v16  ;;  %v602_v9 = vmin.f32 %v4393_v10, 0.0  ;;  %s5910_s9 = sld [smem:[#allocation60_spill]]  ;;  %vm851_vm6 = vcmask 261120   ;;  %s495_s24 = scalar_lea.vmem [#allocation12], %s4361_s3 }
  0x87   : > { %3679 = vpow2.f32 %v615_v11  ;;  %v601_v11 = vmin.f32 %v4384_v4, 0.0  ;;  %s4504_s27 = scalar_select %p567_p8, %s4099_s12, 1  ;;  %vm708_vm7 = vcmask 277504   ;;  %vm1242_vm8 = vcmask 244736  }
  0x88   : > { %700 = vrot.lane.b32.xlu1 %v4373_v1, %s4117_s21  ;;  %849 = vrot.lane.b32.xlu0 %v4393_v10, %s4116_s15  ;;  %3681 = vpow2.f32 %v617_v13  ;;  %vm1505_vm9 = vcmask 15360   ;;  %vm1768_vm10 = vcmask 1031168   ;;  %vm2031_vm11 = vcmask 801792   ;;  %s6085_s18 = sld [smem:[#allocation64_spill]] }
  0x89   : > { %3683 = vpow2.f32 %v621_v18  ;;  %s3423_s14 = sshll.u32 %s4504_s27, 3  ;;  %vm2294_vm12 = vcmask 785408  }
  0x8a   : > { %3685 = vpow2.f32 %v619_v20 }
  0x8c   : > { %704 = vrot.lane.b32.xlu1 %v4370_v0, %s4117_s21  ;;  %702 = vrot.lane.b32.xlu0 %v4380_v2, %s4117_s21  ;;  %s4516_s11 = scalar_lea.vmem %s5910_s9, %s3423_s14  ;;  %s6089_s9 = sld [smem:[#allocation66_spill]] }
  0x8d   : > { %v2817_v16 = vld [vmem:[%s4516_s11] sm:$0xff] }
  0x90   : > { %1232 = vrot.lane.b32.xlu1 %v4373_v1, %s4118_s8  ;;  %706 = vrot.lane.b32.xlu0 %v4384_v4, %s4117_s21 }
  0x93   : > { %v3678_v19 = vpop.eup %3677 }
  0x94   : > { %1236 = vrot.lane.b32.xlu1 %v4370_v0, %s4118_s8  ;;  %1234 = vrot.lane.b32.xlu0 %v4380_v2, %s4118_s8  ;;  %v3680_v21 = vpop.eup %3679  ;;  %v623_v22 = vadd.f32 1.0, %v3678_v19  ;;  %v626_v27 = vmul.f32 -0.5, %v3678_v19  ;;  %v629_v38 = vand.u32 2147483647, %v3678_v19 }
  0x95   : > { %v632_v23 = vadd.f32 1.0, %v3680_v21  ;;  %v3682_v24 = vpop.eup %3681  ;;  %v635_v26 = vmul.f32 -0.5, %v3680_v21  ;;  %v638_v37 = vand.u32 2147483647, %v3680_v21 }
  0x96   : > { %3687 = vlog2.f32 %v623_v22  ;;  %v641_v25 = vadd.f32 1.0, %v3682_v24  ;;  %v3684_v28 = vpop.eup %3683  ;;  %v627_v31 = vadd.f32 1.0, %v626_v27  ;;  %v644_v34 = vmul.f32 -0.5, %v3682_v24 }
  0x97   : > { %3689 = vlog2.f32 %v632_v23  ;;  %v3686_v29 = vpop.eup %3685  ;;  %v636_v30 = vadd.f32 1.0, %v635_v26  ;;  %v659_v32 = vadd.f32 1.0, %v3684_v28  ;;  %vm639_vm0 = vcmp.lt.f32.partialorder %v638_v37, 0.0004427343 }
  0x98   : > { %1240 = vrot.lane.b32.xlu1 %v4393_v10, %s4118_s8  ;;  %1238 = vrot.lane.b32.xlu0 %v4384_v4, %s4118_s8  ;;  %3691 = vlog2.f32 %v641_v25  ;;  %v650_v35 = vadd.f32 1.0, %v3686_v29  ;;  %v628_v40 = vmul.f32 %v3678_v19, %v627_v31  ;;  %v645_v43 = vadd.f32 1.0, %v644_v34 }
  0x99   : > { %v637_v39 = vmul.f32 %v3680_v21, %v636_v30  ;;  %3693 = vlog2.f32 %v659_v32  ;;  %vm630_vm1 = vcmp.lt.f32.partialorder %v629_v38, 0.0004427343  ;;  %v647_v45 = vand.u32 2147483647, %v3682_v24 }
  0x9a   : > { %3695 = vlog2.f32 %v650_v35  ;;  %v646_v51 = vmul.f32 %v3682_v24, %v645_v43  ;;  %v662_v56 = vmul.f32 -0.5, %v3684_v28  ;;  %v653_v57 = vmul.f32 -0.5, %v3686_v29 }
  0x9b   : > { %vm648_vm2 = vcmp.lt.f32.partialorder %v647_v45, 0.0004427343  ;;  %v665_v63 = vand.u32 2147483647, %v3684_v28  ;;  %v656_v3 = vand.u32 2147483647, %v3686_v29 }
  0x9c   : > { %1497 = vrot.lane.b32.xlu1 %v4380_v2, %s4119_s16  ;;  %1495 = vrot.lane.b32.xlu0 %v4373_v1, %s4119_s16  ;;  %v663_v60 = vadd.f32 1.0, %v662_v56  ;;  %v654_v61 = vadd.f32 1.0, %v653_v57  ;;  %v2819_v19 = vsel %vm2818_vm5, %v2817_v16, -inf }
  0x9d   : > { %vm666_vm3 = vcmp.lt.f32.partialorder %v665_v63, 0.0004427343  ;;  %vm657_vm4 = vcmp.lt.f32.partialorder %v656_v3, 0.0004427343 }
  0x9e   : > { %v664_v6 = vmul.f32 %v3684_v28, %v663_v60  ;;  %v655_v8 = vmul.f32 %v3686_v29, %v654_v61 }
  0xa0   : > { %1501 = vrot.lane.b32.xlu1 %v4384_v4, %s4119_s16  ;;  %1499 = vrot.lane.b32.xlu0 %v4370_v0, %s4119_s16 }
  0xa3   : > { %v3688_v33 = vpop.eup %3687 }
  0xa4   : > { %1760 = vrot.lane.b32.xlu1 %v4380_v2, %s4120_s20  ;;  %1503 = vrot.lane.b32.xlu0 %v4393_v10, %s4119_s16  ;;  %v3690_v36 = vpop.eup %3689  ;;  %v625_v42 = vmul.f32 0.6931472, %v3688_v33 }
  0xa5   : > { %v634_v41 = vmul.f32 0.6931472, %v3690_v36  ;;  %v3692_v44 = vpop.eup %3691 }
  0xa6   : > { %v631_v49 = vsel %vm630_vm1, %v628_v40, %v625_v42  ;;  %v643_v50 = vmul.f32 0.6931472, %v3692_v44  ;;  %v3694_v59 = vpop.eup %3693 }
  0xa7   : > { %v640_v48 = vsel %vm639_vm0, %v637_v39, %v634_v41  ;;  %v4449_v53 = vsub.f32 %v598_v47, %v631_v49  ;;  %v3696_v62 = vpop.eup %3695  ;;  %v661_v5 = vmul.f32 0.6931472, %v3694_v59 }
  0xa8   : > { %1764 = vrot.lane.b32.xlu1 %v4384_v4, %s4120_s20  ;;  %1762 = vrot.lane.b32.xlu0 %v4370_v0, %s4120_s20  ;;  %v4447_v52 = vsub.f32 %v599_v46, %v640_v48  ;;  %v649_v55 = vsel %vm648_vm2, %v646_v51, %v643_v50  ;;  %v652_v7 = vmul.f32 0.6931472, %v3696_v62  ;;  %vm1000_vm2 = vcmask 769024  }
  0xa9   : > { %v4456_v58 = vsub.f32 %v600_v54, %v649_v55  ;;  %v667_v12 = vsel %vm666_vm3, %v664_v6, %v661_v5 }
  0xaa   : > { %v658_v13 = vsel %vm657_vm4, %v655_v8, %v652_v7  ;;  %v4472_v14 = vsub.f32 %v602_v9, %v667_v12 }
  0xab   : > { %v4474_v15 = vsub.f32 %v601_v11, %v658_v13 }
  0xac   : > { %1766 = vrot.lane.b32.xlu1 %v4393_v10, %s4120_s20  ;;  %1758 = vrot.lane.b32.xlu0 %v4373_v1, %s4120_s20 }
  0xb0   : > { %2025 = vrot.lane.b32.xlu1 %v4370_v0, %s4121_s23  ;;  %2023 = vrot.lane.b32.xlu0 %v4380_v2, %s4121_s23 }
  0xb4   : > { %2021 = vrot.lane.b32.xlu1 %v4373_v1, %s4121_s23  ;;  %2027 = vrot.lane.b32.xlu0 %v4384_v4, %s4121_s23 }
  0xb8   : > { %953 = vrot.lane.b32.xlu1 %v4447_v52, %s4116_s15  ;;  %951 = vrot.lane.b32.xlu0 %v4449_v53, %s4116_s15 }
  0xbc   : > { %2029 = vrot.lane.b32.xlu1 %v4393_v10, %s4121_s23  ;;  %955 = vrot.lane.b32.xlu0 %v4456_v58, %s4116_s15 }
  0xc0   : > { %2288 = vrot.lane.b32.xlu1 %v4370_v0, %s4122_s17  ;;  %2286 = vrot.lane.b32.xlu0 %v4380_v2, %s4122_s17 }
  0xc4   : > { %2284 = vrot.lane.b32.xlu1 %v4373_v1, %s4122_s17  ;;  %2290 = vrot.lane.b32.xlu0 %v4384_v4, %s4122_s17 }
  0xc8   : > { %959 = vrot.lane.b32.xlu1 %v4472_v14, %s4116_s15  ;;  %957 = vrot.lane.b32.xlu0 %v4474_v15, %s4116_s15 }
  0xcc   : > { %808 = vrot.lane.b32.xlu1 %v4447_v52, %s4117_s21  ;;  %806 = vrot.lane.b32.xlu0 %v4449_v53, %s4117_s21 }
  0xd0   : > { %2292 = vrot.lane.b32.xlu1 %v4393_v10, %s4122_s17  ;;  %810 = vrot.lane.b32.xlu0 %v4456_v58, %s4117_s21 }
  0xd4   : > { %2551 = vrot.lane.b32.xlu1 %v4370_v0, %s4123_s29  ;;  %2549 = vrot.lane.b32.xlu0 %v4380_v2, %s4123_s29 }
  0xd8   : > { %2547 = vrot.lane.b32.xlu1 %v4373_v1, %s4123_s29  ;;  %2553 = vrot.lane.b32.xlu0 %v4384_v4, %s4123_s29 }
  0xdc   : > { %812 = vrot.lane.b32.xlu1 %v4474_v15, %s4117_s21  ;;  %s6086_s21 = sld [smem:[#allocation65_spill]] }
  0xe0   : > { %1337 = vrot.lane.b32.xlu1 %v4449_v53, %s4118_s8 }
  0xe4   : > { %1339 = vrot.lane.b32.xlu1 %v4447_v52, %s4118_s8 }
  0xe8   : > { %1341 = vrot.lane.b32.xlu1 %v4456_v58, %s4118_s8 }
  0xec   : > { %2555 = vrot.lane.b32.xlu1 %v4393_v10, %s4123_s29 }
  0xf0   : > { %1343 = vrot.lane.b32.xlu1 %v4474_v15, %s4118_s8 }
  0xf2   : > { %v846_v17 = vpop.permute.xlu1 %845  ;;  %v842_v18 = vpop.permute.xlu0 %841 }
  0xf3   : > { %v4527_v22 = vadd.f32 %v842_v18, %v4373_v1 }
  0xf4   : > { %1345 = vrot.lane.b32.xlu1 %v4472_v14, %s4118_s8 }
  0xf5   : > { %v871_v26 = vand.u32 2147483647, %v4527_v22 }
  0xf6   : > { %v848_v20 = vpop.permute.xlu1 %847  ;;  %v844_v21 = vpop.permute.xlu0 %843 }
  0xf7   : > { %2820 = vmax.xlane.f32.xlu0 %v2819_v19  ;;  %v854_v25 = vsel %vm851_vm6, %v846_v17, %v848_v20  ;;  %v852_v29 = vsel %vm851_vm6, %v842_v18, %v844_v21  ;;  %v853_v31 = vsel %vm851_vm6, %v844_v21, %v846_v17  ;;  %v876_v32 = vsub.f32 0.0, %v871_v26 }
  0xf8   : > { %1600 = vrot.lane.b32.xlu1 %v4449_v53, %s4119_s16  ;;  %v4535_v30 = vadd.f32 %v854_v25, %v4384_v4  ;;  %v4541_v33 = vadd.f32 %v852_v29, %v4380_v2  ;;  %v4544_v36 = vadd.f32 %v853_v31, %v4370_v0 }
  0xf9   : > { %v881_v43 = vmul.f32 1.442695, %v876_v32 }
  0xfa   : > { %v701_v23 = vpop.permute.xlu1 %700  ;;  %v850_v24 = vpop.permute.xlu0 %849  ;;  %v874_v37 = vand.u32 2147483647, %v4535_v30  ;;  %v872_v44 = vand.u32 2147483647, %v4541_v33  ;;  %v873_v48 = vand.u32 2147483647, %v4544_v36 }
  0xfb   : > { %v4548_v38 = vadd.f32 %v701_v23, %v4373_v1  ;;  %v855_v39 = vsel %vm851_vm6, %v848_v20, %v850_v24  ;;  %3697 = vpow2.f32 %v881_v43 }
  0xfc   : > { %1604 = vrot.lane.b32.xlu1 %v4456_v58, %s4119_s16  ;;  %v4564_v49 = vadd.f32 %v855_v39, %v4393_v10  ;;  %v879_v54 = vsub.f32 0.0, %v874_v37  ;;  %v877_v60 = vsub.f32 0.0, %v872_v44  ;;  %v878_v9 = vsub.f32 0.0, %v873_v48 }
  0xfd   : > { %v727_v55 = vand.u32 2147483647, %v4548_v38 }
  0xfe   : > { %v705_v27 = vpop.permute.xlu1 %704  ;;  %v703_v28 = vpop.permute.xlu0 %702  ;;  %v875_v3 = vand.u32 2147483647, %v4564_v49  ;;  %v887_v8 = vmul.f32 1.442695, %v879_v54  ;;  %v883_v18 = vmul.f32 1.442695, %v877_v60 }
  0xff   : > { %v709_v45 = vsel %vm708_vm7, %v701_v23, %v703_v28  ;;  %v710_v50 = vsel %vm708_vm7, %v703_v28, %v705_v27  ;;  %v732_v11 = vsub.f32 0.0, %v727_v55  ;;  %v885_v31 = vmul.f32 1.442695, %v878_v9 }
 0x100   : > { %1606 = vrot.lane.b32.xlu1 %v4474_v15, %s4119_s16  ;;  %v4573_v57 = vadd.f32 %v709_v45, %v4380_v2  ;;  %v4576_v61 = vadd.f32 %v710_v50, %v4370_v0  ;;  %v880_v25 = vsub.f32 0.0, %v875_v3  ;;  %3699 = vpow2.f32 %v887_v8 }
 0x101   : > { %v737_v32 = vmul.f32 1.442695, %v732_v11 }
 0x102   : > { %v1233_v34 = vpop.permute.xlu1 %1232  ;;  %v707_v35 = vpop.permute.xlu0 %706  ;;  %v728_v16 = vand.u32 2147483647, %v4573_v57  ;;  %v729_v19 = vand.u32 2147483647, %v4576_v61 }
 0x103   : > { %v711_v40 = vsel %vm708_vm7, %v705_v27, %v707_v35  ;;  %v4558_v42 = vadd.f32 %v707_v35, %v4393_v10  ;;  %v4580_v5 = vadd.f32 %v1233_v34, %v4373_v1 }
 0x104   : > { %1608 = vrot.lane.b32.xlu1 %v4472_v14, %s4119_s16  ;;  %v4555_v41 = vadd.f32 %v711_v40, %v4384_v4  ;;  %v734_v40 = vsub.f32 0.0, %v729_v19 }
 0x105   : > { %v731_v56 = vand.u32 2147483647, %v4558_v42  ;;  %5911 = vst [vmem:[#allocation25_spill] sm:$0xff] %v4580_v5  ;;  %v1262_v26 = vand.u32 2147483647, %v4580_v5 }
 0x106   : > { %v1237_v46 = vpop.permute.xlu1 %1236  ;;  %v1235_v47 = vpop.permute.xlu0 %1234  ;;  %v730_v51 = vand.u32 2147483647, %v4555_v41 }
 0x107   : > { %v736_v6 = vsub.f32 0.0, %v731_v56  ;;  %v1243_v7 = vsel %vm1242_vm8, %v1233_v34, %v1235_v47  ;;  %v1244_v12 = vsel %vm1242_vm8, %v1235_v47, %v1237_v46  ;;  %v733_v34 = vsub.f32 0.0, %v728_v16 }
 0x108   : > { %1865 = vrot.lane.b32.xlu1 %v4447_v52, %s4120_s20  ;;  %v735_v59 = vsub.f32 0.0, %v730_v51  ;;  %v4592_v20 = vadd.f32 %v1243_v7, %v4380_v2  ;;  %v4597_v28 = vadd.f32 %v1244_v12, %v4370_v0  ;;  %v1267_v47 = vsub.f32 0.0, %v1262_v26  ;;  %v4626_v8 = vpop.eup %3697 }
 0x109   : > { %v745_v27 = vmul.f32 1.442695, %v736_v6  ;;  %v739_v56 = vmul.f32 1.442695, %v733_v34 }
 0x10a   : > { %v1241_v62 = vpop.permute.xlu1 %1240  ;;  %v1239_v63 = vpop.permute.xlu0 %1238  ;;  %v743_v17 = vmul.f32 1.442695, %v735_v59  ;;  %5912 = vst [vmem:[#allocation26_spill] sm:$0xff] %v4592_v20  ;;  %5913 = vst [vmem:[#allocation27_spill] sm:$0xff] %v4597_v28  ;;  %v1263_v43 = vand.u32 2147483647, %v4592_v20 }
 0x10b   : > { %v1245_v21 = vsel %vm1242_vm8, %v1237_v46, %v1239_v63  ;;  %v1246_v35 = vsel %vm1242_vm8, %v1239_v63, %v1241_v62  ;;  %v889_v46 = vmul.f32 1.442695, %v880_v25  ;;  %v1264_v48 = vand.u32 2147483647, %v4597_v28 }
 0x10c   : > { %1867 = vrot.lane.b32.xlu1 %v4456_v58, %s4120_s20  ;;  %3701 = vpow2.f32 %v743_v17  ;;  %v4604_v37 = vadd.f32 %v1245_v21, %v4384_v4  ;;  %v4614_v54 = vadd.f32 %v1246_v35, %v4393_v10  ;;  %v741_v62 = vmul.f32 1.442695, %v734_v40 }
 0x10d   : > { %1602 = vrot.lane.b32.xlu0 %v4447_v52, %s4119_s16  ;;  %3703 = vpow2.f32 %v883_v18  ;;  %v1268_v63 = vsub.f32 0.0, %v1263_v43  ;;  %v1272_v11 = vmul.f32 1.442695, %v1267_v47  ;;  %v1269_v12 = vsub.f32 0.0, %v1264_v48 }
 0x10e   : > { %v1498_v23 = vpop.permute.xlu1 %1497  ;;  %v1496_v24 = vpop.permute.xlu0 %1495  ;;  %5914 = vst [vmem:[#allocation28_spill] sm:$0xff] %v4604_v37  ;;  %3705 = vpow2.f32 %v745_v27  ;;  %5915 = vst [vmem:[#allocation29_spill] sm:$0xff] %v4614_v54  ;;  %v1265_v59 = vand.u32 2147483647, %v4604_v37  ;;  %v1266_v18 = vand.u32 2147483647, %v4614_v54 }
 0x10f   : > { %3707 = vpow2.f32 %v885_v31  ;;  %v1506_v3 = vsel %vm1505_vm9, %v1496_v24, %v1498_v23  ;;  %v4633_v19 = vadd.f32 %v1496_v24, %v4373_v1  ;;  %v1274_v31 = vmul.f32 1.442695, %v1268_v63 }
 0x110   : > { %1869 = vrot.lane.b32.xlu1 %v4474_v15, %s4120_s20  ;;  %3709 = vpow2.f32 %v737_v32  ;;  %v1270_v25 = vsub.f32 0.0, %v1265_v59  ;;  %v4639_v26 = vadd.f32 %v1506_v3, %v4380_v2  ;;  %v1276_v40 = vmul.f32 1.442695, %v1269_v12  ;;  %v4652_v59 = vpop.eup %3699 }
 0x111   : > { %1863 = vrot.lane.b32.xlu0 %v4449_v53, %s4120_s20  ;;  %3711 = vpow2.f32 %v889_v46  ;;  %5916 = vst [vmem:[#allocation30_spill] sm:$0xff] %v4633_v19  ;;  %v1271_v47 = vsub.f32 0.0, %v1266_v18  ;;  %v1525_v48 = vand.u32 2147483647, %v4633_v19  ;;  %v894_v46 = vmul.f32 -0.5, %v4626_v8 }
 0x112   : > { %v1502_v44 = vpop.permute.xlu1 %1501  ;;  %v1500_v45 = vpop.permute.xlu0 %1499  ;;  %3713 = vpow2.f32 %v739_v56  ;;  %5917 = vst [vmem:[#allocation31_spill] sm:$0xff] %v4639_v26  ;;  %v891_v56 = vadd.f32 1.0, %v4626_v8 }
 0x113   : > { %3715 = vpow2.f32 %v741_v62  ;;  %v1507_v24 = vsel %vm1505_vm9, %v1498_v23, %v1500_v45  ;;  %v1508_v43 = vsel %vm1505_vm9, %v1500_v45, %v1502_v44  ;;  %v1278_v23 = vmul.f32 1.442695, %v1270_v25 }
 0x114   : > { %1871 = vrot.lane.b32.xlu1 %v4472_v14, %s4120_s20  ;;  %3717 = vpow2.f32 %v1272_v11  ;;  %v1526_v62 = vand.u32 2147483647, %v4639_v26  ;;  %v4656_v63 = vadd.f32 %v1507_v24, %v4370_v0  ;;  %v4665_v12 = vadd.f32 %v1508_v43, %v4384_v4 }
 0x115   : > { %2128 = vrot.lane.b32.xlu0 %v4447_v52, %s4121_s23  ;;  %3719 = vpow2.f32 %v1274_v31  ;;  %v1280_v11 = vmul.f32 1.442695, %v1271_v47  ;;  %v1530_v43 = vsub.f32 0.0, %v1525_v48  ;;  %v895_v51 = vadd.f32 1.0, %v894_v46 }
 0x116   : > { %v4624_v6 = vpop.permute.xlu1 %1760  ;;  %v1504_v7 = vpop.permute.xlu0 %1503  ;;  %5918 = vst [vmem:[#allocation32_spill] sm:$0xff] %v4656_v63  ;;  %5919 = vst [vmem:[#allocation33_spill] sm:$0xff] %v4665_v12  ;;  %3721 = vpow2.f32 %v1276_v40  ;;  %v1527_v9 = vand.u32 2147483647, %v4656_v63  ;;  %v1528_v48 = vand.u32 2147483647, %v4665_v12 }
 0x117   : > { %v1509_v45 = vsel %vm1505_vm9, %v1502_v44, %v1504_v7  ;;  %3723 = vpow2.f32 %v1278_v23  ;;  %v1531_v7 = vsub.f32 0.0, %v1526_v62  ;;  %v1535_v21 = vmul.f32 1.442695, %v1530_v43 }
 0x118   : > { %2130 = vrot.lane.b32.xlu1 %v4456_v58, %s4121_s23  ;;  %v4677_v27 = vadd.f32 %v1509_v45, %v4393_v10  ;;  %3725 = vlog2.f32 %v891_v56  ;;  %v1532_v13 = vsub.f32 0.0, %v1527_v9 }
 0x119   : > { %2132 = vrot.lane.b32.xlu0 %v4474_v15, %s4121_s23  ;;  %v4661_v3 = vpop.eup %3701  ;;  %3727 = vpow2.f32 %v1280_v11  ;;  %v1537_v46 = vmul.f32 1.442695, %v1531_v7 }
 0x11a   : > { %v1765_v32 = vpop.permute.xlu1 %1764  ;;  %v1763_v34 = vpop.permute.xlu0 %1762  ;;  %5920 = vst [vmem:[#allocation34_spill] sm:$0xff] %v4677_v27  ;;  %v774_v44 = vadd.f32 1.0, %v4661_v3  ;;  %v1529_v17 = vand.u32 2147483647, %v4677_v27  ;;  %v777_v56 = vmul.f32 -0.5, %v4661_v3 }
 0x11b   : > { %v4668_v24 = vpop.eup %3703  ;;  %v1770_v31 = vsel %vm1768_vm10, %v4624_v6, %v1763_v34  ;;  %v1771_v16 = vsel %vm1768_vm10, %v1763_v34, %v1765_v32 }
 0x11c   : > { %2126 = vrot.lane.b32.xlu1 %v4449_v53, %s4121_s23  ;;  %v4674_v35 = vpop.eup %3705  ;;  %v4692_v34 = vadd.f32 %v1770_v31, %v4380_v2  ;;  %v900_v55 = vadd.f32 1.0, %v4668_v24  ;;  %v4699_v62 = vadd.f32 %v1771_v16, %v4370_v0  ;;  %3729 = vlog2.f32 %v774_v44 }
 0x11d   : > { %2134 = vrot.lane.b32.xlu0 %v4472_v14, %s4121_s23  ;;  %v4682_v40 = vpop.eup %3707  ;;  %v783_v23 = vadd.f32 1.0, %v4674_v35  ;;  %v786_v63 = vmul.f32 -0.5, %v4674_v35  ;;  %s6087_s23 = sld [smem:[#allocation61_spill]] }
 0x11e   : > { %v1767_v18 = vpop.permute.xlu1 %1766  ;;  %v1759_v25 = vpop.permute.xlu0 %1758  ;;  %5921 = vst [vmem:[#allocation35_spill] sm:$0xff] %v4692_v34  ;;  %5922 = vst [vmem:[#allocation36_spill] sm:$0xff] %v4699_v62  ;;  %v1789_v11 = vand.u32 2147483647, %v4692_v34  ;;  %3731 = vlog2.f32 %v900_v55  ;;  %v1539_v55 = vmul.f32 1.442695, %v1532_v13 }
 0x11f   : > { %v4688_v47 = vpop.eup %3709  ;;  %v1772_v29 = vsel %vm1768_vm10, %v1765_v32, %v1767_v18  ;;  %v1769_v16 = vsel %vm1768_vm10, %v1759_v25, %v4624_v6  ;;  %3733 = vlog2.f32 %v783_v23  ;;  %v1533_v6 = vsub.f32 0.0, %v1528_v48 }
 0x120   : > { %2391 = vrot.lane.b32.xlu1 %v4447_v52, %s4122_s17  ;;  %v4702_v50 = vpop.eup %3711  ;;  %v4717_v43 = vadd.f32 %v1772_v29, %v4384_v4  ;;  %v1790_v25 = vand.u32 2147483647, %v4699_v62  ;;  %v4725_v44 = vadd.f32 %v1767_v18, %v4393_v10  ;;  %3735 = vpow2.f32 %v1535_v21 }
 0x121   : > { %2393 = vrot.lane.b32.xlu0 %v4456_v58, %s4122_s17  ;;  %v4712_v32 = vpop.eup %3713  ;;  %v1534_v29 = vsub.f32 0.0, %v1529_v17  ;;  %v4731_v26 = vadd.f32 %v1769_v16, %v4373_v1  ;;  %v4740_v18 = vmul.f32 %v4626_v8, %v895_v51  ;;  %v897_v23 = vand.u32 2147483647, %v4626_v8 }
 0x122   : > { %v4694_v45 = vpop.permute.xlu1 %2025  ;;  %v2024_v60 = vpop.permute.xlu0 %2023  ;;  %5923 = vst [vmem:[#allocation37_spill] sm:$0xff] %v4717_v43  ;;  %5924 = vst [vmem:[#allocation38_spill] sm:$0xff] %v4725_v44  ;;  %v778_v21 = vadd.f32 1.0, %v777_v56  ;;  %v1794_v17 = vsub.f32 0.0, %v1789_v11  ;;  %v1791_v16 = vand.u32 2147483647, %v4717_v43  ;;  %3737 = vpow2.f32 %v1537_v46 }
 0x123   : > { %v4721_v9 = vpop.eup %3715  ;;  %5925 = vst [vmem:[#allocation39_spill] sm:$0xff] %v4731_v26  ;;  %v2033_v48 = vsel %vm2031_vm11, %v2024_v60, %v4694_v45  ;;  %v1541_v28 = vmul.f32 1.442695, %v1533_v6  ;;  %v1795_v20 = vsub.f32 0.0, %v1790_v25  ;;  %v1792_v51 = vand.u32 2147483647, %v4725_v44 }
 0x124   : > { %2395 = vrot.lane.b32.xlu1 %v4474_v15, %s4122_s17  ;;  %v4727_v7 = vpop.eup %3717  ;;  %v787_v8 = vadd.f32 1.0, %v786_v63  ;;  %v1543_v56 = vmul.f32 1.442695, %v1534_v29  ;;  %v1788_v11 = vand.u32 2147483647, %v4731_v26  ;;  %v4756_v43 = vadd.f32 %v2033_v48, %v4380_v2 }
 0x125   : > { %2389 = vrot.lane.b32.xlu0 %v4449_v53, %s4122_s17  ;;  %v4749_v37 = vpop.eup %3719  ;;  %3739 = vpow2.f32 %v1539_v55  ;;  %v4770_v6 = vmul.f32 %v4661_v3, %v778_v21  ;;  %v1800_v25 = vmul.f32 1.442695, %v1794_v17  ;;  %v1796_v29 = vsub.f32 0.0, %v1791_v16 }
 0x126   : > { %v2022_v31 = vpop.permute.xlu1 %2021  ;;  %v4719_v39 = vpop.permute.xlu0 %2027  ;;  %5926 = vst [vmem:[#allocation40_spill] sm:$0xff] %v4749_v37  ;;  %5928 = vst [vmem:[#allocation42_spill] sm:$0xff] %v4756_v43  ;;  %3741 = vpow2.f32 %v1541_v28  ;;  %v903_v26 = vmul.f32 -0.5, %v4668_v24  ;;  %v2052_v21 = vand.u32 2147483647, %v4756_v43 }
 0x127   : > { %v2032_v19 = vsel %vm2031_vm11, %v2022_v31, %v2024_v60  ;;  %v4752_v5 = vpop.eup %3721  ;;  %v780_v60 = vand.u32 2147483647, %v4661_v3  ;;  %v2034_v48 = vsel %vm2031_vm11, %v4694_v45, %v4719_v39  ;;  %3743 = vpow2.f32 %v1543_v56 }
 0x128   : > { %2397 = vrot.lane.b32.xlu1 %v4472_v14, %s4122_s17  ;;  %5927 = vst [vmem:[#allocation41_spill] sm:$0xff] %v4752_v5  ;;  %v4763_v46 = vadd.f32 %v2032_v19, %v4373_v1  ;;  %v4767_v63 = vpop.eup %3723  ;;  %v1802_v1 = vmul.f32 1.442695, %v1795_v20  ;;  %v1797_v19 = vsub.f32 0.0, %v1792_v51  ;;  %v1793_v3 = vsub.f32 0.0, %v1788_v11  ;;  %s574_s17 = scalar_lea.vmem %s6087_s23, %s3423_s14 }
 0x129   : > { %2654 = vrot.lane.b32.xlu0 %v4447_v52, %s4123_s29  ;;  %5930 = vst [vmem:[#allocation44_spill] sm:$0xff] %v4767_v63  ;;  %v3726_v44 = vpop.eup %3725  ;;  %v4779_v63 = vmul.f32 %v4674_v35, %v787_v8  ;;  %v4788_v20 = vadd.f32 %v2034_v48, %v4370_v0  ;;  %v904_v28 = vadd.f32 1.0, %v903_v26  ;;  %v906_v16 = vand.u32 2147483647, %v4668_v24 }
 0x12a   : > { %v4745_v54 = vpop.permute.xlu1 %953  ;;  %v4747_v13 = vpop.permute.xlu0 %951  ;;  %5929 = vst [vmem:[#allocation43_spill] sm:$0xff] %v4763_v46  ;;  %v2051_v17 = vand.u32 2147483647, %v4763_v46  ;;  %3745 = vpow2.f32 %v1800_v25  ;;  %v1804_v8 = vmul.f32 1.442695, %v1796_v29  ;;  %v909_v11 = vadd.f32 1.0, %v4682_v40 }
 0x12b   : > { %v4784_v45 = vpop.eup %3727  ;;  %5932 = vst [vmem:[#allocation46_spill] sm:$0xff] %v4788_v20  ;;  %vm4791_vm13 = vcmp.lt.f32.partialorder %v897_v23, 0.0004427343  ;;  %vm4796_vm14 = vcmp.lt.f32.partialorder %v780_v60, 0.0004427343  ;;  %3747 = vpow2.f32 %v1802_v1  ;;  %v2057_v48 = vsub.f32 0.0, %v2052_v21 }
 0x12c   : > { %2656 = vrot.lane.b32.xlu1 %v4456_v58, %s4123_s29  ;;  %5931 = vst [vmem:[#allocation45_spill] sm:$0xff] %v4784_v45  ;;  %v3730_v51 = vpop.eup %3729  ;;  %v1806_v0 = vmul.f32 1.442695, %v1797_v19  ;;  %v893_v26 = vmul.f32 0.6931472, %v3726_v44  ;;  %v905_v27 = vmul.f32 %v4668_v24, %v904_v28  ;;  %v2056_v5 = vsub.f32 0.0, %v2051_v17 }
 0x12d   : > { %2658 = vrot.lane.b32.xlu0 %v4474_v15, %s4123_s29  ;;  %v3732_v45 = vpop.eup %3731  ;;  %v1798_v23 = vmul.f32 1.442695, %v1793_v3  ;;  %v2053_v60 = vand.u32 2147483647, %v4788_v20  ;;  %vm907_vm15 = vcmp.lt.f32.partialorder %v906_v16, 0.0004427343  ;;  %3749 = vlog2.f32 %v909_v11 }
 0x12e   : > { %v2030_v31 = vpop.permute.xlu1 %2029  ;;  %v4775_v55 = vpop.permute.xlu0 %955  ;;  %v902_v34 = vmul.f32 0.6931472, %v3732_v45  ;;  %v776_v37 = vmul.f32 0.6931472, %v3730_v51  ;;  %3751 = vpow2.f32 %v1804_v8  ;;  %v899_v24 = vsel %vm4791_vm13, %v4740_v18, %v893_v26  ;;  %v4867_v46 = vld [vmem:[%s4346_s19 + $0x10] sm:$0xff] }
 0x12f   : > { %v2035_v25 = vsel %vm2031_vm11, %v4719_v39, %v2030_v31  ;;  %v3734_v29 = vpop.eup %3733  ;;  %3753 = vpow2.f32 %v1806_v0  ;;  %v5938_v21 = vmin.f32 %v4541_v33, 0.0  ;;  %v2063_v28 = vmul.f32 1.442695, %v2057_v48 }
 0x130   : > { %2652 = vrot.lane.b32.xlu1 %v4449_v53, %s4123_s29  ;;  %v4803_v12 = vpop.eup %3735  ;;  %v908_v1 = vsel %vm907_vm15, %v905_v27, %v902_v34  ;;  %v4807_v44 = vadd.f32 %v2035_v25, %v4384_v4  ;;  %v785_v3 = vmul.f32 0.6931472, %v3734_v29  ;;  %v961_v4 = vsel %vm851_vm6, %v4747_v13, %v4745_v54 }
 0x131   : > { %v937_v45 = vsub.f32 %v5938_v21, %v908_v1  ;;  %v4816_v17 = vpop.eup %3737  ;;  %v4822_v27 = vadd.f32 %v2030_v31, %v4393_v10  ;;  %3755 = vpow2.f32 %v1798_v23  ;;  %v2061_v16 = vmul.f32 1.442695, %v2056_v5  ;;  %v4861_v21 = vld [vmem:[%s4346_s19] sm:$0xff] }
 0x132   : > { %v2289_v43 = vpop.permute.xlu1 %2288  ;;  %v2287_v62 = vpop.permute.xlu0 %2286  ;;  %5937 = vst [vmem:[#allocation47_spill] sm:$0xff] %v4807_v44  ;;  %v2058_v51 = vsub.f32 0.0, %v2053_v60  ;;  %v5940_v33 = vmin.f32 %v4527_v22, 0.0  ;;  %v2054_v11 = vand.u32 2147483647, %v4807_v44  ;;  %v918_v10 = vadd.f32 1.0, %v4652_v59 }
 0x133   : > { %5939 = vst [vmem:[#allocation48_spill] sm:$0xff] %v4822_v27  ;;  %v2296_v34 = vsel %vm2294_vm12, %v2287_v62, %v2289_v43  ;;  %v942_v18 = vsub.f32 %v937_v45, %v4447_v52  ;;  %v4826_v8 = vpop.eup %3739  ;;  %v912_v5 = vmul.f32 -0.5, %v4682_v40  ;;  %v5941_v48 = vand.u32 2147483647, %v4674_v35 }
 0x134   : > { %v936_v56 = vsub.f32 %v5940_v33, %v899_v24  ;;  %v4837_v25 = vadd.f32 %v2296_v34, %v4380_v2  ;;  %v4843_v23 = vpop.eup %3741  ;;  %v2055_v2 = vand.u32 2147483647, %v4822_v27  ;;  %3757 = vlog2.f32 %v918_v10 }
 0x135   : > { %v971_v31 = vsub.f32 %v942_v18, %v961_v4  ;;  %vm4850_vm0 = vcmp.lt.f32.partialorder %v5941_v48, 0.0004427343  ;;  %v4855_v1 = vpop.eup %3743  ;;  %3759 = vpow2.f32 %v2063_v28  ;;  %v2059_v35 = vsub.f32 0.0, %v2054_v11 }
 0x136   : > { %v2285_v39 = vpop.permute.xlu1 %2284  ;;  %v4809_v19 = vpop.permute.xlu0 %2290  ;;  %v927_v45 = vadd.f32 1.0, %v4702_v50  ;;  %3761 = vpow2.f32 %v2061_v16  ;;  %v2315_v28 = vand.u32 2147483647, %v4837_v25  ;;  %v2060_v18 = vsub.f32 0.0, %v2055_v2 }
 0x137   : > { %v2295_v0 = vsel %vm2294_vm12, %v2285_v39, %v2287_v62  ;;  %v2297_v22 = vsel %vm2294_vm12, %v2289_v43, %v4809_v19  ;;  %v782_v62 = vsel %vm4796_vm14, %v4770_v6, %v776_v37  ;;  %v791_v43 = vsel %vm4850_vm0, %v4779_v63, %v785_v3  ;;  %v4875_v34 = vpop.eup %3745 }
 0x138   : > { %v2065_v39 = vmul.f32 1.442695, %v2058_v51  ;;  %v981_v24 = vpack.c.bf16 %v971_v31, %v971_v31  ;;  %v4864_v37 = vadd.f32 %v4861_v21, %v2295_v0  ;;  %v4870_v6 = vadd.f32 %v4867_v46, %v2297_v22  ;;  %v4880_v51 = vpop.eup %3747 }
 0x139   : > { %v941_v63 = vsub.f32 %v936_v56, %v4449_v53  ;;  %v913_v3 = vadd.f32 1.0, %v912_v5  ;;  %v915_v33 = vand.u32 2147483647, %v4682_v40  ;;  %v921_v11 = vmul.f32 -0.5, %v4652_v59 }
 0x13a   : > { %v4832_v26 = vpop.permute.xlu1 %959  ;;  %v4841_v29 = vpop.permute.xlu0 %957  ;;  %5944 = vst [vmem:[#allocation49_spill] sm:$0xff] %v4864_v37  ;;  %5945 = vst [vmem:[#allocation50_spill] sm:$0xff] %v4870_v6  ;;  %992 = vrot.lane.b32.xlu0 %v981_v24, %s4123_s29  ;;  %3763 = vlog2.f32 %v927_v45  ;;  %v5946_v0 = vmin.f32 %v4555_v41, 0.0  ;;  %v5947_v16 = vmin.f32 %v4558_v42, 0.0  ;;  %v2314_v31 = vand.u32 2147483647, %v4864_v37 }
 0x13b   : > { %3765 = vpow2.f32 %v2065_v39  ;;  %v3750_v22 = vpop.eup %3749  ;;  %v4896_v48 = vsub.f32 %v941_v63, %v4747_v13  ;;  %v2067_v60 = vmul.f32 1.442695, %v2059_v35  ;;  %v2316_v2 = vand.u32 2147483647, %v4870_v6 }
 0x13c   : > { %v4886_v10 = vsub.f32 %v5946_v0, %v782_v62  ;;  %v4890_v56 = vsub.f32 %v5947_v16, %v791_v43  ;;  %v747_v41 = vadd.f32 1.0, %v4688_v47  ;;  %v4900_v24 = vpop.eup %3751  ;;  %v911_v42 = vmul.f32 0.6931472, %v3750_v22 }
 0x13d   : > { %v914_v43 = vmul.f32 %v4682_v40, %v913_v3  ;;  %v2320_v39 = vsub.f32 0.0, %v2315_v28  ;;  %v756_v45 = vadd.f32 1.0, %v4712_v32  ;;  %v4906_v0 = vpop.eup %3753  ;;  %v2069_v13 = vmul.f32 1.442695, %v2060_v18 }
 0x13e   : > { %v4873_v4 = vpop.permute.xlu1 %808  ;;  %v4893_v5 = vpop.permute.xlu0 %806  ;;  %2660 = vrot.lane.b32.xlu0 %v4472_v14, %s4123_s29  ;;  %5948 = vst [vmem:[#allocation51_spill] sm:$0xff] %v4906_v0  ;;  %vm916_vm1 = vcmp.lt.f32.partialorder %v915_v33, 0.0004427343  ;;  %v922_v35 = vadd.f32 1.0, %v921_v11  ;;  %3767 = vlog2.f32 %v747_v41  ;;  %v2319_v16 = vsub.f32 0.0, %v2314_v31  ;;  %v4953_v0 = vld [vmem:[%s4346_s19 + $0x20] sm:$0xff] }
 0x13f   : > { %v917_v63 = vsel %vm916_vm1, %v914_v43, %v911_v42  ;;  %v924_v6 = vand.u32 2147483647, %v4652_v59  ;;  %3769 = vlog2.f32 %v756_v45  ;;  %v4909_v22 = vpop.eup %3755  ;;  %v5950_v40 = vmin.f32 %v4544_v36, 0.0 }
 0x140   : > { %5949 = vst [vmem:[#allocation52_spill] sm:$0xff] %v4909_v22  ;;  %v962_v28 = vsel %vm851_vm6, %v4745_v54, %v4775_v55  ;;  %v2321_v37 = vsub.f32 0.0, %v2316_v2  ;;  %v930_v18 = vmul.f32 -0.5, %v4702_v50  ;;  %3771 = vpow2.f32 %v2067_v60 }
 0x141   : > { %v938_v3 = vsub.f32 %v5950_v40, %v917_v63  ;;  %v2326_v11 = vmul.f32 1.442695, %v2320_v39  ;;  %v933_v31 = vand.u32 2147483647, %v4702_v50  ;;  %v765_v41 = vadd.f32 1.0, %v4721_v9  ;;  %v3758_v2 = vpop.eup %3757 }
 0x142   : > { %v2293_v62 = vpop.permute.xlu1 %2292  ;;  %v4921_v42 = vpop.permute.xlu0 %810  ;;  %3773 = vpow2.f32 %v2069_v13  ;;  %v923_v43 = vmul.f32 %v4652_v59, %v922_v35  ;;  %v750_v54 = vmul.f32 -0.5, %v4688_v47  ;;  %v2324_v45 = vmul.f32 1.442695, %v2319_v16  ;;  %v3629_v16 = vld [vmem:[%s4354_s26 + $0x24] ss:$16 sps:$4 sm:$0xff]  }
 0x143   : > { %v943_v36 = vsub.f32 %v938_v3, %v4456_v58  ;;  %vm4926_vm3 = vcmp.lt.f32.partialorder %v924_v6, 0.0004427343  ;;  %v759_v60 = vmul.f32 -0.5, %v4712_v32  ;;  %3775 = vlog2.f32 %v765_v41  ;;  %v4931_v3 = vpop.eup %3759  ;;  %1043 = vmatprep.subr.bf16.mxu0 %v3629_v16 }
 0x144   : > { %v2328_v40 = vmul.f32 1.442695, %v2321_v37  ;;  %v920_v27 = vmul.f32 0.6931472, %v3758_v2  ;;  %v931_v13 = vadd.f32 1.0, %v930_v18  ;;  %5953 = vst [vmem:[#allocation53_spill] sm:$0xff] %v4931_v3  ;;  %v980_v59 = vpack.c.bf16 %v4896_v48, %v4896_v48  ;;  %v4941_v41 = vpop.eup %3761 }
 0x145   : > { %v972_v39 = vsub.f32 %v943_v36, %v962_v28  ;;  %3777 = vpow2.f32 %v2326_v11  ;;  %vm4935_vm4 = vcmp.lt.f32.partialorder %v933_v31, 0.0004427343  ;;  %v753_v35 = vand.u32 2147483647, %v4688_v47 }
 0x146   : > { %v4917_v33 = vpop.permute.xlu1 %2551  ;;  %v926_v28 = vsel %vm4926_vm3, %v923_v43, %v920_v27  ;;  %v963_v18 = vsel %vm851_vm6, %v4775_v55, %v4841_v29  ;;  %v751_v36 = vadd.f32 1.0, %v750_v54  ;;  %v5956_v11 = vmin.f32 %v4535_v30, 0.0  ;;  %v2550_v27 = vpop.permute.xlu0 %2549 }
 0x147   : > { %v982_v37 = vpack.c.bf16 %v972_v39, %v972_v39  ;;  %v3764_v48 = vpop.eup %3763  ;;  %v760_v2 = vadd.f32 1.0, %v759_v60  ;;  %v2298_v3 = vsel %vm2294_vm12, %v4809_v19, %v2293_v62  ;;  %v4956_v39 = vadd.f32 %v4953_v0, %v2293_v62  ;;  %v3631_v62 = vld [vmem:[%s4354_s26 + $0x20] ss:$16 sps:$4 sm:$0xff]  }
 0x148   : > { %v939_v31 = vsub.f32 %v5956_v11, %v926_v28  ;;  %v4958_v43 = vpop.eup %3765  ;;  %v929_v55 = vmul.f32 0.6931472, %v3764_v48  ;;  %v932_v30 = vmul.f32 %v4702_v50, %v931_v13  ;;  %v964_v54 = vsel %vm851_vm6, %v4841_v29, %v4832_v26  ;;  %v4979_v26 = vld [vmem:[%s4346_s19 + $0x18] sm:$0xff]  ;;  %1044 = vmatpush1.bf16.xpose.msra.mxu0 %v3631_v62 }
 0x149   : > { %5957 = vst [vmem:[#allocation54_spill] sm:$0xff] %v4956_v39  ;;  %5958 = vst [vmem:[#allocation55_spill] sm:$0xff] %v4958_v43  ;;  %994 = vrot.lane.b32.xlu1 %v982_v37, %s4123_s29  ;;  %v768_v19 = vmul.f32 -0.5, %v4721_v9  ;;  %3779 = vpow2.f32 %v2324_v45  ;;  %vm4970_vm13 = vcmp.lt.f32.partialorder %v753_v35, 0.0004427343  ;;  %v752_v13 = vmul.f32 %v4688_v47, %v751_v36 }
 0x14a   : > { %v2548_v22 = vpop.permute.xlu1 %2547  ;;  %v944_v60 = vsub.f32 %v939_v31, %v4474_v15  ;;  %v762_v37 = vand.u32 2147483647, %v4712_v32  ;;  %v935_v50 = vsel %vm4935_vm4, %v932_v30, %v929_v55  ;;  %v4982_v29 = vadd.f32 %v4979_v26, %v2298_v3 }
 0x14b   : > { %v2559_v45 = vsel %vm1000_vm2, %v2550_v27, %v4917_v33  ;;  %v3768_v35 = vpop.eup %3767  ;;  %v5962_v28 = vmin.f32 %v4564_v49, 0.0  ;;  %v761_v6 = vmul.f32 %v4712_v32, %v760_v2  ;;  %v2318_v31 = vand.u32 2147483647, %v4956_v39  ;;  %v3877_v32 = vld [vmem:[%s4346_s19 + $0x8] sm:$0xff]  ;;  %s3503_s19 = sshll.u32 %s4504_s27, 4  ;;  %s566_s27 = scalar_lea.vmem [#allocation13], %s4361_s3 }
 0x14c   : > { %5961 = vst [vmem:[#allocation56_spill] sm:$0xff] %v4982_v29  ;;  %v973_v11 = vsub.f32 %v944_v60, %v963_v18  ;;  %v3770_v47 = vpop.eup %3769  ;;  %v749_v36 = vmul.f32 0.6931472, %v3768_v35  ;;  %v769_v3 = vadd.f32 1.0, %v768_v19  ;;  %v771_v55 = vand.u32 2147483647, %v4721_v9  ;;  %s580_s5 = scalar_lea.vmem %s6085_s18, %s3503_s19  ;;  %s585_s8 = scalar_lea.vmem %s6086_s21, %s3503_s19 }
 0x14d   : > { %v940_v48 = vsub.f32 %v5962_v28, %v935_v50  ;;  %990 = vrot.lane.b32.xlu1 %v980_v59, %s4123_s29  ;;  %v2558_v30 = vsel %vm1000_vm2, %v2548_v22, %v2550_v27  ;;  %v758_v18 = vmul.f32 0.6931472, %v3770_v47  ;;  %v4997_v2 = vadd.f32 %v3877_v32, %v2559_v45  ;;  %v4999_v60 = vpop.eup %3771  ;;  %v3632_v28 = vld [vmem:[%s4354_s26 + $0x2c] ss:$16 sps:$4 sm:$0xff]   ;;  %s3190_s14 = sshll.u32 %s566_s27, 4  ;;  %s3191_s14 = int_to_ptr.vmem [resolvable:$true] %s3190_s14 }
 0x14e   : > { %v4966_v63 = vpop.permute.xlu1 %812  ;;  %v983_v49 = vpack.c.bf16 %v973_v11, %v973_v11  ;;  %3781 = vpow2.f32 %v2328_v40  ;;  %v755_v59 = vsel %vm4970_vm13, %v752_v13, %v749_v36  ;;  %vm763_vm6 = vcmp.lt.f32.partialorder %v762_v37, 0.0004427343  ;;  %v3634_v40 = vld [vmem:[%s4354_s26 + $0x28] ss:$16 sps:$4 sm:$0xff]   ;;  %1083 = vmatprep.subr.bf16.mxu1 %v3632_v28  ;;  %s4019_s19 = scalar_lea.vmem %s3191_s14, 128 }
 0x14f   : > { %v945_v43 = vsub.f32 %v940_v48, %v4472_v14  ;;  %5963 = vst [vmem:[#allocation57_spill] sm:$0xff] %v4997_v2  ;;  %v2317_v22 = vand.u32 2147483647, %v4982_v29  ;;  %v5004_v27 = vpop.eup %3773  ;;  %v764_v50 = vsel %vm763_vm6, %v761_v6, %v758_v18  ;;  %v2323_v35 = vsub.f32 0.0, %v2318_v31  ;;  %v3637_v31 = vld [vmem:[%s4354_s26 + $0x4] ss:$16 sps:$4 sm:$0xff]   ;;  %1084 = vmatpush1.bf16.xpose.msra.mxu1 %v3634_v40  ;;  %p4020_p12 = scmp.ne.s32.totalorder %s3191_s14, %s4019_s19 }
 0x150   : > { %996 = vrot.lane.b32.xlu0 %v983_v49, %s4123_s29  ;;  %v5008_v45 = vadd.f32 %v4861_v21, %v2558_v30  ;;  %v3776_v48 = vpop.eup %3775  ;;  %v5965_v16 = vmin.f32 %v4548_v38, 0.0  ;;  %v5966_v13 = vmin.f32 %v4573_v57, 0.0  ;;  %vm5019_vm14 = vcmp.lt.f32.partialorder %v771_v55, 0.0004427343  ;;  %v5023_v21 = vpop.permute.xlu0 %2553  ;;  %v3640_v30 = vld [vmem:[%s4354_s26 + $0xc] ss:$16 sps:$4 sm:$0xff]   ;;  %1166 = vmatprep.subr.bf16.mxu0 %v3637_v31 }
 0x151   : > { %v974_v19 = vsub.f32 %v945_v43, %v964_v54  ;;  %v814_v43 = vsel %vm708_vm7, %v4893_v5, %v4873_v4  ;;  %v767_v36 = vmul.f32 0.6931472, %v3776_v48  ;;  %v770_v38 = vmul.f32 %v4721_v9, %v769_v3  ;;  %1206 = vmatprep.subr.bf16.mxu1 %v3640_v30  ;;  %v5971_v54 = vld [vmem:[#allocation40_spill] sm:$0xff]  ;;  %p4021_p0 = pnand %p4020_p12, %p4232_p9 }
 0x152   : > { %v4993_v62 = vpop.permute.xlu1 %1337  ;;  %5964 = vst [vmem:[#allocation58_spill] sm:$0xff] %v5008_v45  ;;  %v792_v37 = vsub.f32 %v5965_v16, %v755_v59  ;;  %v793_v11 = vsub.f32 %v5966_v13, %v764_v50  ;;  %v2578_v57 = vand.u32 2147483647, %v4997_v2  ;;  %v5031_v49 = vpop.eup %3777  ;;  %v2322_v18 = vsub.f32 0.0, %v2317_v22 }
 0x153   : > { %v984_v47 = vpack.c.bf16 %v974_v19, %v974_v19  ;;  %v815_v32 = vsel %vm708_vm7, %v4873_v4, %v4921_v42  ;;  %v1282_v59 = vadd.f32 1.0, %v4727_v7  ;;  %v2332_v9 = vmul.f32 1.442695, %v2323_v35  ;;  %p4022_p1 = pneg %p4021_p0 }
 0x154   : > { %v798_v55 = vsub.f32 %v793_v11, %v4447_v52  ;;  %v773_v3 = vsel %vm5019_vm14, %v770_v38, %v767_v36  ;;  %v2577_v19 = vand.u32 2147483647, %v5008_v45  ;;  %v2560_v22 = vsel %vm1000_vm2, %v4917_v33, %v5023_v21 }
 0x155   : > { %998 = vrot.lane.b32.xlu1 %v984_v47, %s4123_s29  ;;  %v797_v50 = vsub.f32 %v792_v37, %v4449_v53  ;;  %v5969_v28 = vmin.f32 %v4576_v61, 0.0  ;;  %v816_v35 = vsel %vm708_vm7, %v4921_v42, %v4966_v63  ;;  %v2583_v16 = vsub.f32 0.0, %v2578_v57  ;;  %v5973_v57 = vld [vmem:[#allocation41_spill] sm:$0xff] }
 0x156   : > { %v5025_v6 = vpop.permute.xlu1 %1339  ;;  %v823_v4 = vsub.f32 %v798_v55, %v814_v43  ;;  %v800_v13 = vsub.f32 %v4886_v10, %v4474_v15  ;;  %v801_v33 = vsub.f32 %v4890_v56, %v4472_v14  ;;  %3783 = vlog2.f32 %v1282_v59  ;;  %v5057_v11 = vpop.eup %3779  ;;  %v5974_v55 = vld [vmem:[#allocation33_spill] sm:$0xff] }
 0x157   : > { %v794_v40 = vsub.f32 %v5969_v28, %v773_v3  ;;  %5970 = vst [vmem:[#allocation59_spill] sm:$0xff] %v5057_v11  ;;  %v822_v37 = vsub.f32 %v797_v50, %v4893_v5  ;;  %v1291_v31 = vadd.f32 1.0, %v5971_v54  ;;  %v2330_v42 = vmul.f32 1.442695, %v2322_v18  ;;  %v5975_v3 = vld [vmem:[#allocation34_spill] sm:$0xff]  ;;  %v5977_v28 = vld [vmem:[#allocation36_spill] sm:$0xff] }
 0x158   : > { %v832_v61 = vpack.c.bf16 %v823_v4, %v823_v4  ;;  %v2582_v47 = vsub.f32 0.0, %v2577_v19  ;;  %v5063_v36 = vadd.f32 %v4867_v46, %v2560_v22  ;;  %v825_v38 = vsub.f32 %v800_v13, %v816_v35  ;;  %v5976_v4 = vld [vmem:[#allocation35_spill] sm:$0xff]  ;;  %v5983_v50 = vld [vmem:[#allocation45_spill] sm:$0xff] }
 0x159   : > { %v799_v43 = vsub.f32 %v794_v40, %v4456_v58  ;;  %v826_v56 = vsub.f32 %v801_v33, %v4966_v63  ;;  %3785 = vlog2.f32 %v1291_v31  ;;  %v1300_v30 = vadd.f32 1.0, %v5973_v57  ;;  %v5978_v33 = vld [vmem:[#allocation44_spill] sm:$0xff]  ;;  %v5981_v63 = vld [vmem:[#allocation39_spill] sm:$0xff]  ;;  %v5992_v11 = vld [vmem:[#allocation25_spill] sm:$0xff] }
 0x15a   : > { %v5051_v48 = vpop.permute.xlu1 %1341  ;;  %5972 = vst [vmem:[#allocation40_spill] sm:$0xff] %v5063_v36  ;;  %1116 = vrot.lane.b32.xlu0 %v832_v61, %s4123_s29  ;;  %3787 = vpow2.f32 %v2332_v9  ;;  %v2589_v18 = vmul.f32 1.442695, %v2583_v16  ;;  %v831_v19 = vpack.c.bf16 %v822_v37, %v822_v37  ;;  %v1285_v22 = vmul.f32 -0.5, %v4727_v7 }
 0x15b   : > { %v824_v10 = vsub.f32 %v799_v43, %v815_v32  ;;  %3789 = vlog2.f32 %v1300_v30  ;;  %v5073_v32 = vpop.eup %3781  ;;  %v2587_v35 = vmul.f32 1.442695, %v2582_v47  ;;  %v2579_v9 = vand.u32 2147483647, %v5063_v36  ;;  %v5979_v43 = vld [vmem:[#allocation37_spill] sm:$0xff] }
 0x15c   : > { %3791 = vpow2.f32 %v2330_v42  ;;  %v834_v16 = vpack.c.bf16 %v825_v38, %v825_v38  ;;  %v835_v13 = vpack.c.bf16 %v826_v56, %v826_v56  ;;  %v1309_v37 = vadd.f32 1.0, %v5978_v33 }
 0x15d   : > { %v833_v46 = vpack.c.bf16 %v824_v10, %v824_v10  ;;  %v5980_v10 = vld [vmem:[#allocation38_spill] sm:$0xff]  ;;  %3793 = vpow2.f32 %v2589_v18  ;;  %v1286_v42 = vadd.f32 1.0, %v1285_v22  ;;  %v1288_v47 = vand.u32 2147483647, %v4727_v7 }
 0x15e   : > { %v5068_v5 = vpop.permute.xlu1 %2555  ;;  %1114 = vrot.lane.b32.xlu0 %v831_v19, %s4123_s29  ;;  %v1294_v19 = vmul.f32 -0.5, %v5971_v54  ;;  %3795 = vlog2.f32 %v1309_v37  ;;  %v1303_v56 = vmul.f32 -0.5, %v5973_v57  ;;  %v1318_v59 = vadd.f32 1.0, %v5983_v50 }
 0x15f   : > { %1118 = vrot.lane.b32.xlu1 %v833_v46, %s4123_s29  ;;  %3797 = vpow2.f32 %v2587_v35  ;;  %v2584_v45 = vsub.f32 0.0, %v2579_v9  ;;  %v1297_v18 = vand.u32 2147483647, %v5971_v54  ;;  %v2561_v22 = vsel %vm1000_vm2, %v5023_v21, %v5068_v5 }
 0x160   : > { %v1545_v37 = vadd.f32 1.0, %v4803_v12  ;;  %3799 = vlog2.f32 %v1318_v59  ;;  %vm5104_vm7 = vcmp.lt.f32.partialorder %v1288_v47, 0.0004427343  ;;  %v1295_v36 = vadd.f32 1.0, %v1294_v19 }
 0x161   : > { %v1304_v2 = vadd.f32 1.0, %v1303_v56  ;;  %v5109_v39 = vadd.f32 %v4979_v26, %v2561_v22  ;;  %v1312_v38 = vmul.f32 -0.5, %v5978_v33  ;;  %v5112_v40 = vmul.f32 1.442695, %v2584_v45 }
 0x162   : > { %v5081_v61 = vpop.permute.xlu1 %1343  ;;  %1122 = vrot.lane.b32.xlu0 %v835_v13, %s4123_s29  ;;  %3801 = vlog2.f32 %v1545_v37  ;;  %vm5114_vm15 = vcmp.lt.f32.partialorder %v1297_v18, 0.0004427343  ;;  %v1572_v47 = vadd.f32 1.0, %v4843_v23  ;;  %v1306_v56 = vand.u32 2147483647, %v5973_v57 }
 0x163   : > { %1120 = vrot.lane.b32.xlu1 %v834_v16, %s4123_s29  ;;  %v3784_v13 = vpop.eup %3783  ;;  %v1287_v16 = vmul.f32 %v4727_v7, %v1286_v42  ;;  %5987 = vst [vmem:[#allocation41_spill] sm:$0xff] %v5109_v39  ;;  %v1347_v7 = vsel %vm1242_vm8, %v4993_v62, %v5025_v6  ;;  %v1321_v45 = vmul.f32 -0.5, %v5983_v50  ;;  %v1581_v18 = vadd.f32 1.0, %v4855_v1 }
 0x164   : > { %v1284_v21 = vmul.f32 0.6931472, %v3784_v13  ;;  %v1296_v13 = vmul.f32 %v5971_v54, %v1295_v36  ;;  %v5134_v9 = vadd.f32 %v4953_v0, %v5068_v5  ;;  %v1315_v29 = vand.u32 2147483647, %v5978_v33  ;;  %v5994_v5 = vld [vmem:[#allocation26_spill] sm:$0xff] }
 0x165   : > { %v1305_v31 = vmul.f32 %v5973_v57, %v1304_v2  ;;  %3803 = vlog2.f32 %v1572_v47  ;;  %v5995_v20 = vmin.f32 %v5994_v5, 0.0  ;;  %vm1307_vm0 = vcmp.lt.f32.partialorder %v1306_v56, 0.0004427343  ;;  %v5998_v56 = vld [vmem:[#allocation27_spill] sm:$0xff] }
 0x166   : > { %v5097_v30 = vpop.permute.xlu1 %1345  ;;  %v3786_v19 = vpop.eup %3785  ;;  %v1290_v26 = vsel %vm5104_vm7, %v1287_v16, %v1284_v21  ;;  %5991 = vst [vmem:[#allocation34_spill] sm:$0xff] %v5134_v9  ;;  %v2580_v16 = vand.u32 2147483647, %v5109_v39  ;;  %v1313_v21 = vadd.f32 1.0, %v1312_v38  ;;  %3805 = vlog2.f32 %v1581_v18  ;;  %v6000_v39 = vld [vmem:[#allocation28_spill] sm:$0xff] }
 0x167   : > { %v5129_v22 = vpop.eup %3787  ;;  %v1293_v37 = vmul.f32 0.6931472, %v3786_v19  ;;  %v1322_v2 = vadd.f32 1.0, %v1321_v45  ;;  %v1548_v57 = vmul.f32 -0.5, %v4803_v12  ;;  %v2581_v59 = vand.u32 2147483647, %v5134_v9 }
 0x168   : > { %5990 = vst [vmem:[#allocation33_spill] sm:$0xff] %v5129_v22  ;;  %v3790_v44 = vpop.eup %3789  ;;  %v5993_v22 = vmin.f32 %v5992_v11, 0.0  ;;  %v1348_v11 = vsel %vm1242_vm8, %v5025_v6, %v5051_v48  ;;  %vm5156_vm1 = vcmp.lt.f32.partialorder %v1315_v29, 0.0004427343  ;;  %v5999_v45 = vmin.f32 %v5998_v56, 0.0 }
 0x169   : > { %v5139_v35 = vpop.eup %3791  ;;  %v1299_v54 = vsel %vm5114_vm15, %v1296_v13, %v1293_v37  ;;  %v1302_v36 = vmul.f32 0.6931472, %v3790_v44  ;;  %v1349_v37 = vsel %vm1242_vm8, %v5051_v48, %v5081_v61  ;;  %v1314_v29 = vmul.f32 %v5978_v33, %v1313_v21 }
 0x16a   : > { %v5121_v42 = vpop.permute.xlu1 %1600  ;;  %v1327_v19 = vsub.f32 %v5993_v22, %v1290_v26  ;;  %v1328_v46 = vsub.f32 %v5995_v20, %v1299_v54  ;;  %v5150_v38 = vpop.eup %3793  ;;  %v2585_v22 = vsub.f32 0.0, %v2580_v16  ;;  %v1324_v54 = vand.u32 2147483647, %v5983_v50 }
 0x16b   : > { %v1308_v47 = vsel %vm1307_vm0, %v1305_v31, %v1302_v36  ;;  %v3796_v26 = vpop.eup %3795  ;;  %v1323_v16 = vmul.f32 %v5983_v50, %v1322_v2  ;;  %v1826_v33 = vadd.f32 1.0, %v4880_v51  ;;  %v1350_v50 = vsel %vm1242_vm8, %v5081_v61, %v5097_v30 }
 0x16c   : > { %v1333_v20 = vsub.f32 %v1328_v46, %v4447_v52  ;;  %v1329_v18 = vsub.f32 %v5999_v45, %v1308_v47  ;;  %v5166_v13 = vpop.eup %3797  ;;  %v1332_v6 = vsub.f32 %v1327_v19, %v4449_v53  ;;  %v1311_v31 = vmul.f32 0.6931472, %v3796_v26 }
 0x16d   : > { %v1549_v47 = vadd.f32 1.0, %v1548_v57  ;;  %v3800_v56 = vpop.eup %3799  ;;  %v1817_v19 = vadd.f32 1.0, %v4875_v34  ;;  %vm1325_vm3 = vcmp.lt.f32.partialorder %v1324_v54, 0.0004427343  ;;  %v1575_v2 = vmul.f32 -0.5, %v4843_v23 }
 0x16e   : > { %v5145_v0 = vpop.permute.xlu1 %1604  ;;  %v1357_v46 = vsub.f32 %v1333_v20, %v1347_v7  ;;  %v1334_v5 = vsub.f32 %v1329_v18, %v4456_v58  ;;  %v1356_v48 = vsub.f32 %v1332_v6, %v4993_v62  ;;  %v1317_v45 = vsel %vm5156_vm1, %v1314_v29, %v1311_v31  ;;  %v6002_v31 = vld [vmem:[#allocation29_spill] sm:$0xff] }
 0x16f   : > { %v3802_v21 = vpop.eup %3801  ;;  %v6001_v7 = vmin.f32 %v6000_v39, 0.0  ;;  %v1320_v18 = vmul.f32 0.6931472, %v3800_v56  ;;  %v1551_v62 = vand.u32 2147483647, %v4803_v12  ;;  %v6003_v39 = vmin.f32 %v6002_v31, 0.0 }
 0x170   : > { %v1367_v26 = vpack.c.bf16 %v1357_v46, %v1357_v46  ;;  %v1358_v9 = vsub.f32 %v1334_v5, %v1348_v11  ;;  %v1547_v11 = vmul.f32 0.6931472, %v3802_v21  ;;  %v1584_v54 = vmul.f32 -0.5, %v4855_v1 }
 0x171   : > { %v1330_v20 = vsub.f32 %v6001_v7, %v1317_v45  ;;  %v1326_v6 = vsel %vm1325_vm3, %v1323_v16, %v1320_v18  ;;  %3807 = vlog2.f32 %v1817_v19  ;;  %v1554_v61 = vadd.f32 1.0, %v4816_v17 }
 0x172   : > { %v5171_v36 = vpop.permute.xlu1 %1606  ;;  %v1368_v57 = vpack.c.bf16 %v1358_v9, %v1358_v9  ;;  %1378 = vrot.lane.b32.xlu1 %v1367_v26, %s4123_s29  ;;  %v1331_v29 = vsub.f32 %v6003_v39, %v1326_v6  ;;  %v1366_v30 = vpack.c.bf16 %v1356_v48, %v1356_v48  ;;  %v1550_v5 = vmul.f32 %v4803_v12, %v1549_v47  ;;  %v3804_v56 = vpop.eup %3803 }
 0x173   : > { %v1335_v44 = vsub.f32 %v1330_v20, %v4474_v15  ;;  %3809 = vlog2.f32 %v1826_v33  ;;  %vm5198_vm8 = vcmp.lt.f32.partialorder %v1551_v62, 0.0004427343  ;;  %v1563_v21 = vadd.f32 1.0, %v4826_v8  ;;  %v3806_v19 = vpop.eup %3805  ;;  %v6006_v62 = vld [vmem:[#allocation30_spill] sm:$0xff] }
 0x174   : > { %1380 = vrot.lane.b32.xlu0 %v1368_v57, %s4123_s29  ;;  %v1336_v16 = vsub.f32 %v1331_v29, %v4472_v14  ;;  %3811 = vlog2.f32 %v1554_v61  ;;  %v2586_v26 = vsub.f32 0.0, %v2581_v59  ;;  %v2593_v7 = vmul.f32 1.442695, %v2585_v22 }
 0x175   : > { %v1359_v9 = vsub.f32 %v1335_v44, %v1349_v37  ;;  %v1553_v12 = vsel %vm5198_vm8, %v1550_v5, %v1547_v11  ;;  %v1576_v47 = vadd.f32 1.0, %v1575_v2  ;;  %v1585_v33 = vadd.f32 1.0, %v1584_v54 }
 0x176   : > { %v5192_v46 = vpop.permute.xlu1 %1608  ;;  %1376 = vrot.lane.b32.xlu1 %v1366_v30, %s4123_s29  ;;  %v1360_v37 = vsub.f32 %v1336_v16, %v1350_v50  ;;  %3813 = vlog2.f32 %v1563_v21  ;;  %v1578_v20 = vand.u32 2147483647, %v4843_v23  ;;  %v1587_v18 = vand.u32 2147483647, %v4855_v1 }
 0x177   : > { %v1369_v48 = vpack.c.bf16 %v1359_v9, %v1359_v9  ;;  %3815 = vpow2.f32 %v5112_v40  ;;  %v1820_v59 = vmul.f32 -0.5, %v4875_v34  ;;  %v6007_v57 = vmin.f32 %v6006_v62, 0.0 }
 0x178   : > { %v1370_v22 = vpack.c.bf16 %v1360_v37, %v1360_v37  ;;  %v1574_v6 = vmul.f32 0.6931472, %v3804_v56  ;;  %v1583_v11 = vmul.f32 0.6931472, %v3806_v19  ;;  %3817 = vpow2.f32 %v2593_v7 }
 0x179   : > { %1382 = vrot.lane.b32.xlu0 %v1369_v48, %s4123_s29  ;;  %v1590_v44 = vsub.f32 %v6007_v57, %v1553_v12  ;;  %v2595_v2 = vmul.f32 1.442695, %v2586_v26  ;;  %v1829_v40 = vmul.f32 -0.5, %v4880_v51  ;;  %v1557_v31 = vmul.f32 -0.5, %v4816_v17 }
 0x17a   : > { %v5213_v50 = vpop.permute.xlu1 %1865  ;;  %1384 = vrot.lane.b32.xlu1 %v1370_v22, %s4123_s29  ;;  %v1577_v39 = vmul.f32 %v4843_v23, %v1576_v47  ;;  %v1586_v29 = vmul.f32 %v4855_v1, %v1585_v33  ;;  %v1823_v54 = vand.u32 2147483647, %v4875_v34  ;;  %v1835_v61 = vadd.f32 1.0, %v4900_v24 }
 0x17b   : > { %vm5222_vm4 = vcmp.lt.f32.partialorder %v1578_v20, 0.0004427343  ;;  %vm5226_vm13 = vcmp.lt.f32.partialorder %v1587_v18, 0.0004427343  ;;  %v1821_v5 = vadd.f32 1.0, %v1820_v59  ;;  %v1566_v56 = vmul.f32 -0.5, %v4826_v8 }
 0x17c   : > { %v1595_v16 = vsub.f32 %v1590_v44, %v4449_v53  ;;  %v1580_v23 = vsel %vm5222_vm4, %v1577_v39, %v1574_v6  ;;  %v1589_v1 = vsel %vm5226_vm13, %v1586_v29, %v1583_v11  ;;  %v1832_v21 = vand.u32 2147483647, %v4880_v51 }
 0x17d   : > { %v1830_v19 = vadd.f32 1.0, %v1829_v40  ;;  %v1558_v26 = vadd.f32 1.0, %v1557_v31  ;;  %v1560_v7 = vand.u32 2147483647, %v4816_v17  ;;  %3819 = vlog2.f32 %v1835_v61  ;;  %v6021_v61 = vld [vmem:[#allocation52_spill] sm:$0xff] }
 0x17e   : > { %v2310_v48 = vmin.f32 %v4837_v25, 0.0  ;;  %3821 = vpow2.f32 %v2595_v2  ;;  %v5242_v12 = vsub.f32 %v1595_v16, %v5121_v42  ;;  %vm5244_vm6 = vcmp.lt.f32.partialorder %v1823_v54, 0.0004427343  ;;  %v5248_v47 = vpop.permute.xlu1 %1867  ;;  %v3808_v33 = vpop.eup %3807 }
 0x17f   : > { %v6014_v20 = vmin.f32 %v5974_v55, 0.0  ;;  %v1612_v59 = vsel %vm1505_vm9, %v5145_v0, %v5171_v36  ;;  %v6015_v22 = vmin.f32 %v5975_v3, 0.0  ;;  %v1567_v57 = vadd.f32 1.0, %v1566_v56  ;;  %v6018_v55 = vld [vmem:[#allocation51_spill] sm:$0xff] }
 0x180   : > { %v5236_v45 = vpop.xlane.xlu0 %2820  ;;  %v3810_v44 = vpop.eup %3809  ;;  %v1613_v6 = vsel %vm1505_vm9, %v5171_v36, %v5192_v46  ;;  %v1822_v11 = vmul.f32 %v4875_v34, %v1821_v5  ;;  %vm5261_vm14 = vcmp.lt.f32.partialorder %v1832_v21, 0.0004427343  ;;  %v1844_v40 = vadd.f32 1.0, %v6018_v55 }
 0x181   : > { %v1593_v18 = vsub.f32 %v6014_v20, %v1580_v23  ;;  %v1594_v62 = vsub.f32 %v6015_v22, %v1589_v1  ;;  %v3812_v31 = vpop.eup %3811  ;;  %v1831_v39 = vmul.f32 %v4880_v51, %v1830_v19  ;;  %v1559_v3 = vmul.f32 %v4816_v17, %v1558_v26 }
 0x182   : > { %vm5268_vm7 = vcmp.lt.f32.partialorder %v1560_v7, 0.0004427343  ;;  %v1569_v54 = vand.u32 2147483647, %v4826_v8  ;;  %v1629_v34 = vpack.c.bf16 %v5242_v12, %v5242_v12  ;;  %v1556_v36 = vmul.f32 0.6931472, %v3812_v31  ;;  %v5281_v1 = vpop.permute.xlu1 %1869 }
 0x183   : > { %3823 = vlog2.f32 %v1844_v40  ;;  %v1808_v30 = vadd.f32 1.0, %v6021_v61  ;;  %v3814_v9 = vpop.eup %3813  ;;  %v1598_v51 = vsub.f32 %v1593_v18, %v4474_v15  ;;  %v1599_v17 = vsub.f32 %v1594_v62, %v4472_v14  ;;  %v3878_v7 = vld [vmem:[%s4516_s11] sm:$0xff]  ;;  %v6024_v40 = vld [vmem:[#allocation53_spill] sm:$0xff] }
 0x184   : > { %v1603_v46 = vpop.permute.xlu0 %1602  ;;  %v1819_v5 = vmul.f32 0.6931472, %v3808_v33  ;;  %v1568_v56 = vmul.f32 %v4826_v8, %v1567_v57  ;;  %v5279_v16 = vpop.eup %3815  ;;  %v1828_v23 = vmul.f32 0.6931472, %v3810_v44  ;;  %v1562_v21 = vsel %vm5268_vm7, %v1559_v3, %v1556_v36  ;;  %v6022_v18 = vld [vmem:[#allocation31_spill] sm:$0xff]  ;;  %v6025_v3 = vld [vmem:[#allocation32_spill] sm:$0xff] }
 0x185   : > { %v1565_v19 = vmul.f32 0.6931472, %v3814_v9  ;;  %3825 = vlog2.f32 %v1808_v30  ;;  %v5285_v26 = vsub.f32 %v1598_v51, %v1612_v59  ;;  %v2822_v20 = vsub.f32 %v3878_v7, %v5236_v45  ;;  %v5291_v8 = vpop.eup %3817 }
 0x186   : > { %vm1570_vm15 = vcmp.lt.f32.partialorder %v1569_v54, 0.0004427343  ;;  %v6023_v33 = vmin.f32 %v6022_v18, 0.0  ;;  %v1610_v57 = vsel %vm1505_vm9, %v5121_v42, %v1603_v46  ;;  %v1838_v44 = vmul.f32 -0.5, %v4900_v24 }
 0x187   : > { %v1571_v62 = vsel %vm1570_vm15, %v1568_v56, %v1565_v19  ;;  %v2080_v31 = vadd.f32 1.0, %v6024_v40  ;;  %v1825_v59 = vsel %vm5244_vm6, %v1822_v11, %v1819_v5  ;;  %v1874_v45 = vsel %vm1768_vm10, %v5213_v50, %v5248_v47 }
 0x188   : > { %v1591_v22 = vsub.f32 %v6023_v33, %v1562_v21  ;;  %v6026_v29 = vmin.f32 %v6025_v3, 0.0  ;;  %v5305_v30 = vsub.f32 %v1599_v17, %v1613_v6  ;;  %v1834_v42 = vsel %vm5261_vm14, %v1831_v39, %v1828_v23  ;;  %v5311_v51 = vpop.permute.xlu0 %1863 }
 0x189   : > { %v1611_v9 = vsel %vm1505_vm9, %v1603_v46, %v5145_v0  ;;  %3827 = vlog2.f32 %v2080_v31  ;;  %v1811_v5 = vmul.f32 -0.5, %v6021_v61  ;;  %v2071_v56 = vadd.f32 1.0, %v4941_v41  ;;  %v5320_v0 = vpop.permute.xlu1 %1871 }
 0x18a   : > { %v1592_v54 = vsub.f32 %v6026_v29, %v1571_v62  ;;  %v1596_v36 = vsub.f32 %v1591_v22, %v4447_v52  ;;  %v3820_v21 = vpop.eup %3819  ;;  %v1632_v6 = vpack.c.bf16 %v5285_v26, %v5285_v26  ;;  %v6027_v2 = vmin.f32 %v5976_v4, 0.0  ;;  %v6029_v62 = vld [vmem:[#allocation55_spill] sm:$0xff] }
 0x18b   : > { %v2823_v17 = vmul.f32 1.442695, %v2822_v20  ;;  %v1839_v23 = vadd.f32 1.0, %v1838_v44  ;;  %v5322_v46 = vpop.eup %3821  ;;  %v6028_v19 = vmin.f32 %v5977_v28, 0.0  ;;  %v1847_v22 = vmul.f32 -0.5, %v6018_v55 }
 0x18c   : > { %v1597_v37 = vsub.f32 %v1592_v54, %v4456_v58  ;;  %v1620_v11 = vsub.f32 %v1596_v36, %v1610_v57  ;;  %v1854_v39 = vsub.f32 %v6027_v2, %v1825_v59  ;;  %v1875_v26 = vsel %vm1768_vm10, %v5248_v47, %v5281_v1  ;;  %v5338_v47 = vpop.permute.xlu0 %2128 }
 0x18d   : > { %v1855_v7 = vsub.f32 %v6028_v19, %v1834_v42  ;;  %v1841_v4 = vand.u32 2147483647, %v4900_v24  ;;  %v1850_v20 = vand.u32 2147483647, %v6018_v55  ;;  %v2089_v57 = vadd.f32 1.0, %v6029_v62 }
 0x18e   : > { %v1621_v18 = vsub.f32 %v1597_v37, %v1611_v9  ;;  %v1630_v33 = vpack.c.bf16 %v1620_v11, %v1620_v11  ;;  %v1837_v31 = vmul.f32 0.6931472, %v3820_v21  ;;  %v1812_v59 = vadd.f32 1.0, %v1811_v5 }
 0x18f   : > { %3829 = vlog2.f32 %v2071_v56  ;;  %v1633_v28 = vpack.c.bf16 %v5305_v30, %v5305_v30  ;;  %v1859_v3 = vsub.f32 %v1854_v39, %v4447_v52  ;;  %v1840_v29 = vmul.f32 %v4900_v24, %v1839_v23  ;;  %v5348_v24 = vpop.permute.xlu1 %2130 }
 0x190   : > { %v1631_v44 = vpack.c.bf16 %v1621_v18, %v1621_v18  ;;  %1641 = vrot.lane.b32.xlu0 %v1630_v33, %s4123_s29  ;;  %3831 = vlog2.f32 %v2089_v57  ;;  %v3824_v54 = vpop.eup %3823  ;;  %v1860_v36 = vsub.f32 %v1855_v7, %v4456_v58  ;;  %v1848_v42 = vadd.f32 1.0, %v1847_v22  ;;  %v5368_v12 = vpop.permute.xlu0 %2132 }
 0x191   : > { %v1814_v9 = vand.u32 2147483647, %v6021_v61  ;;  %v2098_v37 = vadd.f32 1.0, %v4999_v60  ;;  %v1883_v11 = vsub.f32 %v1859_v3, %v1874_v45  ;;  %3833 = vpow2.f32 %v2823_v17 }
 0x192   : > { %1643 = vrot.lane.b32.xlu1 %v1631_v44, %s4123_s29  ;;  %vm5344_vm9 = vcmp.lt.f32.partialorder %v1841_v4, 0.0004427343  ;;  %v2083_v5 = vmul.f32 -0.5, %v6024_v40  ;;  %v3826_v56 = vpop.eup %3825  ;;  %v1884_v21 = vsub.f32 %v1860_v36, %v1875_v26  ;;  %vm5353_vm0 = vcmp.lt.f32.partialorder %v1850_v20, 0.0004427343 }
 0x193   : > { %v1843_v2 = vsel %vm5344_vm9, %v1840_v29, %v1837_v31  ;;  %v1813_v45 = vmul.f32 %v6021_v61, %v1812_v59  ;;  %v1846_v17 = vmul.f32 0.6931472, %v3824_v54  ;;  %v1810_v23 = vmul.f32 0.6931472, %v3826_v56  ;;  %v2127_v29 = vpop.permute.xlu1 %2126 }
 0x194   : > { %1639 = vrot.lane.b32.xlu0 %v1629_v34, %s4123_s29  ;;  %3835 = vlog2.f32 %v2098_v37  ;;  %v2107_v19 = vadd.f32 1.0, %v5004_v27  ;;  %v1849_v7 = vmul.f32 %v6018_v55, %v1848_v42  ;;  %vm1815_vm1 = vcmp.lt.f32.partialorder %v1814_v9, 0.0004427343 }
 0x195   : > { %v2086_v18 = vand.u32 2147483647, %v6024_v40  ;;  %v2074_v33 = vmul.f32 -0.5, %v4941_v41  ;;  %v1816_v61 = vsel %vm1815_vm1, %v1813_v45, %v1810_v23  ;;  %v2084_v22 = vadd.f32 1.0, %v2083_v5 }
 0x196   : > { %1645 = vrot.lane.b32.xlu1 %v1632_v6, %s4123_s29  ;;  %v2092_v26 = vmul.f32 -0.5, %v6029_v62  ;;  %v2343_v34 = vadd.f32 1.0, %v5031_v49  ;;  %v3828_v4 = vpop.eup %3827  ;;  %v1893_v20 = vpack.c.bf16 %v1883_v11, %v1883_v11  ;;  %v6034_v57 = vmin.f32 %v5979_v43, 0.0 }
 0x197   : > { %v6035_v44 = vmin.f32 %v5981_v63, 0.0  ;;  %3837 = vlog2.f32 %v2107_v19  ;;  %v1852_v6 = vsel %vm5353_vm0, %v1849_v7, %v1846_v17  ;;  %v1873_v59 = vsel %vm1768_vm10, %v5311_v51, %v5213_v50 }
 0x198   : > { %v1856_v55 = vsub.f32 %v6034_v57, %v1843_v2  ;;  %1647 = vrot.lane.b32.xlu0 %v1633_v28, %s4123_s29  ;;  %v2082_v3 = vmul.f32 0.6931472, %v3828_v4  ;;  %3839 = vlog2.f32 %v2343_v34  ;;  %v1894_v54 = vpack.c.bf16 %v1884_v21, %v1884_v21  ;;  %v5403_v2 = vpop.permute.xlu0 %2134  ;;  %v6039_v34 = vld [vmem:[#allocation42_spill] sm:$0xff] }
 0x199   : > { %v1853_v31 = vsub.f32 %v6035_v44, %v1816_v61  ;;  %v1876_v43 = vsel %vm1768_vm10, %v5281_v1, %v5320_v0  ;;  %vm5385_vm3 = vcmp.lt.f32.partialorder %v2086_v18, 0.0004427343  ;;  %v2085_v36 = vmul.f32 %v6024_v40, %v2084_v22  ;;  %v5411_v18 = vpop.permute.xlu1 %2391 }
 0x19a   : > { %1904 = vrot.lane.b32.xlu1 %v1893_v20, %s4123_s29  ;;  %v2075_v42 = vadd.f32 1.0, %v2074_v33  ;;  %v2093_v50 = vadd.f32 1.0, %v2092_v26  ;;  %v2352_v51 = vadd.f32 1.0, %v5073_v32  ;;  %v6038_v9 = vmin.f32 %v5980_v10, 0.0 }
 0x19b   : > { %v1858_v63 = vsub.f32 %v1853_v31, %v4449_v53  ;;  %v1861_v11 = vsub.f32 %v1856_v55, %v4474_v15  ;;  %v2095_v30 = vand.u32 2147483647, %v6029_v62  ;;  %v2088_v56 = vsel %vm5385_vm3, %v2085_v36, %v2082_v3 }
 0x19c   : > { %v1857_v37 = vsub.f32 %v6038_v9, %v1852_v6  ;;  %1906 = vrot.lane.b32.xlu0 %v1894_v54, %s4123_s29  ;;  %v3830_v5 = vpop.eup %3829  ;;  %v2137_v40 = vsel %vm2031_vm11, %v5338_v47, %v5348_v24  ;;  %v2101_v21 = vmul.f32 -0.5, %v4999_v60  ;;  %3841 = vlog2.f32 %v2352_v51  ;;  %v5443_v36 = vpop.permute.xlu0 %2393  ;;  %v6049_v9 = vld [vmem:[#allocation33_spill] sm:$0xff] }
 0x19d   : > { %v1882_v1 = vsub.f32 %v1858_v63, %v1873_v59  ;;  %v3832_v10 = vpop.eup %3831  ;;  %v1885_v39 = vsub.f32 %v1861_v11, %v1876_v43  ;;  %v2077_v17 = vand.u32 2147483647, %v4941_v41  ;;  %v5408_v23 = vsel %vm2031_vm11, %v2127_v29, %v5338_v47 }
 0x19e   : > { %v2091_v19 = vmul.f32 0.6931472, %v3832_v10  ;;  %v2094_v7 = vmul.f32 %v6029_v62, %v2093_v50  ;;  %v2104_v33 = vand.u32 2147483647, %v4999_v60  ;;  %v2346_v61 = vmul.f32 -0.5, %v5031_v49  ;;  %v5415_v22 = vpop.eup %3833 }
 0x19f   : > { %v1892_v45 = vpack.c.bf16 %v1882_v1, %v1882_v1  ;;  %v1862_v26 = vsub.f32 %v1857_v37, %v4472_v14  ;;  %v6040_v4 = vmin.f32 %v6039_v34, 0.0  ;;  %v2076_v57 = vmul.f32 %v4941_v41, %v2075_v42  ;;  %v6047_v42 = vld [vmem:[#allocation46_spill] sm:$0xff] }
 0x1a0   : > { %vm5421_vm10 = vcmp.lt.f32.partialorder %v2095_v30, 0.0004427343  ;;  %v2073_v62 = vmul.f32 0.6931472, %v3830_v5  ;;  %v2102_v44 = vadd.f32 1.0, %v2101_v21  ;;  %v2361_v31 = vadd.f32 1.0, %v5139_v35 }
 0x1a1   : > { %v2117_v20 = vsub.f32 %v6040_v4, %v2088_v56  ;;  %1902 = vrot.lane.b32.xlu1 %v1892_v45, %s4123_s29  ;;  %v2097_v55 = vsel %vm5421_vm10, %v2094_v7, %v2091_v19  ;;  %v3836_v6 = vpop.eup %3835  ;;  %v1886_v59 = vsub.f32 %v1862_v26, %v5320_v0  ;;  %v1895_v3 = vpack.c.bf16 %v1885_v39, %v1885_v39  ;;  %v5454_v56 = vpop.permute.xlu1 %2395 }
 0x1a2   : > { %v2110_v29 = vmul.f32 -0.5, %v5004_v27  ;;  %v2349_v41 = vand.u32 2147483647, %v5031_v49  ;;  %vm5432_vm8 = vcmp.lt.f32.partialorder %v2077_v17, 0.0004427343  ;;  %v2138_v43 = vsel %vm2031_vm11, %v5348_v24, %v5368_v12  ;;  %v6060_v17 = vld [vmem:[#allocation49_spill] sm:$0xff] }
 0x1a3   : > { %vm5439_vm4 = vcmp.lt.f32.partialorder %v2104_v33, 0.0004427343  ;;  %v2347_v28 = vadd.f32 1.0, %v2346_v61  ;;  %v2122_v0 = vsub.f32 %v2117_v20, %v4447_v52  ;;  %v6048_v50 = vmin.f32 %v6047_v42, 0.0  ;;  %v6052_v61 = vld [vmem:[#allocation59_spill] sm:$0xff]  ;;  %v6059_v42 = vld [vmem:[#allocation48_spill] sm:$0xff] }
 0x1a4   : > { %v2370_v37 = vadd.f32 1.0, %v6049_v9  ;;  %3843 = vlog2.f32 %v2361_v31  ;;  %v3838_v11 = vpop.eup %3837  ;;  %v2079_v24 = vsel %vm5432_vm8, %v2076_v57, %v2073_v62  ;;  %v2100_v1 = vmul.f32 0.6931472, %v3836_v6  ;;  %v5475_v62 = vpop.permute.xlu0 %2389 }
 0x1a5   : > { %v2118_v51 = vsub.f32 %v6048_v50, %v2097_v55  ;;  %1908 = vrot.lane.b32.xlu1 %v1895_v3, %s4123_s29  ;;  %v2103_v30 = vmul.f32 %v4999_v60, %v2102_v44  ;;  %v2113_v5 = vand.u32 2147483647, %v5004_v27  ;;  %v3840_v21 = vpop.eup %3839  ;;  %v1896_v10 = vpack.c.bf16 %v1886_v59, %v1886_v59  ;;  %v6053_v60 = vld [vmem:[#allocation43_spill] sm:$0xff]  ;;  %v5484_v54 = vpop.permute.xlu1 %2397 }
 0x1a6   : > { %v2146_v39 = vsub.f32 %v2122_v0, %v2137_v40  ;;  %v2111_v45 = vadd.f32 1.0, %v2110_v29  ;;  %vm5456_vm13 = vcmp.lt.f32.partialorder %v2349_v41, 0.0004427343  ;;  %v2345_v19 = vmul.f32 0.6931472, %v3840_v21 }
 0x1a7   : > { %v2348_v7 = vmul.f32 %v5031_v49, %v2347_v28  ;;  %v2355_v33 = vmul.f32 -0.5, %v5073_v32  ;;  %v2334_v26 = vadd.f32 1.0, %v6052_v61  ;;  %v6054_v34 = vmin.f32 %v6053_v60, 0.0 }
 0x1a8   : > { %v2123_v20 = vsub.f32 %v2118_v51, %v4456_v58  ;;  %v2109_v57 = vmul.f32 0.6931472, %v3838_v11  ;;  %3845 = vlog2.f32 %v2370_v37  ;;  %v2106_v40 = vsel %vm5439_vm4, %v2103_v30, %v2100_v1 }
 0x1a9   : > { %v2116_v4 = vsub.f32 %v6054_v34, %v2079_v24  ;;  %1910 = vrot.lane.b32.xlu1 %v1896_v10, %s4123_s29  ;;  %vm5469_vm6 = vcmp.lt.f32.partialorder %v2113_v5, 0.0004427343  ;;  %v2351_v49 = vsel %vm5456_vm13, %v2348_v7, %v2345_v19  ;;  %3847 = vlog2.f32 %v2334_v26  ;;  %v3842_v55 = vpop.eup %3841  ;;  %v6061_v19 = vld [vmem:[#allocation50_spill] sm:$0xff] }
 0x1aa   : > { %v2156_v44 = vpack.c.bf16 %v2146_v39, %v2146_v39  ;;  %v2147_v31 = vsub.f32 %v2123_v20, %v2138_v43  ;;  %v2112_v6 = vmul.f32 %v5004_v27, %v2111_v45  ;;  %v2380_v59 = vsub.f32 %v2310_v48, %v2351_v49  ;;  %v6057_v27 = vld [vmem:[#allocation47_spill] sm:$0xff]  ;;  %v5504_v39 = vpop.permute.xlu0 %2654 }
 0x1ab   : > { %v2356_v3 = vadd.f32 1.0, %v2355_v33  ;;  %v2358_v29 = vand.u32 2147483647, %v5073_v32  ;;  %v2400_v41 = vsel %vm2294_vm12, %v5411_v18, %v5443_v36  ;;  %v2606_v63 = vadd.f32 1.0, %v5150_v38 }
 0x1ac   : > { %v2121_v28 = vsub.f32 %v2116_v4, %v4449_v53  ;;  %v2115_v43 = vsel %vm5469_vm6, %v2112_v6, %v2109_v57  ;;  %v6058_v0 = vmin.f32 %v6057_v27, 0.0  ;;  %v2385_v48 = vsub.f32 %v2380_v59, %v4447_v52  ;;  %v5520_v57 = vpop.permute.xlu1 %2656 }
 0x1ad   : > { %2167 = vrot.lane.b32.xlu1 %v2156_v44, %s4123_s29  ;;  %v2050_v50 = vmin.f32 %v6059_v42, 0.0  ;;  %v2139_v51 = vsel %vm2031_vm11, %v5368_v12, %v5403_v2  ;;  %v2354_v37 = vmul.f32 0.6931472, %v3842_v55  ;;  %3849 = vlog2.f32 %v2606_v63 }
 0x1ae   : > { %v2119_v25 = vsub.f32 %v6058_v0, %v2106_v40  ;;  %v2145_v11 = vsub.f32 %v2121_v28, %v5408_v23  ;;  %v2157_v24 = vpack.c.bf16 %v2147_v31, %v2147_v31  ;;  %v5499_v1 = vsub.f32 %v2385_v48, %v2400_v41  ;;  %v5531_v27 = vpop.permute.xlu0 %2658 }
 0x1af   : > { %v2364_v30 = vmul.f32 -0.5, %v5139_v35  ;;  %v2120_v5 = vsub.f32 %v2050_v50, %v2115_v43  ;;  %v2357_v21 = vmul.f32 %v5073_v32, %v2356_v3  ;;  %v2337_v10 = vmul.f32 -0.5, %v6052_v61  ;;  %v6064_v32 = vld [vmem:[#allocation56_spill] sm:$0xff] }
 0x1b0   : > { %v2597_v45 = vadd.f32 1.0, %v5166_v13  ;;  %v2309_v12 = vmin.f32 %v6060_v17, 0.0  ;;  %v2311_v7 = vmin.f32 %v6061_v19, 0.0  ;;  %v2124_v23 = vsub.f32 %v2119_v25, %v4474_v15 }
 0x1b1   : > { %vm5510_vm11 = vcmp.lt.f32.partialorder %v2358_v29, 0.0004427343  ;;  %2169 = vrot.lane.b32.xlu1 %v2157_v24, %s4123_s29  ;;  %v3844_v26 = vpop.eup %3843  ;;  %v2312_v60 = vmin.f32 %v6064_v32, 0.0  ;;  %v2373_v4 = vmul.f32 -0.5, %v6049_v9  ;;  %v2376_v20 = vand.u32 2147483647, %v6049_v9 }
 0x1b2   : > { %v2360_v34 = vsel %vm5510_vm11, %v2357_v21, %v2354_v37  ;;  %v2155_v40 = vpack.c.bf16 %v2145_v11, %v2145_v11  ;;  %v2148_v47 = vsub.f32 %v2124_v23, %v2139_v51  ;;  %v2365_v49 = vadd.f32 1.0, %v2364_v30  ;;  %v5545_v11 = vpop.permute.xlu1 %2652 }
 0x1b3   : > { %v2615_v55 = vadd.f32 1.0, %v5279_v16  ;;  %v2125_v44 = vsub.f32 %v2120_v5, %v4472_v14  ;;  %v2367_v31 = vand.u32 2147483647, %v5139_v35  ;;  %v2338_v6 = vadd.f32 1.0, %v2337_v10 }
 0x1b4   : > { %3851 = vlog2.f32 %v2597_v45  ;;  %v2381_v59 = vsub.f32 %v2311_v7, %v2360_v34  ;;  %v2363_v3 = vmul.f32 0.6931472, %v3844_v26  ;;  %v2340_v29 = vand.u32 2147483647, %v6052_v61  ;;  %v993_v34 = vpop.permute.xlu0 %992 }
 0x1b5   : > { %3853 = vlog2.f32 %v2615_v55  ;;  %2165 = vrot.lane.b32.xlu1 %v2155_v40, %s4123_s29  ;;  %v3846_v41 = vpop.eup %3845  ;;  %v2149_v63 = vsub.f32 %v2125_v44, %v5403_v2  ;;  %v2401_v28 = vsel %vm2294_vm12, %v5443_v36, %v5454_v56  ;;  %v2374_v43 = vadd.f32 1.0, %v2373_v4  ;;  %v6069_v4 = vld [vmem:[#allocation54_spill] sm:$0xff] }
 0x1b6   : > { %v2624_v0 = vadd.f32 1.0, %v5291_v8  ;;  %v3848_v25 = vpop.eup %3847  ;;  %v2158_v48 = vpack.c.bf16 %v2148_v47, %v2148_v47  ;;  %vm5534_vm14 = vcmp.lt.f32.partialorder %v2376_v20, 0.0004427343  ;;  %v2366_v50 = vmul.f32 %v5139_v35, %v2365_v49 }
 0x1b7   : > { %v2609_v51 = vmul.f32 -0.5, %v5150_v38  ;;  %vm5540_vm7 = vcmp.lt.f32.partialorder %v2367_v31, 0.0004427343  ;;  %v2336_v36 = vmul.f32 0.6931472, %v3848_v25  ;;  %v2339_v37 = vmul.f32 %v6052_v61, %v2338_v6  ;;  %v6072_v25 = vld [vmem:[#allocation57_spill] sm:$0xff] }
 0x1b8   : > { %3855 = vlog2.f32 %v2624_v0  ;;  %v2386_v24 = vsub.f32 %v2381_v59, %v4456_v58  ;;  %v2369_v30 = vsel %vm5540_vm7, %v2366_v50, %v2363_v3  ;;  %vm2341_vm15 = vcmp.lt.f32.partialorder %v2340_v29, 0.0004427343 }
 0x1b9   : > { %v2633_v35 = vadd.f32 1.0, %v5322_v46  ;;  %2171 = vrot.lane.b32.xlu1 %v2158_v48, %s4123_s29  ;;  %v2159_v5 = vpack.c.bf16 %v2149_v63, %v2149_v63  ;;  %v2372_v21 = vmul.f32 0.6931472, %v3846_v41  ;;  %v2375_v10 = vmul.f32 %v6049_v9, %v2374_v43  ;;  %v3635_v43 = vld [vmem:[%s4354_s26] ss:$16 sps:$4 sm:$0xff]  }
 0x1ba   : > { %v2342_v45 = vsel %vm2341_vm15, %v2339_v37, %v2336_v36  ;;  %v3850_v17 = vpop.eup %3849  ;;  %v2410_v61 = vsub.f32 %v2386_v24, %v2401_v28  ;;  %v2610_v7 = vadd.f32 1.0, %v2609_v51  ;;  %v2382_v23 = vsub.f32 %v2312_v60, %v2369_v30  ;;  %v5584_v36 = vpop.permute.xlu0 %2660  ;;  %v3643_v37 = vld [vmem:[%s4354_s26 + $0x44] ss:$16 sps:$4 sm:$0xff]  }
 0x1bb   : > { %v2379_v19 = vsub.f32 %v2309_v12, %v2342_v45  ;;  %3857 = vlog2.f32 %v2633_v35  ;;  %v2399_v33 = vsel %vm2294_vm12, %v5475_v62, %v5411_v18  ;;  %v2612_v26 = vand.u32 2147483647, %v5150_v38  ;;  %v995_v47 = vpop.permute.xlu1 %994 }
 0x1bc   : > { %v2618_v32 = vmul.f32 -0.5, %v5279_v16  ;;  %v2313_v20 = vmin.f32 %v6069_v4, 0.0  ;;  %v2608_v40 = vmul.f32 0.6931472, %v3850_v17  ;;  %v2825_v12 = vsel %vm2818_vm5, %v5415_v22, 0.0 }
 0x1bd   : > { %v2384_v9 = vsub.f32 %v2379_v19, %v4449_v53  ;;  %2173 = vrot.lane.b32.xlu1 %v2159_v5, %s4123_s29  ;;  %v2378_v60 = vsel %vm5534_vm14, %v2375_v10, %v2372_v21  ;;  %v2402_v18 = vsel %vm2294_vm12, %v5454_v56, %v5484_v54  ;;  %v2600_v62 = vmul.f32 -0.5, %v5166_v13  ;;  %2826 = vadd.xlane.f32.xlu0 %v2825_v12  ;;  %v6073_v19 = vld [vmem:[#allocation40_spill] sm:$0xff] }
 0x1be   : > { %v2627_v49 = vmul.f32 -0.5, %v5291_v8  ;;  %v2420_v55 = vpack.c.bf16 %v2410_v61, %v2410_v61  ;;  %v2611_v31 = vmul.f32 %v5150_v38, %v2610_v7  ;;  %v1002_v6 = vsel %vm1000_vm2, %v993_v34, %v995_v47 }
 0x1bf   : > { %v2408_v44 = vsub.f32 %v2384_v9, %v2399_v33  ;;  %v2387_v59 = vsub.f32 %v2382_v23, %v4474_v15  ;;  %vm5573_vm9 = vcmp.lt.f32.partialorder %v2612_v26, 0.0004427343  ;;  %v2619_v56 = vadd.f32 1.0, %v2618_v32  ;;  %1061 = vmatprep.mubr.bf16.mxu0 %v1002_v6  ;;  %v991_v51 = vpop.permute.xlu1 %990 }
 0x1c0   : > { %v2383_v41 = vsub.f32 %v2313_v20, %v2378_v60  ;;  %v2614_v63 = vsel %vm5573_vm9, %v2611_v31, %v2608_v40  ;;  %v2603_v28 = vand.u32 2147483647, %v5166_v13  ;;  %v2621_v38 = vand.u32 2147483647, %v5279_v16 }
 0x1c1   : > { %v3852_v29 = vpop.eup %3851  ;;  %2432 = vrot.lane.b32.xlu1 %v2420_v55, %s4123_s29  ;;  %v2573_v48 = vmin.f32 %v6072_v25, 0.0  ;;  %v2411_v42 = vsub.f32 %v2387_v59, %v2402_v18  ;;  %v2601_v50 = vadd.f32 1.0, %v2600_v62  ;;  %v2628_v2 = vadd.f32 1.0, %v2627_v49  ;;  %v6080_v59 = vld [vmem:[#allocation58_spill] sm:$0xff] }
 0x1c2   : > { %v3854_v0 = vpop.eup %3853  ;;  %v2418_v24 = vpack.c.bf16 %v2408_v44, %v2408_v44  ;;  %v2636_v35 = vmul.f32 -0.5, %v5322_v46  ;;  %v1001_v5 = vsel %vm1000_vm2, %v991_v51, %v993_v34  ;;  %v2599_v10 = vmul.f32 0.6931472, %v3852_v29  ;;  %v997_v20 = vpop.permute.xlu0 %996  ;;  %v6084_v51 = vld [vmem:[#allocation34_spill] sm:$0xff] }
 0x1c3   : > { %v2617_v30 = vmul.f32 0.6931472, %v3854_v0  ;;  %v2643_v21 = vsub.f32 %v2573_v48, %v2614_v63  ;;  %v2620_v45 = vmul.f32 %v5279_v16, %v2619_v56  ;;  %v2630_v17 = vand.u32 2147483647, %v5291_v8  ;;  %1062 = vmatmul.mubr.bf16.vlgmr.msra.gmra.mxu0 %v1001_v5  ;;  %v6081_v56 = vld [vmem:[#allocation41_spill] sm:$0xff] }
 0x1c4   : > { %v2574_v7 = vmin.f32 %v6073_v19, 0.0  ;;  %v2388_v23 = vsub.f32 %v2383_v41, %v4472_v14  ;;  %vm5593_vm12 = vcmp.lt.f32.partialorder %v2603_v28, 0.0004427343  ;;  %vm5597_vm0 = vcmp.lt.f32.partialorder %v2621_v38, 0.0004427343  ;;  %1167 = vmatpush1.bf16.xpose.msra.mxu0 %v3635_v43  ;;  %v3041_v55 = vld [vmem:[%s495_s24] sm:$0xff] }
 0x1c5   : > { %v3856_v61 = vpop.eup %3855  ;;  %2428 = vrot.lane.b32.xlu1 %v2418_v24, %s4123_s29  ;;  %v2602_v16 = vmul.f32 %v5166_v13, %v2601_v50  ;;  %v2623_v32 = vsel %vm5597_vm0, %v2620_v45, %v2617_v30  ;;  %v2639_v4 = vand.u32 2147483647, %v5322_v46  ;;  %1428 = vmatprep.subr.bf16.mxu0 %v3643_v37  ;;  %v2421_v40 = vpack.c.bf16 %v2411_v42, %v2411_v42  ;;  %v3646_v28 = vld [vmem:[%s4354_s26 + $0x4c] ss:$16 sps:$4 sm:$0xff]   ;;  %s3177_s24 = scalar_lea.sflag [#allocation6], %s4342_s0 }
 0x1c6   : > { %v2626_v34 = vmul.f32 0.6931472, %v3856_v61  ;;  %v2412_v9 = vsub.f32 %v2388_v23, %v5484_v54  ;;  %v2629_v12 = vmul.f32 %v5291_v8, %v2628_v2  ;;  %v2637_v60 = vadd.f32 1.0, %v2636_v35 }
 0x1c7   : > { %v2648_v62 = vsub.f32 %v2643_v21, %v4447_v52  ;;  %v2663_v13 = vsel %vm1000_vm2, %v5504_v39, %v5520_v57  ;;  %v2605_v49 = vsel %vm5593_vm12, %v2602_v16, %v2599_v10  ;;  %vm5614_vm1 = vcmp.lt.f32.partialorder %v2630_v17, 0.0004427343  ;;  %v999_v31 = vpop.permute.xlu1 %998  ;;  %v3638_v52 = vld [vmem:[%s4354_s26 + $0x8] ss:$16 sps:$4 sm:$0xff]  }
 0x1c8   : > { %v3858_v18 = vpop.eup %3857  ;;  %v2644_v54 = vsub.f32 %v2574_v7, %v2623_v32  ;;  %v2632_v8 = vsel %vm5614_vm1, %v2629_v12, %v2626_v34  ;;  %v1003_v6 = vsel %vm1000_vm2, %v995_v47, %v997_v20  ;;  %v2572_v3 = vmin.f32 %v6080_v59, 0.0  ;;  %v3644_v16 = vld [vmem:[%s4354_s26 + $0x48] ss:$16 sps:$4 sm:$0xff]   ;;  %v3647_v12 = vld [vmem:[%s4354_s26 + $0x60] ss:$16 sps:$4 sm:$0xff]  }
 0x1c9   : > { %v2635_v44 = vmul.f32 0.6931472, %v3858_v18  ;;  %2434 = vrot.lane.b32.xlu1 %v2421_v40, %s4123_s29  ;;  %v2575_v29 = vmin.f32 %v6081_v56, 0.0  ;;  %vm5625_vm3 = vcmp.lt.f32.partialorder %v2639_v4, 0.0004427343  ;;  %v1004_v63 = vsel %vm1000_vm2, %v997_v20, %v999_v31 }
 0x1ca   : > { %v2422_v38 = vpack.c.bf16 %v2412_v9, %v2412_v9  ;;  %v2672_v43 = vsub.f32 %v2648_v62, %v2663_v13  ;;  %v2638_v0 = vmul.f32 %v5322_v46, %v2637_v60  ;;  %1101 = vmatprep.mubr.bf16.mxu1 %v1004_v63  ;;  %v2642_v47 = vsub.f32 %v2572_v3, %v2605_v49  ;;  %v2909_v60 = vld [vmem:[%s486_s7] sm:$0xff] }
 0x1cb   : > { %v2664_v25 = vsel %vm1000_vm2, %v5520_v57, %v5531_v27  ;;  %v2645_v48 = vsub.f32 %v2575_v29, %v2632_v8  ;;  %1102 = vmatmul.mubr.bf16.vlgmr.msra.gmra.mxu1 %v1003_v6  ;;  %v2649_v42 = vsub.f32 %v2644_v54, %v4456_v58  ;;  %v2576_v2 = vmin.f32 %v6084_v51, 0.0  ;;  %v3655_v62 = vld [vmem:[%s4354_s26 + $0x84] ss:$16 sps:$4 sm:$0xff]   ;;  %v3658_v6 = vld [vmem:[%s4354_s26 + $0x8c] ss:$16 sps:$4 sm:$0xff]  }
 0x1cc   : > { %v2641_v50 = vsel %vm5625_vm3, %v2638_v0, %v2635_v44  ;;  %1207 = vmatpush1.bf16.xpose.msra.mxu1 %v3638_v52  ;;  %v1117_v46 = vpop.permute.xlu0 %1116  ;;  %v2682_v37 = vpack.c.bf16 %v2672_v43, %v2672_v43  ;;  %v2662_v57 = vsel %vm1000_vm2, %v5545_v11, %v5504_v39  ;;  %v2665_v58 = vsel %vm1000_vm2, %v5531_v27, %v5584_v36  ;;  %v3641_v11 = vld [vmem:[%s4354_s26 + $0x40] ss:$16 sps:$4 sm:$0xff]   ;;  %v3650_v44 = vld [vmem:[%s4354_s26 + $0x68] ss:$16 sps:$4 sm:$0xff]  }
 0x1cd   : > { %2436 = vrot.lane.b32.xlu1 %v2422_v38, %s4123_s29  ;;  %1468 = vmatprep.subr.bf16.mxu1 %v3646_v28  ;;  %v2673_v24 = vsub.f32 %v2649_v42, %v2664_v25  ;;  %v2647_v30 = vsub.f32 %v2642_v47, %v4449_v53  ;;  %v2646_v35 = vsub.f32 %v2576_v2, %v2641_v50  ;;  %v3649_v53 = vld [vmem:[%s4354_s26 + $0x64] ss:$16 sps:$4 sm:$0xff]   ;;  %vm591_vm10 = vcmask 130048   ;;  %v3653_v0 = vld [vmem:[%s4354_s26 + $0x80] ss:$16 sps:$4 sm:$0xff]  }
 0x1ce   : > { %v2650_v5 = vsub.f32 %v2645_v48, %v4474_v15  ;;  %v2419_v21 = vpack.c.bf16 %v5499_v1, %v5499_v1  ;;  %v4124_v4 = vmov 0.0   ;;  %v2912_v49 = vsub.f32 0.0, %v2909_v60  ;;  %v3661_v25 = vld [vmem:[%s4354_s26 + $0xa4] ss:$16 sps:$4 sm:$0xff]   ;;  %v3656_v2 = vld [vmem:[%s4354_s26 + $0x88] ss:$16 sps:$4 sm:$0xff]  }
 0x1cf   : > { %v2671_v10 = vsub.f32 %v2647_v30, %v2662_v57  ;;  %v2683_v61 = vpack.c.bf16 %v2673_v24, %v2673_v24  ;;  %v2651_v15 = vsub.f32 %v2646_v35, %v4472_v14  ;;  %v3652_v14 = vld [vmem:[%s4354_s26 + $0x6c] ss:$16 sps:$4 sm:$0xff]   ;;  %592 = vst.msk [vmem:[#allocation3] sm:$0xff] %vm591_vm10, %v4124_v4  ;;  %v3044_v59 = vsub.f32 0.0, %v3041_v55  ;;  %v3673_v60 = vld [vmem:[%s4354_s26 + $0xe4] ss:$16 sps:$4 sm:$0xff]  }
 0x1d0   : > { %v2674_v45 = vsub.f32 %v2650_v5, %v2665_v58  ;;  %v1115_v39 = vpop.permute.xlu0 %1114  ;;  %v2913_v52 = vmul.f32 1.442695, %v2912_v49  ;;  %v5691_v58 = vld [vmem:[%s580_s5 + $0x8] sm:$0xff]  ;;  %v3665_v49 = vld [vmem:[%s4354_s26 + $0xc8] ss:$16 sps:$4 sm:$0xff]   ;;  %vm2834_vm8 = vcmask 1045504  }
 0x1d1   : > { %2693 = vrot.lane.b32.xlu1 %v2682_v37, %s4123_s29  ;;  %v1119_v17 = vpop.permute.xlu1 %1118  ;;  %v1124_v19 = vsel %vm1000_vm2, %v1115_v39, %v1117_v46  ;;  %v2681_v1 = vpack.c.bf16 %v2671_v10, %v2671_v10  ;;  %v2675_v7 = vsub.f32 %v2651_v15, %v5584_v36  ;;  %v3045_v56 = vmul.f32 1.442695, %v3044_v59  ;;  %v3664_v37 = vld [vmem:[%s4354_s26 + $0xac] ss:$16 sps:$4 sm:$0xff]   ;;  %v3674_v59 = vld [vmem:[%s4354_s26 + $0xe8] ss:$16 sps:$4 sm:$0xff]  }
 0x1d2   : > { %v1125_v27 = vsel %vm1000_vm2, %v1117_v46, %v1119_v17  ;;  %v2684_v23 = vpack.c.bf16 %v2674_v45, %v2674_v45  ;;  %3859 = vpow2.f32 %v2913_v52  ;;  %v3004_v30 = vsel %vm591_vm10, %v5691_v58, 0.0  ;;  %v5701_v10 = vld [vmem:[%s585_s8] sm:$0xff]  ;;  %v3659_v45 = vld [vmem:[%s4354_s26 + $0xa0] ss:$16 sps:$4 sm:$0xff]  }
 0x1d3   : > { %1184 = vmatprep.mubr.bf16.mxu0 %v1125_v27  ;;  %2430 = vrot.lane.b32.xlu0 %v2419_v21, %s4123_s29  ;;  %v2685_v36 = vpack.c.bf16 %v2675_v7, %v2675_v7  ;;  %3861 = vpow2.f32 %v3045_v56  ;;  %v5699_v21 = vld [vmem:[%s580_s5] sm:$0xff]  ;;  %v3133_v39 = vsel %vm591_vm10, %v5701_v10, 0.0  ;;  %vm4125_vm4 = vmmov 0  }
 0x1d4   : > { %1185 = vmatmul.mubr.bf16.vlgmr.msra.gmra.mxu0 %v1124_v19  ;;  %v1123_v33 = vpop.permute.xlu0 %1122 }
 0x1d5   : > { %2695 = vrot.lane.b32.xlu1 %v2683_v61, %s4123_s29  ;;  %v1121_v26 = vpop.permute.xlu1 %1120  ;;  %1429 = vmatpush1.bf16.xpose.msra.mxu0 %v3641_v11  ;;  %v3670_v61 = vld [vmem:[%s4354_s26 + $0xc4] ss:$16 sps:$4 sm:$0xff]  }
 0x1d6   : > { %v1126_v32 = vsel %vm1000_vm2, %v1119_v17, %v1121_v26  ;;  %v1127_v34 = vsel %vm1000_vm2, %v1121_v26, %v1123_v33  ;;  %1691 = vmatprep.subr.bf16.mxu0 %v3649_v53  ;;  %v3001_v17 = vsel %vm591_vm10, %v5699_v21, 0.0  ;;  %v5712_v53 = vld [vmem:[%s585_s8 + $0x8] sm:$0xff]  ;;  %v3662_v26 = vld [vmem:[%s4354_s26 + $0xa8] ss:$16 sps:$4 sm:$0xff]  }
 0x1d7   : > { %1224 = vmatprep.mubr.bf16.mxu1 %v1127_v34  ;;  %2691 = vrot.lane.b32.xlu0 %v2681_v1, %s4123_s29  ;;  %v3136_v1 = vsel %vm591_vm10, %v5712_v53, 0.0  ;;  %v3667_v34 = vld [vmem:[%s4354_s26 + $0xcc] ss:$16 sps:$4 sm:$0xff]  }
 0x1d8   : > { %1225 = vmatmul.mubr.bf16.vlgmr.msra.gmra.mxu1 %v1126_v32 }
 0x1d9   : > { %2697 = vrot.lane.b32.xlu1 %v2684_v23, %s4123_s29  ;;  %1469 = vmatpush1.bf16.xpose.msra.mxu1 %v3644_v16 }
 0x1da   : > { %1731 = vmatprep.subr.bf16.mxu1 %v3652_v14 }
 0x1db   : > { %2699 = vrot.lane.b32.xlu0 %v2685_v36, %s4123_s29  ;;  %s3499_s29 = sshll.u32 %s4099_s12, 7 }
 0x1dc   : > { %s3188_s11 = scalar_lea.hbm %s6089_s9, %s3499_s29 }
 0x1df   : > { %v3860_v29 = vpop.eup %3859 }
 0x1e0   : > { %v2915_v28 = vadd.f32 1.0, %v3860_v29  ;;  %v3862_v38 = vpop.eup %3861 }
 0x1e1   : > { %v3047_v50 = vadd.f32 1.0, %v3862_v38  ;;  %v3671_v38 = vld [vmem:[%s4354_s26 + $0xe0] ss:$16 sps:$4 sm:$0xff]  }
 0x1e2   : > { %3863 = vrcp.f32 %v2915_v28 }
 0x1e3   : > { %3865 = vrcp.f32 %v3047_v50  ;;  %v2830_v50 = vld [vmem:[%s574_s17] sm:$0x3f] }
 0x1e4   : > { %v1379_v20 = vpop.permute.xlu1 %1378 }
 0x1e6   : > { %v1381_v9 = vpop.permute.xlu0 %1380 }
 0x1e7   : > { %v1387_v40 = vsel %vm1000_vm2, %v1379_v20, %v1381_v9 }
 0x1e8   : > { %v1377_v18 = vpop.permute.xlu1 %1376  ;;  %1446 = vmatprep.mubr.bf16.mxu0 %v1387_v40  ;;  %v3668_v40 = vld [vmem:[%s4354_s26 + $0xc0] ss:$16 sps:$4 sm:$0xff]  }
 0x1e9   : > { %v1386_v13 = vsel %vm1000_vm2, %v1377_v18, %v1379_v20 }
 0x1ea   : > { %1447 = vmatmul.mubr.bf16.vlgmr.msra.gmra.mxu0 %v1386_v13 }
 0x1eb   : > { %1692 = vmatpush1.bf16.xpose.msra.mxu0 %v3647_v12  ;;  %v1383_v54 = vpop.permute.xlu0 %1382 }
 0x1ec   : > { %1954 = vmatprep.subr.bf16.mxu0 %v3655_v62  ;;  %v1385_v8 = vpop.permute.xlu1 %1384  ;;  %v1388_v3 = vsel %vm1000_vm2, %v1381_v9, %v1383_v54 }
 0x1ed   : > { %v1389_v31 = vsel %vm1000_vm2, %v1383_v54, %v1385_v8  ;;  %v3676_v54 = vld [vmem:[%s4354_s26 + $0xec] ss:$16 sps:$4 sm:$0xff]  }
 0x1ee   : > { %1486 = vmatprep.mubr.bf16.mxu1 %v1389_v31 }
 0x1ef   : > { %1487 = vmatmul.mubr.bf16.vlgmr.msra.gmra.mxu1 %v1388_v3  ;;  %v5710_v27 = vpop.eup %3863 }
 0x1f0   : > { %1732 = vmatpush1.bf16.xpose.msra.mxu1 %v3650_v44  ;;  %v2998_v7 = vsel %vm591_vm10, %v5710_v27, 0.0  ;;  %v5718_v23 = vpop.eup %3865 }
 0x1f1   : > { %1994 = vmatprep.subr.bf16.mxu1 %v3658_v6  ;;  %v3130_v16 = vsel %vm591_vm10, %v5718_v23, 0.0 }
 0x1fa   : > { %3005 = vadd.xlane.f32.xlu0 %v3004_v30 }
 0x1fd   : > { %3002 = vadd.xlane.f32.xlu1 %v3001_v17 }
 0x1fe   : > { %3134 = vadd.xlane.f32.xlu0 %v3133_v39 }
 0x201   : > { %3137 = vadd.xlane.f32.xlu1 %v3136_v1 }
 0x202   : > { %v1642_v41 = vpop.permute.xlu0 %1641  ;;  %2999 = vadd.xlane.f32.xlu0 %v2998_v7 }
 0x204   : > { %v1644_v63 = vpop.permute.xlu1 %1643 }
 0x205   : > { %v1650_v43 = vsel %vm1000_vm2, %v1642_v41, %v1644_v63  ;;  %3131 = vadd.xlane.f32.xlu1 %v3130_v16 }
 0x206   : > { %1709 = vmatprep.mubr.bf16.mxu0 %v1650_v43  ;;  %v1640_v47 = vpop.permute.xlu0 %1639 }
 0x207   : > { %v1649_v48 = vsel %vm1000_vm2, %v1640_v47, %v1642_v41 }
 0x208   : > { %v1646_v42 = vpop.permute.xlu1 %1645  ;;  %1710 = vmatmul.mubr.bf16.vlgmr.msra.gmra.mxu0 %v1649_v48 }
 0x209   : > { %1955 = vmatpush1.bf16.xpose.msra.mxu0 %v3653_v0  ;;  %v1651_v57 = vsel %vm1000_vm2, %v1644_v63, %v1646_v42 }
 0x20a   : > { %v1648_v51 = vpop.permute.xlu0 %1647  ;;  %2217 = vmatprep.subr.bf16.mxu0 %v3661_v25 }
 0x20b   : > { %v1652_v46 = vsel %vm1000_vm2, %v1646_v42, %v1648_v51 }
 0x20c   : > { %v1905_v24 = vpop.permute.xlu1 %1904  ;;  %1749 = vmatprep.mubr.bf16.mxu1 %v1652_v46 }
 0x20d   : > { %1750 = vmatmul.mubr.bf16.vlgmr.msra.gmra.mxu1 %v1651_v57 }
 0x20e   : > { %v1907_v35 = vpop.permute.xlu0 %1906  ;;  %1995 = vmatpush1.bf16.xpose.msra.mxu1 %v3656_v2 }
 0x20f   : > { %v1913_v5 = vsel %vm1000_vm2, %v1905_v24, %v1907_v35  ;;  %2257 = vmatprep.subr.bf16.mxu1 %v3664_v37 }
 0x210   : > { %1972 = vmatprep.mubr.bf16.mxu0 %v1913_v5 }
 0x213   : > { %v1903_v11 = vpop.permute.xlu1 %1902 }
 0x214   : > { %v1912_v19 = vsel %vm1000_vm2, %v1903_v11, %v1905_v24 }
 0x215   : > { %1973 = vmatmul.mubr.bf16.vlgmr.msra.gmra.mxu0 %v1912_v19 }
 0x216   : > { %2218 = vmatpush1.bf16.xpose.msra.mxu0 %v3659_v45 }
 0x217   : > { %v1909_v15 = vpop.permute.xlu1 %1908  ;;  %2480 = vmatprep.subr.bf16.mxu0 %v3670_v61 }
 0x218   : > { %v1914_v14 = vsel %vm1000_vm2, %v1907_v35, %v1909_v15 }
 0x21b   : > { %v1911_v33 = vpop.permute.xlu1 %1910 }
 0x21c   : > { %v1915_v32 = vsel %vm1000_vm2, %v1909_v15, %v1911_v33 }
 0x21d   : > { %2012 = vmatprep.mubr.bf16.mxu1 %v1915_v32 }
 0x21e   : > { %2013 = vmatmul.mubr.bf16.vlgmr.msra.gmra.mxu1 %v1914_v14 }
 0x21f   : > { %v2168_v36 = vpop.permute.xlu1 %2167  ;;  %2258 = vmatpush1.bf16.xpose.msra.mxu1 %v3662_v26 }
 0x220   : > { %2520 = vmatprep.subr.bf16.mxu1 %v3667_v34 }
 0x223   : > { %v2170_v20 = vpop.permute.xlu1 %2169 }
 0x224   : > { %v2176_v9 = vsel %vm1000_vm2, %v2168_v36, %v2170_v20 }
 0x225   : > { %2235 = vmatprep.mubr.bf16.mxu0 %v2176_v9 }
 0x227   : > { %v2166_v12 = vpop.permute.xlu1 %2165 }
 0x228   : > { %v2175_v18 = vsel %vm1000_vm2, %v2166_v12, %v2168_v36 }
 0x229   : > { %2236 = vmatmul.mubr.bf16.vlgmr.msra.gmra.mxu0 %v2175_v18 }
 0x22a   : > { %2481 = vmatpush1.bf16.xpose.msra.mxu0 %v3668_v40 }
 0x22b   : > { %v2172_v62 = vpop.permute.xlu1 %2171  ;;  %2743 = vmatprep.subr.bf16.mxu0 %v3673_v60 }
 0x22c   : > { %v2177_v8 = vsel %vm1000_vm2, %v2170_v20, %v2172_v62 }
 0x22f   : > { %v2174_v13 = vpop.permute.xlu1 %2173 }
 0x230   : > { %v2178_v55 = vsel %vm1000_vm2, %v2172_v62, %v2174_v13 }
 0x231   : > { %2275 = vmatprep.mubr.bf16.mxu1 %v2178_v55 }
 0x232   : > { %2276 = vmatmul.mubr.bf16.vlgmr.msra.gmra.mxu1 %v2177_v8 }
 0x233   : > { %v2433_v44 = vpop.permute.xlu1 %2432  ;;  %2521 = vmatpush1.bf16.xpose.msra.mxu1 %v3665_v49 }
 0x234   : > { %2783 = vmatprep.subr.bf16.mxu1 %v3676_v54 }
 0x237   : > { %v2429_v31 = vpop.permute.xlu1 %2428 }
 0x23b   : > { %v2435_v6 = vpop.permute.xlu1 %2434 }
 0x23c   : > { %v2440_v56 = vsel %vm1000_vm2, %v2433_v44, %v2435_v6 }
 0x23f   : > { %v2437_v52 = vpop.permute.xlu1 %2436 }
 0x240   : > { %v2441_v3 = vsel %vm1000_vm2, %v2435_v6, %v2437_v52 }
 0x241   : > { %2538 = vmatprep.mubr.bf16.mxu1 %v2441_v3 }
 0x242   : > { %2539 = vmatmul.mubr.bf16.vlgmr.msra.gmra.mxu1 %v2440_v56 }
 0x243   : > { %2784 = vmatpush1.bf16.xpose.msra.mxu1 %v3674_v59  ;;  %v2694_v29 = vpop.permute.xlu1 %2693 }
 0x244   : > { %3518 = vmatprep.subr.mxu1 %v4124_v4 }
 0x246   : > { %v2827_v41 = vpop.xlane.xlu0 %2826 }
 0x247   : > { %v2696_v63 = vpop.permute.xlu1 %2695  ;;  %3867 = vrcp.f32 %v2827_v41 }
 0x248   : > { %v2702_v47 = vsel %vm1000_vm2, %v2694_v29, %v2696_v63 }
 0x24a   : > { %v2431_v28 = vpop.permute.xlu0 %2430 }
 0x24b   : > { %v2438_v43 = vsel %vm1000_vm2, %v2429_v31, %v2431_v28  ;;  %v2439_v0 = vsel %vm1000_vm2, %v2431_v28, %v2433_v44  ;;  %v2698_v48 = vpop.permute.xlu1 %2697 }
 0x24c   : > { %2498 = vmatprep.mubr.bf16.mxu0 %v2439_v0  ;;  %v2703_v2 = vsel %vm1000_vm2, %v2696_v63, %v2698_v48 }
 0x24d   : > { %2499 = vmatmul.mubr.bf16.vlgmr.msra.gmra.mxu0 %v2438_v43 }
 0x24e   : > { %2744 = vmatpush1.bf16.xpose.msra.mxu0 %v3671_v38  ;;  %2761 = vmatprep.mubr.bf16.mxu0 %v2702_v47  ;;  %v2692_v25 = vpop.permute.xlu0 %2691 }
 0x24f   : > { %3513 = vmatprep.subr.mxu0 %v4124_v4  ;;  %v2701_v46 = vsel %vm1000_vm2, %v2692_v25, %v2694_v29  ;;  %v3009_v25 = vlaneseq }
 0x252   : > { %v2700_v42 = vpop.permute.xlu0 %2699 }
 0x253   : > { %v2704_v51 = vsel %vm1000_vm2, %v2698_v48, %v2700_v42  ;;  %v3010_v48 = vand.u32 127, %v3009_v25 }
 0x254   : > { %2801 = vmatprep.mubr.bf16.mxu1 %v2704_v51  ;;  %v3868_v37 = vpop.eup %3867 }
 0x255   : > { %2762 = vmatmul.mubr.bf16.vlgmr.msra.gmra.mxu0 %v2701_v46  ;;  %2802 = vmatmul.mubr.bf16.vlgmr.msra.gmra.mxu1 %v2703_v2  ;;  %v2829_v57 = vmul.f32 %v3868_v37, %v5415_v22  ;;  %v3015_v51 = vadd.s32 4294967288, %v3010_v48 }
 0x256   : > { %3514 = vmatpush3.msk.msra.mxu0 %vm2834_vm8, %v2830_v50  ;;  %3519 = vmatpush3.xpose.msk.msra.mxu1 %vm591_vm10, %v5691_v58  ;;  %v3012_v50 = vshrl.u32 %v3009_v25, 7 }
 0x257   : > { %3520 = vmatprep.subr.mxu1 %v4124_v4  ;;  %3515 = vmatprep.mubr.msk.f32.mxu0 %vm4125_vm4, %v4124_v4 }
 0x258   : > { %3525 = vmatprep.subr.mxu0 %v4124_v4  ;;  %3522 = vmatprep.mubr.msk.f32.mxu1 %vm4125_vm4, %v4124_v4 }
 0x25a   : > { %3521 = vmatpush3.xpose.msk.msra.mxu1 %vm591_vm10, %v5699_v21 }
 0x25d   : > { %3516 = vmatmul.mubr.msk.f32.vlgmr.msra.gmra.mxu0 %vm2818_vm5, %v2829_v57  ;;  %3523 = vmatmul.mubr.msk.f32.vlgmr.msra.gmra.mxu1 %vm591_vm10, %v5710_v27  ;;  %vm3020_vm5 = vcmask 130112  }
 0x25e   : > { %3526 = vmatpush3.xpose.msk.msra.mxu0 %vm591_vm10, %v5712_v53  ;;  %3529 = vmatprep.mubr.msk.f32.mxu0 %vm4125_vm4, %v4124_v4 }
 0x25f   : > { %3527 = vmatprep.subr.mxu0 %v4124_v4 }
 0x262   : > { %3528 = vmatpush3.xpose.msk.msra.mxu0 %vm591_vm10, %v5701_v10 }
 0x265   : > { %3530 = vmatmul.mubr.msk.f32.vlgmr.msra.gmra.mxu0 %vm591_vm10, %v5718_v23 }
 0x283   : > { %v1063_v24 = vpop.f32.mrf.mxu0  ;;  %v3006_v2 = vpop.xlane.xlu0 %3005 }
 0x285   : > { %v1065_v22 = vpop.f32.mrf.mxu0 }
 0x286   : > { %v3003_v46 = vpop.xlane.xlu1 %3002  ;;  %v3013_v22 = vsub.s32 %v3010_v48, %v3012_v50  ;;  %v3497_v48 = vld [vmem:[%s477_s22] ss:$0 sm:$0xff]  ;;  %s4126_s22 = smov [#allocation13]  }
 0x287   : > { %v1066_v58 = vpop.f32.mrf.mxu0  ;;  %s4023_s12 = sshll.u32 %s4126_s22, 4  ;;  %s4024_s12 = int_to_ptr.vmem [resolvable:$false] %s4023_s12 }
 0x288   : > { %s4025_s3 = scalar_lea.vmem %s4024_s12, 256  ;;  %p4026_p3 = scmp.lt.s32.totalorder %s3191_s14, %s4024_s12 }
 0x289   : > { %v1067_v30 = vpop.f32.mrf.mxu0  ;;  %p4027_p2 = scmp.lt.s32.totalorder %s4025_s3, %s4019_s19 }
 0x28a   : > { %v3135_v30 = vpop.xlane.xlu0 %3134 }
 0x28b   : > { %v1103_v35 = vpop.f32.mrf.mxu1  ;;  %p4028_p4 = por %p4027_p2, %p4026_p3 }
 0x28c   : > { %v1104_v5 = vadd.f32 %v1103_v35, %v1063_v24  ;;  %v3018_v24 = vsub.s32 %v3015_v51, %v3012_v50  ;;  %v3138_v35 = vpop.xlane.xlu1 %3137 }
 0x28d   : > { %v1105_v21 = vpop.f32.mrf.mxu1  ;;  %p4029_p5 = pnand %p4028_p4, %p4022_p1 }
 0x28e   : > { %v3014_v21 = vrot.slane %v3003_v46, %v3013_v22 }
 0x28f   : > { %v1106_v45 = vpop.f32.mrf.mxu1 }
 0x290   : > { %v3144_v45 = vrot.slane %v3135_v30, %v3013_v22 }
 0x291   : > { %v1107_v17 = vpop.f32.mrf.mxu1 }
 0x292   : > { %v3148_v17 = vrot.slane %v3138_v35, %v3018_v24 }
 0x294   : > { %v1186_v39 = vpop.f32.mrf.mxu0 }
 0x295   : > { %v1187_v11 = vadd.f32 %v1186_v39, %v1104_v5  ;;  %v3019_v5 = vrot.slane %v3006_v2, %v3018_v24 }
 0x296   : > { %v1188_v61 = vpop.f32.mrf.mxu0 }
 0x297   : > { %v3000_v61 = vpop.xlane.xlu0 %2999 }
 0x298   : > { %v1189_v19 = vpop.f32.mrf.mxu0  ;;  %v1226_v4 = vpop.f32.mrf.mxu1 }
 0x299   : > { %v1227_v27 = vadd.f32 %v1226_v4, %v1187_v11  ;;  %v3021_v11 = vsel %vm3020_vm5, %v3019_v5, %v3014_v21 }
 0x29a   : > { %v1190_v53 = vpop.f32.mrf.mxu0  ;;  %v1228_v10 = vpop.f32.mrf.mxu1 }
 0x29b   : > { %v3149_v53 = vsel %vm3020_vm5, %v3148_v17, %v3144_v45 }
 0x29c   : > { %v1229_v15 = vpop.f32.mrf.mxu1 }
 0x29d   : > { %v3035_v15 = vadd.f32 %v3021_v11, %v3000_v61 }
 0x29e   : > { %v1230_v1 = vpop.f32.mrf.mxu1 }
 0x2aa   : > { %v1448_v7 = vpop.f32.mrf.mxu0 }
 0x2ac   : > { %v1450_v23 = vpop.f32.mrf.mxu0 }
 0x2ae   : > { %v1451_v33 = vpop.f32.mrf.mxu0 }
 0x2af   : > { %v1488_v16 = vpop.f32.mrf.mxu1 }
 0x2b0   : > { %v1452_v26 = vpop.f32.mrf.mxu0  ;;  %v1489_v32 = vadd.f32 %v1488_v16, %v1448_v7 }
 0x2b1   : > { %v1490_v34 = vpop.f32.mrf.mxu1 }
 0x2b2   : > { %v1494_v14 = vadd.f32 %v1489_v32, %v1227_v27  ;;  %v3132_v27 = vpop.xlane.xlu1 %3131  ;;  %v3037_v32 = vadd.f32 1.0, %v3035_v15 }
 0x2b3   : > { %v1491_v36 = vpop.f32.mrf.mxu1  ;;  %v3157_v33 = vadd.f32 %v3149_v53, %v3132_v27 }
 0x2b4   : > { %3869 = vrcp.f32 %v3037_v32 }
 0x2b5   : > { %v1492_v20 = vpop.f32.mrf.mxu1 }
 0x2b6   : > { %v3159_v20 = vadd.f32 1.0, %v3157_v33 }
 0x2b8   : > { %3871 = vrcp.f32 %v3159_v20 }
 0x2c8   : > { %v1711_v9 = vpop.f32.mrf.mxu0 }
 0x2ca   : > { %v1713_v40 = vpop.f32.mrf.mxu0 }
 0x2cb   : > { %v2810_v40 = vld [vmem:[#allocation3] sm:$0xff] }
 0x2cc   : > { %v1714_v12 = vpop.f32.mrf.mxu0 }
 0x2cd   : > { %v1751_v60 = vpop.f32.mrf.mxu1 }
 0x2ce   : > { %v1752_v18 = vadd.f32 %v1751_v60, %v1711_v9  ;;  %v1715_v62 = vpop.f32.mrf.mxu0 }
 0x2cf   : > { %v1753_v13 = vpop.f32.mrf.mxu1 }
 0x2d0   : > { %v1757_v49 = vadd.f32 %v1752_v18, %v1494_v14 }
 0x2d1   : > { %v1754_v55 = vpop.f32.mrf.mxu1 }
 0x2d3   : > { %v1755_v54 = vpop.f32.mrf.mxu1 }
 0x2d5   : > { %v1974_v8 = vpop.f32.mrf.mxu0 }
 0x2d7   : > { %v1976_v44 = vpop.f32.mrf.mxu0 }
 0x2d9   : > { %v1977_v31 = vpop.f32.mrf.mxu0 }
 0x2db   : > { %v1978_v6 = vpop.f32.mrf.mxu0 }
 0x2de   : > { %v2014_v52 = vpop.f32.mrf.mxu1 }
 0x2df   : > { %v2015_v19 = vadd.f32 %v2014_v52, %v1974_v8 }
 0x2e0   : > { %v2016_v59 = vpop.f32.mrf.mxu1 }
 0x2e1   : > { %v2020_v7 = vadd.f32 %v2015_v19, %v1757_v49 }
 0x2e2   : > { %v2017_v3 = vpop.f32.mrf.mxu1 }
 0x2e3   : > { %v3870_v3 = vpop.eup %3869 }
 0x2e4   : > { %v2018_v56 = vpop.f32.mrf.mxu1 }
 0x2e9   : > { %v2237_v29 = vpop.f32.mrf.mxu0 }
 0x2eb   : > { %v2239_v41 = vpop.f32.mrf.mxu0 }
 0x2ec   : > { %v3872_v41 = vpop.eup %3871 }
 0x2ed   : > { %v2240_v63 = vpop.f32.mrf.mxu0 }
 0x2ef   : > { %v2241_v28 = vpop.f32.mrf.mxu0 }
 0x2f2   : > { %v2277_v38 = vpop.f32.mrf.mxu1 }
 0x2f3   : > { %v2278_v10 = vadd.f32 %v2277_v38, %v2237_v29 }
 0x2f4   : > { %v2279_v43 = vpop.f32.mrf.mxu1 }
 0x2f5   : > { %v2283_v16 = vadd.f32 %v2278_v10, %v2020_v7 }
 0x2f6   : > { %v2280_v0 = vpop.f32.mrf.mxu1 }
 0x2f8   : > { %v2281_v47 = vpop.f32.mrf.mxu1 }
 0x302   : > { %v2540_v42 = vpop.f32.mrf.mxu1 }
 0x304   : > { %v2542_v37 = vpop.f32.mrf.mxu1 }
 0x306   : > { %v2543_v57 = vpop.f32.mrf.mxu1 }
 0x308   : > { %v2544_v58 = vpop.f32.mrf.mxu1 }
 0x30d   : > { %v2500_v39 = vpop.f32.mrf.mxu0 }
 0x30e   : > { %v2541_v23 = vadd.f32 %v2540_v42, %v2500_v39 }
 0x30f   : > { %v2502_v4 = vpop.f32.mrf.mxu0 }
 0x310   : > { %v2546_v36 = vadd.f32 %v2541_v23, %v2283_v16 }
 0x311   : > { %v2503_v1 = vpop.f32.mrf.mxu0 }
 0x313   : > { %v2504_v26 = vpop.f32.mrf.mxu0 }
 0x315   : > { %v2763_v34 = vpop.f32.mrf.mxu0  ;;  %v2803_v14 = vpop.f32.mrf.mxu1 }
 0x316   : > { %v2804_v9 = vadd.f32 %v2803_v14, %v2763_v34 }
 0x317   : > { %v2765_v12 = vpop.f32.mrf.mxu0  ;;  %v2805_v60 = vpop.f32.mrf.mxu1 }
 0x318   : > { %v2809_v18 = vadd.f32 %v2804_v9, %v2546_v36 }
 0x319   : > { %v2766_v62 = vpop.f32.mrf.mxu0  ;;  %v2806_v13 = vpop.f32.mrf.mxu1 }
 0x31a   : > { %v2811_v55 = vadd.f32 %v2810_v40, %v2809_v18 }
 0x31b   : > { %v2767_v49 = vpop.f32.mrf.mxu0  ;;  %v2807_v54 = vpop.f32.mrf.mxu1 }
 0x31c   : > { %2813 = vst.msk [vmem:[#allocation3] sm:$0xff] %vm591_vm10, %v2811_v55 }
 0x31d   : > { %v2904_v8 = vpop.f32.mrf.mxu0  ;;  %v2993_v44 = vpop.f32.mrf.mxu1 }
 0x31e   : > { %v2997_v52 = vmul.f32 2.0, %v2993_v44  ;;  %v2908_v42 = vsub.f32 0.0, %v2904_v8 }
 0x31f   : > { %v3517_v31 = vpop.f32.mrf.mxu0  ;;  %v3524_v6 = vpop.f32.mrf.mxu1 }
 0x320   : > { %v3036_v59 = vadd.f32 1.0, %v2997_v52 }
 0x322   : > { %v3039_v28 = vmul.f32 %v3870_v3, %v3036_v59 }
 0x323   : > { %v3164_v25 = vld [vmem:[#allocation3] sm:$0xff] }
 0x324   : > { %v3040_v0 = vsub.f32 1.0, %v3039_v28  ;;  %v3172_v51 = vmul.f32 %v3497_v48, %v3164_v25 }
 0x325   : > { %v3125_v56 = vpop.f32.mrf.mxu0 }
 0x326   : > { %v3129_v29 = vmul.f32 2.0, %v3125_v56 }
 0x327   : > { %v3531_v63 = vpop.f32.mrf.mxu0 }
 0x328   : > { %v3158_v38 = vadd.f32 1.0, %v3129_v29 }
 0x32a   : > { %v3161_v43 = vmul.f32 %v3872_v41, %v3158_v38 }
 0x32c   : > { %v3162_v47 = vsub.f32 1.0, %v3161_v43 }
 0x32e   : > { %v3163_v50 = vadd.f32 %v3162_v47, %v3040_v0 }
 0x330   : > { %v3173_v2 = vadd.f32 %v3163_v50, %v2908_v42 }
 0x332   : > { %v3174_v46 = vadd.f32 %v3173_v2, %v3172_v51 }
 0x334   : > { %3175 = vst.msk [vmem:[%s566_s27] sm:$0xff] %vm591_vm10, %v3174_v46 }
 0x335   : > { %4032 = shalt.err (!%p4029_p5)
}
 0x336   : > { %s4033_s1 = scalar_lea.hbm %s3188_s11, 128  ;;  %s4037_s18 = scalar_lea.hbm %s6089_s9, 256 }
 0x337   : > { %p4034_p6 = scmp.ne.s32.totalorder %s3188_s11, %s4033_s1  ;;  %p4038_p13 = scmp.lt.s32.totalorder %s3188_s11, %s6089_s9 }
 0x338   : > { %p4039_p8 = scmp.lt.s32.totalorder %s4037_s18, %s4033_s1 }
 0x339   : > { %p4035_p7 = pnand %p4034_p6, %p4232_p9 }
 0x33a   : > { %p4040_p12 = por %p4039_p8, %p4038_p13 }
 0x33b   : > { %p4036_p10 = pneg %p4035_p7 }
 0x33d   : > { %p4041_p0 = pnand %p4040_p12, %p4036_p10 }
 0x33f   : > { %4044 = shalt.err (!%p4041_p0)
}
 0x340   : > { %3545 = dma.vmem_to_hbm [thread:$0]  (%p4232_p9), %s3191_s14, 128, %s3188_s11, %s3177_s24  }
 0x341 PF: > { %s6090_s15 = sld [smem:[#allocation18_spill]] }
 0x342   : > { %s6092_s8 = sld [smem:[#allocation20_spill]] }
 0x347   : > { %s3202_s16 = sand.u32 1, %s6090_s15  }
 0x348   : > { %p6093_p1 = scmp.ge.s32.totalorder %s6092_s8, 2  ;;  %s3203_s20 = scalar_lea.sflag [#allocation6], %s3202_s16 }
 0x34a   : > { %p3564_p3 = pnand %p6093_p1, %p4239_p11 }
 0x34c   : > { %p3565_p2 = pneg %p3564_p3 }
 0x34e   : > { %4082 = dma.done.wait (%p3565_p2), %s3203_s20, 128  }
 0x34f   : > { %4084 = vsyncadd (%p3565_p2), %s3203_s20, 4294967168  ;;  %s31_s14 = sadd.s32 1, %s6092_s8   ;;  %s6094_s23 = sld [smem:[#allocation19_spill]] }
 0x350   : > { %p28_p4 = scmp.ge.s32.totalorder %s31_s14, 4   ;;  %s6095_s11 = sld [smem:[#allocation23_spill]] }
 0x351   : > { %s6096_s17 = sld [smem:[#allocation21_spill]]  ;;  %s6097_s30 = smov %s4091_s10 }
 0x352   : > { %s6099_s12 = smov %s4103_s13 }
 0x353   :  { %30 = sbr.rel (!%p28_p4) target bundleno = 18 (0x12), region = 176 }
 0x355   : > { %s6098_s10 = smov %s6094_s23 }
 0x357   : > { %s6100_s13 = smov %s6096_s17 }
 0x358   :  { %3208 = vsyncpa [#allocation5], 1 }
 0x359   :  { %3210 = vsyncpa [#allocation5 + $0x1], 1 }
 0x35a   :  { %3211 = vsyncpa [#allocation8], 1 }
 0x35b   :  { %3213 = vsyncpa [#allocation8 + $0x1], 1 }
 0x35c   :  { %3214 = vsyncpa [#allocation11], 1 }
 0x35d   :  { %3216 = vsyncpa [#allocation11 + $0x1], 1 }
 0x35e   :  { %3217 = vsyncpa [#allocation6], 1 }
 0x35f   :  { %3219 = vsyncpa [#allocation6 + $0x1], 1 }

</bundles_post_ra>
